<compile_context>
chip_gen: v6e
topology: v6e:2x2x1
jax: 0.10.0
libtpu: 0.0.40
codegen_flags: <defaults>
</compile_context>

<pallas_src>
import math
from functools import partial

import jax
import jax.numpy as jnp
from jax import lax
from jax.experimental import pallas as pl
from jax.experimental.pallas import tpu as pltpu

_MIB = 1 << 20


def _round_up(x, m):
    return (x + m - 1) // m * m


# ----------------------------------------------------------------------------
# Optional single-buffering of constant operands (probed once for safety).
# ----------------------------------------------------------------------------
_BUFFERED1_OK = None


def _buffered1_supported():
    global _BUFFERED1_OK
    if _BUFFERED1_OK is None:
        try:
            def _probe_kernel(x_ref, o_ref):
                o_ref[...] = x_ref[...]

            x = jnp.zeros((8, 128), jnp.float32)
            out = pl.pallas_call(
                _probe_kernel,
                out_shape=jax.ShapeDtypeStruct((8, 128), jnp.float32),
                grid=(2,),
                in_specs=[pl.BlockSpec((8, 128), lambda i: (0, 0),
                                       pipeline_mode=pl.Buffered(1))],
                out_specs=pl.BlockSpec((8, 128), lambda i: (0, 0)),
            )(x)
            jax.block_until_ready(out)
            _BUFFERED1_OK = True
        except Exception:
            _BUFFERED1_OK = False
    return _BUFFERED1_OK


def _const_spec(shape, single_buffer):
    """BlockSpec for an operand that never changes across grid steps."""
    if single_buffer:
        return pl.BlockSpec(shape, lambda k: (0, 0), pipeline_mode=pl.Buffered(1))
    return pl.BlockSpec(shape, lambda k: (0, 0))


# ----------------------------------------------------------------------------
# Pallas kernel: fused bidirectional GRU recurrence for one layer.
# Grid iterates sequentially over time chunks of T steps; the two hidden states
# live in VMEM scratch that persists across grid iterations (the recurrence).
# Inputs are the pre-computed input projections gi (bf16), with b_ih and the
# r/z thirds of b_hh already folded in.
# ----------------------------------------------------------------------------
def _bigru_kernel(gif_ref, gib_ref, whhf_ref, whhb_ref, bnf_ref, bnb_ref,
                  outf_ref, outb_ref, hf_scr, hb_scr):
    T, B, _ = gif_ref.shape
    H = whhf_ref.shape[0]
    k = pl.program_id(0)

    @pl.when(k == 0)
    def _():
        hf_scr[...] = jnp.zeros_like(hf_scr)
        hb_scr[...] = jnp.zeros_like(hb_scr)

    # Hoisted out of the time loop: weights and the n-gate recurrent bias,
    # pre-broadcast once (JAX does not CSE broadcast_in_dim under unrolling).
    w_f = whhf_ref[...]
    w_b = whhb_ref[...]
    bn_f = jnp.broadcast_to(bnf_ref[...], (B, H))
    bn_b = jnp.broadcast_to(bnb_ref[...], (B, H))

    def gru_cell(gi, h, w_hh, bn):
        # gi: (B, 3H) f32 input projection (b_ih + b_hh[r,z] folded in)
        # h : (B, H)  f32 carry.  Recurrent matmul in bf16 on the MXU, f32 accum.
        gh = jnp.dot(h.astype(jnp.bfloat16), w_hh,
                     preferred_element_type=jnp.float32)
        # H is padded to a multiple of 128, so all gate slices are lane-aligned.
        r = jax.nn.sigmoid(gi[:, 0:H] + gh[:, 0:H])
        z = jax.nn.sigmoid(gi[:, H:2 * H] + gh[:, H:2 * H])
        n = jnp.tanh(gi[:, 2 * H:3 * H] + r * (gh[:, 2 * H:3 * H] + bn))
        return (1.0 - z) * n + z * h

    def step(i, carry):
        hf, hb = carry
        # forward direction: local row i of the (forward-ordered) chunk
        hf_new = gru_cell(gif_ref[i].astype(jnp.float32), hf, w_f, bn_f)
        outf_ref[i] = hf_new.astype(outf_ref.dtype)
        # backward direction: local row T-1-i of its (time-reversed) chunk
        j = T - 1 - i
        hb_new = gru_cell(gib_ref[j].astype(jnp.float32), hb, w_b, bn_b)
        outb_ref[j] = hb_new.astype(outb_ref.dtype)
        return hf_new, hb_new

    # Modest unroll: keeps LLO scheduling benefits without blowing up vreg live
    # ranges / code size the way a full unroll of up to 128 steps would.
    hf, hb = lax.fori_loop(0, T, step, (hf_scr[...], hb_scr[...]),
                           unroll=min(8, T))
    hf_scr[...] = hf
    hb_scr[...] = hb


def _bigru_layer(gi_f, gi_b, w_hh_f, w_hh_b, b_hn_f, b_hn_b, *, max_chunk=128):
    """Fused fwd+bwd GRU recurrence over precomputed bf16 input projections.

    gi_f, gi_b: (S, Bp, 3*Hp) bf16
    w_hh_*:     (Hp, 3*Hp) bf16 (pre-transposed, zero-padded per gate)
    b_hn_*:     (1, Hp) f32 (n-gate recurrent bias only)
    returns:    out_f, out_b (S, Bp, Hp) bf16, both in natural time order.
    """
    S, Bp, G = gi_f.shape
    Hp = w_hh_f.shape[0]
    single_buffer = _buffered1_supported()

    # --- VMEM budgeting -----------------------------------------------------
    # Per grid step: double-buffered bf16 gi + out chunks for both directions,
    # plus (Hp,3Hp) bf16 recurrent weights (single-buffered when supported) and
    # two f32 hidden carries.  Budget conservatively so the kernel fits the
    # smallest VMEM generation (v7x: 64 MiB physical, 32 MiB default scoped).
    w_copies = 1 if single_buffer else 2
    weights_bytes = 2 * w_copies * Hp * 3 * Hp * 2
    scratch_bytes = 2 * Bp * Hp * 4
    bias_bytes = 2 * 2 * 8 * max(Hp, 128) * 4
    stream_per_t = 2 * 2 * Bp * (3 * Hp + Hp) * 2      # dirs x dbl-buf x (gi+out), bf16
    budget = 24 * _MIB
    t_budget = max(1, (budget - weights_bytes - scratch_bytes - bias_bytes) // stream_per_t)
    T = max(1, min(S, max_chunk, int(t_budget)))
    while S % T:                                        # largest divisor of S <= T
        T -= 1
    nT = S // T

    need = T * stream_per_t + weights_bytes + scratch_bytes + bias_bytes
    vmem_limit = int(min(need + 16 * _MIB, 48 * _MIB))

    grid_spec = pltpu.PrefetchScalarGridSpec(
        num_scalar_prefetch=0,
        grid=(nT,),
        in_specs=[
            pl.BlockSpec((T, Bp, G), lambda k: (k, 0, 0)),            # gi fwd chunk
            pl.BlockSpec((T, Bp, G), lambda k: (nT - 1 - k, 0, 0)),   # gi bwd chunk (reversed)
            _const_spec((Hp, G), single_buffer),                      # W_hh fwd (bf16)
            _const_spec((Hp, G), single_buffer),                      # W_hh bwd (bf16)
            _const_spec((1, Hp), single_buffer),                      # b_hn fwd
            _const_spec((1, Hp), single_buffer),                      # b_hn bwd
        ],
        out_specs=[
            pl.BlockSpec((T, Bp, Hp), lambda k: (k, 0, 0)),           # fwd outputs
            pl.BlockSpec((T, Bp, Hp), lambda k: (nT - 1 - k, 0, 0)),  # bwd outputs (reversed)
        ],
        scratch_shapes=[
            pltpu.VMEM((Bp, Hp), jnp.float32),   # fwd hidden carry
            pltpu.VMEM((Bp, Hp), jnp.float32),   # bwd hidden carry
        ],
    )

    out_f, out_b = pl.pallas_call(
        _bigru_kernel,
        out_shape=(jax.ShapeDtypeStruct((S, Bp, Hp), jnp.bfloat16),
                   jax.ShapeDtypeStruct((S, Bp, Hp), jnp.bfloat16)),
        grid_spec=grid_spec,
        compiler_params=pltpu.CompilerParams(
            dimension_semantics=("arbitrary",),   # sequential recurrence over time
            vmem_limit_bytes=vmem_limit),
    )(gi_f, gi_b, w_hh_f, w_hh_b, b_hn_f, b_hn_b)
    return out_f, out_b


# ----------------------------------------------------------------------------
# Parameter packing: pad H -> multiple of 128 (per gate), pre-concat fwd/bwd
# input-projection weights, fold r/z recurrent biases, cast weights to bf16.
# ----------------------------------------------------------------------------
def _pad_gates(w, H, Hp):
    """Pad the last axis (3 gate chunks of H) to 3*Hp, zero-padding each chunk."""
    parts = []
    for g in range(3):
        p = w[..., g * H:(g + 1) * H]
        pad = [(0, 0)] * (w.ndim - 1) + [(0, Hp - H)]
        parts.append(jnp.pad(p, pad))
    return jnp.concatenate(parts, axis=-1)


def _pad_rows(w, H, Hp, n_blocks):
    """Pad the first axis (n_blocks blocks of H rows) to n_blocks*Hp rows."""
    parts = []
    for g in range(n_blocks):
        p = w[g * H:(g + 1) * H]
        parts.append(jnp.pad(p, [(0, Hp - H)] + [(0, 0)] * (w.ndim - 1)))
    return jnp.concatenate(parts, axis=0)


def pack_params(params, hid_dim):
    H = hid_dim
    Hp = _round_up(H, 128)
    packed = {"embedding": params["embedding"], "layers": []}
    for layer, lp in enumerate(params["layers"]):
        w_ih_cat, b_ih_cat = [], []
        layer_packed = {}
        for d in ("fwd", "bwd"):
            p = lp[d]
            w_ih = _pad_gates(p["w_ih"], H, Hp)                       # (in, 3Hp)
            if layer > 0:
                w_ih = _pad_rows(w_ih, H, Hp, 2)                      # (2Hp, 3Hp)
            w_hh = _pad_rows(_pad_gates(p["w_hh"], H, Hp), H, Hp, 1)  # (Hp, 3Hp)
            b_ih = _pad_gates(p["b_ih"], H, Hp)                       # (1, 3Hp)
            b_hh = _pad_gates(p["b_hh"], H, Hp)                       # (1, 3Hp)
            # Fold the r/z thirds of b_hh into the hoisted input-projection bias;
            # only the n-gate third must stay inside the kernel (multiplied by r).
            b_ih_folded = b_ih.at[:, :2 * Hp].add(b_hh[:, :2 * Hp])
            layer_packed[f"w_hh_{d}"] = w_hh.astype(jnp.bfloat16)
            layer_packed[f"b_hn_{d}"] = b_hh[:, 2 * Hp:].astype(jnp.float32)
            w_ih_cat.append(w_ih)
            b_ih_cat.append(b_ih_folded)
        layer_packed["w_ih"] = jnp.concatenate(w_ih_cat, axis=1).astype(jnp.bfloat16)  # (in, 6Hp)
        layer_packed["b_ih"] = jnp.concatenate(b_ih_cat, axis=1).astype(jnp.float32)   # (1, 6Hp)
        packed["layers"].append(layer_packed)
    return packed


# ----------------------------------------------------------------------------
# Encoder forward (glue in plain JAX; sequential recurrence in Pallas)
# ----------------------------------------------------------------------------
def encoder_forward(tokens, packed, *, n_layers, hid_dim, max_chunk=128):
    H = hid_dim
    Hp = packed["layers"][0]["w_hh_fwd"].shape[0]
    B, S = tokens.shape
    Bp = _round_up(max(B, 1), 8)

    # Embedding lookup (glue gather); dropout == identity (eval mode).
    # TODO(synk): training-mode dropout masks not implemented.
    emb = jnp.take(packed["embedding"], tokens, axis=0)        # (B, S, E) f32
    x = jnp.transpose(emb, (1, 0, 2)).astype(jnp.bfloat16)     # (S, B, E) time-major
    if Bp != B:
        x = jnp.pad(x, ((0, 0), (0, Bp - B), (0, 0)))          # lane-dense batch

    h_finals = []
    out_f = out_b = None
    for layer in range(n_layers):
        lp = packed["layers"][layer]
        # Hoisted input projection for BOTH directions in one bf16 MXU matmul
        # (N = 6*Hp fills the 256-wide MXU; slices below are lane-aligned).
        gi = jnp.einsum("sbd,dg->sbg", x, lp["w_ih"],
                        preferred_element_type=jnp.float32) + lp["b_ih"]
        gi_f = gi[..., :3 * Hp].astype(jnp.bfloat16)
        gi_b = gi[..., 3 * Hp:].astype(jnp.bfloat16)

        out_f, out_b = _bigru_layer(gi_f, gi_b,
                                    lp["w_hh_fwd"], lp["w_hh_bwd"],
                                    lp["b_hn_fwd"], lp["b_hn_bwd"],
                                    max_chunk=max_chunk)
        # Final hidden states read directly from the sequence outputs.
        h_finals.extend([out_f[-1, :B, :H], out_b[0, :B, :H]])
        # Next layer consumes [out_f | out_b] directly (bf16, padded lanes = 0).
        x = jnp.concatenate([out_f, out_b], axis=-1)           # (S, Bp, 2Hp)

    outputs = jnp.concatenate([out_f[:, :B, :H], out_b[:, :B, :H]], axis=-1)
    outputs = jnp.transpose(outputs, (1, 0, 2)).astype(jnp.float32)   # (B, S, 2H)
    hidden = jnp.stack(h_finals, axis=0).astype(jnp.float32)          # (2*n_layers, B, H)
    return outputs, hidden


# ----------------------------------------------------------------------------
# Pure-JAX reference (lax.scan GRU) for correctness validation
# ----------------------------------------------------------------------------
def _reference_encoder(tokens, params, n_layers):
    x = jnp.take(params["embedding"], tokens, axis=0).astype(jnp.float32)  # (B, S, E)
    B, S, _ = x.shape
    h_finals = []
    for layer in range(n_layers):
        lp = params["layers"][layer]
        outs = []
        for direc, rev in (("fwd", False), ("bwd", True)):
            p = lp[direc]
            w_ih, w_hh, b_ih, b_hh = p["w_ih"], p["w_hh"], p["b_ih"], p["b_hh"]
            H = w_hh.shape[0]
            xs = x[:, ::-1] if rev else x

            def step(h, x_t, w_ih=w_ih, w_hh=w_hh, b_ih=b_ih, b_hh=b_hh, H=H):
                gi = x_t @ w_ih + b_ih[0]
                gh = h @ w_hh + b_hh[0]
                r = jax.nn.sigmoid(gi[:, :H] + gh[:, :H])
                z = jax.nn.sigmoid(gi[:, H:2 * H] + gh[:, H:2 * H])
                n = jnp.tanh(gi[:, 2 * H:] + r * gh[:, 2 * H:])
                h_new = (1.0 - z) * n + z * h
                return h_new, h_new

            h0 = jnp.zeros((B, H), jnp.float32)
            h_fin, ys = lax.scan(step, h0, jnp.swapaxes(xs, 0, 1))  # ys: (S, B, H)
            ys = jnp.swapaxes(ys, 0, 1)                             # (B, S, H)
            if rev:
                ys = ys[:, ::-1]
            outs.append(ys)
            h_finals.append(h_fin)
        x = jnp.concatenate(outs, axis=-1)
    return x, jnp.stack(h_finals, axis=0)


# ----------------------------------------------------------------------------
# Deterministic parameter initialization (PyTorch-equivalent, pre-transposed)
# ----------------------------------------------------------------------------
def init_params(key, vocab, emb_dim, hid_dim, n_layers):
    k_emb, key = jax.random.split(key)
    params = {
        "embedding": jax.random.normal(k_emb, (vocab, emb_dim), jnp.float32),
        "layers": [],
    }
    bound = 1.0 / math.sqrt(hid_dim)

    def uni(k, shape):
        return jax.random.uniform(k, shape, jnp.float32, -bound, bound)

    for layer in range(n_layers):
        in_dim = emb_dim if layer == 0 else 2 * hid_dim
        lp = {}
        for direc in ("fwd", "bwd"):
            key, k1, k2, k3, k4 = jax.random.split(key, 5)
            lp[direc] = {
                "w_ih": uni(k1, (in_dim, 3 * hid_dim)),    # weight_ih, pre-transposed
                "w_hh": uni(k2, (hid_dim, 3 * hid_dim)),   # weight_hh, pre-transposed
                "b_ih": uni(k3, (1, 3 * hid_dim)),
                "b_hh": uni(k4, (1, 3 * hid_dim)),
            }
        params["layers"].append(lp)
    return params


if __name__ == "__main__":
    # Small shapes consistent with the module's forward
    B, S = 2, 8
    VOCAB, EMB, HID, N_LAYERS = 50, 16, 32, 2

    key = jax.random.PRNGKey(0)
    k_tok, k_par = jax.random.split(key)
    tokens = jax.random.randint(k_tok, (B, S), 0, VOCAB, dtype=jnp.int32)
    params = init_params(k_par, VOCAB, EMB, HID, N_LAYERS)
    packed = pack_params(params, HID)

    fwd = jax.jit(partial(encoder_forward, n_layers=N_LAYERS, hid_dim=HID))
    outputs, hidden = fwd(tokens, packed)
    jax.block_until_ready((outputs, hidden))

    assert outputs.shape == (B, S, 2 * HID), outputs.shape
    assert hidden.shape == (2 * N_LAYERS, B, HID), hidden.shape
    assert bool(jnp.all(jnp.isfinite(outputs))) and bool(jnp.all(jnp.isfinite(hidden)))

    # Validate against a pure-JAX GRU reference (bf16 streaming -> looser tol).
    ref_out, ref_hid = _reference_encoder(tokens, params, N_LAYERS)
    assert jnp.allclose(outputs, ref_out, atol=3e-2, rtol=3e-2), (
        "outputs mismatch", float(jnp.max(jnp.abs(outputs - ref_out))))
    assert jnp.allclose(hidden, ref_hid, atol=3e-2, rtol=3e-2), (
        "hidden mismatch", float(jnp.max(jnp.abs(hidden - ref_hid))))

    # Also exercise the multi-chunk (nT > 1) hidden-carry path with a small chunk.
    fwd_chunked = jax.jit(partial(encoder_forward, n_layers=N_LAYERS, hid_dim=HID,
                                  max_chunk=4))
    out2, hid2 = fwd_chunked(tokens, packed)
    jax.block_until_ready((out2, hid2))
    assert jnp.allclose(out2, ref_out, atol=3e-2, rtol=3e-2), "chunked outputs mismatch"
    assert jnp.allclose(hid2, ref_hid, atol=3e-2, rtol=3e-2), "chunked hidden mismatch"

    print("KERNEL_OK")
</pallas_src>

<mosaic_0001>
module attributes {stable_mosaic.version = 11 : i64} {
  func.func @_bigru_kernel(%arg0: i32, %arg1: memref<8x8x384xbf16, #tpu.memory_space<vmem>>, %arg2: memref<8x8x384xbf16, #tpu.memory_space<vmem>>, %arg3: memref<128x384xbf16, #tpu.memory_space<vmem>>, %arg4: memref<128x384xbf16, #tpu.memory_space<vmem>>, %arg5: memref<1x128xf32, #tpu.memory_space<vmem>>, %arg6: memref<1x128xf32, #tpu.memory_space<vmem>>, %arg7: memref<8x8x128xbf16, #tpu.memory_space<vmem>>, %arg8: memref<8x8x128xbf16, #tpu.memory_space<vmem>>, %arg9: memref<8x128xf32, #tpu.memory_space<vmem>>, %arg10: memref<8x128xf32, #tpu.memory_space<vmem>>) attributes {dimension_semantics = [#tpu.dimension_semantics<arbitrary>], iteration_bounds = array<i64: 1>, scalar_prefetch = 0 : i64, scratch_operands = 2 : i64, tpu.core_type = #tpu.core_type<tc>, window_params = [{transform_indices = @transform_0, window_bounds = array<i64: 8, 8, 384>}, {transform_indices = @transform_1, window_bounds = array<i64: 8, 8, 384>}, {pipeline_mode = #tpu.pipeline_mode<synchronous>, transform_indices = @transform_2, window_bounds = array<i64: 128, 384>}, {pipeline_mode = #tpu.pipeline_mode<synchronous>, transform_indices = @transform_3, window_bounds = array<i64: 128, 384>}, {pipeline_mode = #tpu.pipeline_mode<synchronous>, transform_indices = @transform_4, window_bounds = array<i64: 1, 128>}, {pipeline_mode = #tpu.pipeline_mode<synchronous>, transform_indices = @transform_5, window_bounds = array<i64: 1, 128>}, {transform_indices = @transform_6, window_bounds = array<i64: 8, 8, 128>}, {transform_indices = @transform_7, window_bounds = array<i64: 8, 8, 128>}]} {
    %c0_i32 = arith.constant 0 : i32
    %0 = arith.cmpi eq, %arg0, %c0_i32 : i32
    %1 = arith.extui %0 : i1 to i32
    %c0_i32_0 = arith.constant 0 : i32
    %2 = arith.cmpi ne, %1, %c0_i32_0 : i32
    scf.if %2 {
      %cst_152 = arith.constant 0.000000e+00 : f32
      %631 = vector.broadcast %cst_152 : f32 to vector<8x128xf32>
      %c0_153 = arith.constant 0 : index
      %c0_154 = arith.constant 0 : index
      %632 = vector.load %arg9[%c0_153, %c0_154] : memref<8x128xf32, #tpu.memory_space<vmem>>, vector<8x128xf32>
      tpu.vector_store %arg9[%c0_153, %c0_154], %631 {strides = array<i32>} : memref<8x128xf32, #tpu.memory_space<vmem>>, vector<8x128xf32>,
      %cst_155 = arith.constant 0.000000e+00 : f32
      %633 = vector.broadcast %cst_155 : f32 to vector<8x128xf32>
      %c0_156 = arith.constant 0 : index
      %c0_157 = arith.constant 0 : index
      %634 = vector.load %arg10[%c0_156, %c0_157] : memref<8x128xf32, #tpu.memory_space<vmem>>, vector<8x128xf32>
      tpu.vector_store %arg10[%c0_156, %c0_157], %633 {strides = array<i32>} : memref<8x128xf32, #tpu.memory_space<vmem>>, vector<8x128xf32>,
    } else {
    }
    %c0 = arith.constant 0 : index
    %c0_1 = arith.constant 0 : index
    %3 = vector.load %arg3[%c0, %c0_1] : memref<128x384xbf16, #tpu.memory_space<vmem>>, vector<128x384xbf16>
    %c0_2 = arith.constant 0 : index
    %c0_3 = arith.constant 0 : index
    %4 = vector.load %arg4[%c0_2, %c0_3] : memref<128x384xbf16, #tpu.memory_space<vmem>>, vector<128x384xbf16>
    %c0_4 = arith.constant 0 : index
    %c0_5 = arith.constant 0 : index
    %5 = vector.load %arg5[%c0_4, %c0_5] : memref<1x128xf32, #tpu.memory_space<vmem>>, vector<1x128xf32>
    %6 = vector.shape_cast %5 : vector<1x128xf32> to vector<1x128xf32>
    %7 = vector.broadcast %6 : vector<1x128xf32> to vector<8x128xf32>
    %c0_6 = arith.constant 0 : index
    %c0_7 = arith.constant 0 : index
    %8 = vector.load %arg6[%c0_6, %c0_7] : memref<1x128xf32, #tpu.memory_space<vmem>>, vector<1x128xf32>
    %9 = vector.shape_cast %8 : vector<1x128xf32> to vector<1x128xf32>
    %10 = vector.broadcast %9 : vector<1x128xf32> to vector<8x128xf32>
    %c0_8 = arith.constant 0 : index
    %c0_9 = arith.constant 0 : index
    %11 = vector.load %arg9[%c0_8, %c0_9] : memref<8x128xf32, #tpu.memory_space<vmem>>, vector<8x128xf32>
    %c0_10 = arith.constant 0 : index
    %c0_11 = arith.constant 0 : index
    %12 = vector.load %arg10[%c0_10, %c0_11] : memref<8x128xf32, #tpu.memory_space<vmem>>, vector<8x128xf32>
    %c0_i32_12 = arith.constant 0 : i32
    %13 = arith.index_cast %c0_i32_12 : i32 to index
    %c0_13 = arith.constant 0 : index
    %c0_14 = arith.constant 0 : index
    %14 = vector.load %arg1[%13, %c0_13, %c0_14] : memref<8x8x384xbf16, #tpu.memory_space<vmem>>, vector<1x8x384xbf16>
    %15 = vector.shape_cast %14 : vector<1x8x384xbf16> to vector<8x384xbf16>
    %16 = arith.extf %15 : vector<8x384xbf16> to vector<8x384xf32>
    %17 = arith.truncf %11 : vector<8x128xf32> to vector<8x128xbf16>
    %cst = arith.constant dense<0.000000e+00> : vector<8x384xf32>
    %18 = tpu.matmul %17, %3, %cst {dimension_numbers = #tpu.dot_dimension_numbers<[1], [0], [0], [1], [0, 0, 1, 1], [], []>} : vector<8x128xbf16>, vector<128x384xbf16>, vector<8x384xf32> -> vector<8x384xf32>
    %19 = vector.extract_strided_slice %16 {offsets = [0, 0], sizes = [8, 128], strides = [1, 1]} : vector<8x384xf32> to vector<8x128xf32>
    %20 = vector.extract_strided_slice %18 {offsets = [0, 0], sizes = [8, 128], strides = [1, 1]} : vector<8x384xf32> to vector<8x128xf32>
    %21 = arith.addf %19, %20 : vector<8x128xf32>
    %22 = arith.negf %21 : vector<8x128xf32>
    %23 = math.exp %22 : vector<8x128xf32>
    %cst_15 = arith.constant 1.000000e+00 : f32
    %24 = vector.broadcast %cst_15 : f32 to vector<8x128xf32>
    %25 = arith.addf %24, %23 : vector<8x128xf32>
    %26 = arith.divf %24, %25 : vector<8x128xf32>
    %27 = vector.extract_strided_slice %16 {offsets = [0, 128], sizes = [8, 128], strides = [1, 1]} : vector<8x384xf32> to vector<8x128xf32>
    %28 = vector.extract_strided_slice %18 {offsets = [0, 128], sizes = [8, 128], strides = [1, 1]} : vector<8x384xf32> to vector<8x128xf32>
    %29 = arith.addf %27, %28 : vector<8x128xf32>
    %30 = arith.negf %29 : vector<8x128xf32>
    %31 = math.exp %30 : vector<8x128xf32>
    %cst_16 = arith.constant 1.000000e+00 : f32
    %32 = vector.broadcast %cst_16 : f32 to vector<8x128xf32>
    %33 = arith.addf %32, %31 : vector<8x128xf32>
    %34 = arith.divf %32, %33 : vector<8x128xf32>
    %35 = vector.extract_strided_slice %16 {offsets = [0, 256], sizes = [8, 128], strides = [1, 1]} : vector<8x384xf32> to vector<8x128xf32>
    %36 = vector.extract_strided_slice %18 {offsets = [0, 256], sizes = [8, 128], strides = [1, 1]} : vector<8x384xf32> to vector<8x128xf32>
    %37 = arith.addf %36, %7 : vector<8x128xf32>
    %38 = arith.mulf %26, %37 : vector<8x128xf32>
    %39 = arith.addf %35, %38 : vector<8x128xf32>
    %40 = math.tanh %39 : vector<8x128xf32>
    %cst_17 = arith.constant 1.000000e+00 : f32
    %41 = vector.broadcast %cst_17 : f32 to vector<8x128xf32>
    %42 = arith.subf %41, %34 : vector<8x128xf32>
    %43 = arith.mulf %42, %40 : vector<8x128xf32>
    %44 = arith.mulf %34, %11 : vector<8x128xf32>
    %45 = arith.addf %43, %44 : vector<8x128xf32>
    %46 = arith.truncf %45 : vector<8x128xf32> to vector<8x128xbf16>
    %47 = arith.index_cast %c0_i32_12 : i32 to index
    %c0_18 = arith.constant 0 : index
    %c0_19 = arith.constant 0 : index
    %48 = vector.load %arg7[%47, %c0_18, %c0_19] : memref<8x8x128xbf16, #tpu.memory_space<vmem>>, vector<1x8x128xbf16>
    %49 = vector.shape_cast %48 : vector<1x8x128xbf16> to vector<8x128xbf16>
    %50 = vector.shape_cast %46 : vector<8x128xbf16> to vector<1x8x128xbf16>
    tpu.vector_store %arg7[%47, %c0_18, %c0_19], %50 {strides = array<i32>} : memref<8x8x128xbf16, #tpu.memory_space<vmem>>, vector<1x8x128xbf16>,
    %c7_i32 = arith.constant 7 : i32
    %51 = arith.subi %c7_i32, %c0_i32_12 : i32
    %52 = arith.index_cast %51 : i32 to index
    %c0_20 = arith.constant 0 : index
    %c0_21 = arith.constant 0 : index
    %53 = vector.load %arg2[%52, %c0_20, %c0_21] : memref<8x8x384xbf16, #tpu.memory_space<vmem>>, vector<1x8x384xbf16>
    %54 = vector.shape_cast %53 : vector<1x8x384xbf16> to vector<8x384xbf16>
    %55 = arith.extf %54 : vector<8x384xbf16> to vector<8x384xf32>
    %56 = arith.truncf %12 : vector<8x128xf32> to vector<8x128xbf16>
    %cst_22 = arith.constant dense<0.000000e+00> : vector<8x384xf32>
    %57 = tpu.matmul %56, %4, %cst_22 {dimension_numbers = #tpu.dot_dimension_numbers<[1], [0], [0], [1], [0, 0, 1, 1], [], []>} : vector<8x128xbf16>, vector<128x384xbf16>, vector<8x384xf32> -> vector<8x384xf32>
    %58 = vector.extract_strided_slice %55 {offsets = [0, 0], sizes = [8, 128], strides = [1, 1]} : vector<8x384xf32> to vector<8x128xf32>
    %59 = vector.extract_strided_slice %57 {offsets = [0, 0], sizes = [8, 128], strides = [1, 1]} : vector<8x384xf32> to vector<8x128xf32>
    %60 = arith.addf %58, %59 : vector<8x128xf32>
    %61 = arith.negf %60 : vector<8x128xf32>
    %62 = math.exp %61 : vector<8x128xf32>
    %cst_23 = arith.constant 1.000000e+00 : f32
    %63 = vector.broadcast %cst_23 : f32 to vector<8x128xf32>
    %64 = arith.addf %63, %62 : vector<8x128xf32>
    %65 = arith.divf %63, %64 : vector<8x128xf32>
    %66 = vector.extract_strided_slice %55 {offsets = [0, 128], sizes = [8, 128], strides = [1, 1]} : vector<8x384xf32> to vector<8x128xf32>
    %67 = vector.extract_strided_slice %57 {offsets = [0, 128], sizes = [8, 128], strides = [1, 1]} : vector<8x384xf32> to vector<8x128xf32>
    %68 = arith.addf %66, %67 : vector<8x128xf32>
    %69 = arith.negf %68 : vector<8x128xf32>
    %70 = math.exp %69 : vector<8x128xf32>
    %cst_24 = arith.constant 1.000000e+00 : f32
    %71 = vector.broadcast %cst_24 : f32 to vector<8x128xf32>
    %72 = arith.addf %71, %70 : vector<8x128xf32>
    %73 = arith.divf %71, %72 : vector<8x128xf32>
    %74 = vector.extract_strided_slice %55 {offsets = [0, 256], sizes = [8, 128], strides = [1, 1]} : vector<8x384xf32> to vector<8x128xf32>
    %75 = vector.extract_strided_slice %57 {offsets = [0, 256], sizes = [8, 128], strides = [1, 1]} : vector<8x384xf32> to vector<8x128xf32>
    %76 = arith.addf %75, %10 : vector<8x128xf32>
    %77 = arith.mulf %65, %76 : vector<8x128xf32>
    %78 = arith.addf %74, %77 : vector<8x128xf32>
    %79 = math.tanh %78 : vector<8x128xf32>
    %cst_25 = arith.constant 1.000000e+00 : f32
    %80 = vector.broadcast %cst_25 : f32 to vector<8x128xf32>
    %81 = arith.subf %80, %73 : vector<8x128xf32>
    %82 = arith.mulf %81, %79 : vector<8x128xf32>
    %83 = arith.mulf %73, %12 : vector<8x128xf32>
    %84 = arith.addf %82, %83 : vector<8x128xf32>
    %85 = arith.truncf %84 : vector<8x128xf32> to vector<8x128xbf16>
    %86 = arith.index_cast %51 : i32 to index
    %c0_26 = arith.constant 0 : index
    %c0_27 = arith.constant 0 : index
    %87 = vector.load %arg8[%86, %c0_26, %c0_27] : memref<8x8x128xbf16, #tpu.memory_space<vmem>>, vector<1x8x128xbf16>
    %88 = vector.shape_cast %87 : vector<1x8x128xbf16> to vector<8x128xbf16>
    %89 = vector.shape_cast %85 : vector<8x128xbf16> to vector<1x8x128xbf16>
    tpu.vector_store %arg8[%86, %c0_26, %c0_27], %89 {strides = array<i32>} : memref<8x8x128xbf16, #tpu.memory_space<vmem>>, vector<1x8x128xbf16>,
    %c1_i32 = arith.constant 1 : i32
    %90 = arith.index_cast %c1_i32 : i32 to index
    %c0_28 = arith.constant 0 : index
    %c0_29 = arith.constant 0 : index
    %91 = vector.load %arg1[%90, %c0_28, %c0_29] : memref<8x8x384xbf16, #tpu.memory_space<vmem>>, vector<1x8x384xbf16>
    %92 = vector.shape_cast %91 : vector<1x8x384xbf16> to vector<8x384xbf16>
    %93 = arith.extf %92 : vector<8x384xbf16> to vector<8x384xf32>
    %94 = arith.truncf %45 : vector<8x128xf32> to vector<8x128xbf16>
    %cst_30 = arith.constant dense<0.000000e+00> : vector<8x384xf32>
    %95 = tpu.matmul %94, %3, %cst_30 {dimension_numbers = #tpu.dot_dimension_numbers<[1], [0], [0], [1], [0, 0, 1, 1], [], []>} : vector<8x128xbf16>, vector<128x384xbf16>, vector<8x384xf32> -> vector<8x384xf32>
    %96 = vector.extract_strided_slice %93 {offsets = [0, 0], sizes = [8, 128], strides = [1, 1]} : vector<8x384xf32> to vector<8x128xf32>
    %97 = vector.extract_strided_slice %95 {offsets = [0, 0], sizes = [8, 128], strides = [1, 1]} : vector<8x384xf32> to vector<8x128xf32>
    %98 = arith.addf %96, %97 : vector<8x128xf32>
    %99 = arith.negf %98 : vector<8x128xf32>
    %100 = math.exp %99 : vector<8x128xf32>
    %cst_31 = arith.constant 1.000000e+00 : f32
    %101 = vector.broadcast %cst_31 : f32 to vector<8x128xf32>
    %102 = arith.addf %101, %100 : vector<8x128xf32>
    %103 = arith.divf %101, %102 : vector<8x128xf32>
    %104 = vector.extract_strided_slice %93 {offsets = [0, 128], sizes = [8, 128], strides = [1, 1]} : vector<8x384xf32> to vector<8x128xf32>
    %105 = vector.extract_strided_slice %95 {offsets = [0, 128], sizes = [8, 128], strides = [1, 1]} : vector<8x384xf32> to vector<8x128xf32>
    %106 = arith.addf %104, %105 : vector<8x128xf32>
    %107 = arith.negf %106 : vector<8x128xf32>
    %108 = math.exp %107 : vector<8x128xf32>
    %cst_32 = arith.constant 1.000000e+00 : f32
    %109 = vector.broadcast %cst_32 : f32 to vector<8x128xf32>
    %110 = arith.addf %109, %108 : vector<8x128xf32>
    %111 = arith.divf %109, %110 : vector<8x128xf32>
    %112 = vector.extract_strided_slice %93 {offsets = [0, 256], sizes = [8, 128], strides = [1, 1]} : vector<8x384xf32> to vector<8x128xf32>
    %113 = vector.extract_strided_slice %95 {offsets = [0, 256], sizes = [8, 128], strides = [1, 1]} : vector<8x384xf32> to vector<8x128xf32>
    %114 = arith.addf %113, %7 : vector<8x128xf32>
    %115 = arith.mulf %103, %114 : vector<8x128xf32>
    %116 = arith.addf %112, %115 : vector<8x128xf32>
    %117 = math.tanh %116 : vector<8x128xf32>
    %cst_33 = arith.constant 1.000000e+00 : f32
    %118 = vector.broadcast %cst_33 : f32 to vector<8x128xf32>
    %119 = arith.subf %118, %111 : vector<8x128xf32>
    %120 = arith.mulf %119, %117 : vector<8x128xf32>
    %121 = arith.mulf %111, %45 : vector<8x128xf32>
    %122 = arith.addf %120, %121 : vector<8x128xf32>
    %123 = arith.truncf %122 : vector<8x128xf32> to vector<8x128xbf16>
    %124 = arith.index_cast %c1_i32 : i32 to index
    %c0_34 = arith.constant 0 : index
    %c0_35 = arith.constant 0 : index
    %125 = vector.load %arg7[%124, %c0_34, %c0_35] : memref<8x8x128xbf16, #tpu.memory_space<vmem>>, vector<1x8x128xbf16>
    %126 = vector.shape_cast %125 : vector<1x8x128xbf16> to vector<8x128xbf16>
    %127 = vector.shape_cast %123 : vector<8x128xbf16> to vector<1x8x128xbf16>
    tpu.vector_store %arg7[%124, %c0_34, %c0_35], %127 {strides = array<i32>} : memref<8x8x128xbf16, #tpu.memory_space<vmem>>, vector<1x8x128xbf16>,
    %c7_i32_36 = arith.constant 7 : i32
    %128 = arith.subi %c7_i32_36, %c1_i32 : i32
    %129 = arith.index_cast %128 : i32 to index
    %c0_37 = arith.constant 0 : index
    %c0_38 = arith.constant 0 : index
    %130 = vector.load %arg2[%129, %c0_37, %c0_38] : memref<8x8x384xbf16, #tpu.memory_space<vmem>>, vector<1x8x384xbf16>
    %131 = vector.shape_cast %130 : vector<1x8x384xbf16> to vector<8x384xbf16>
    %132 = arith.extf %131 : vector<8x384xbf16> to vector<8x384xf32>
    %133 = arith.truncf %84 : vector<8x128xf32> to vector<8x128xbf16>
    %cst_39 = arith.constant dense<0.000000e+00> : vector<8x384xf32>
    %134 = tpu.matmul %133, %4, %cst_39 {dimension_numbers = #tpu.dot_dimension_numbers<[1], [0], [0], [1], [0, 0, 1, 1], [], []>} : vector<8x128xbf16>, vector<128x384xbf16>, vector<8x384xf32> -> vector<8x384xf32>
    %135 = vector.extract_strided_slice %132 {offsets = [0, 0], sizes = [8, 128], strides = [1, 1]} : vector<8x384xf32> to vector<8x128xf32>
    %136 = vector.extract_strided_slice %134 {offsets = [0, 0], sizes = [8, 128], strides = [1, 1]} : vector<8x384xf32> to vector<8x128xf32>
    %137 = arith.addf %135, %136 : vector<8x128xf32>
    %138 = arith.negf %137 : vector<8x128xf32>
    %139 = math.exp %138 : vector<8x128xf32>
    %cst_40 = arith.constant 1.000000e+00 : f32
    %140 = vector.broadcast %cst_40 : f32 to vector<8x128xf32>
    %141 = arith.addf %140, %139 : vector<8x128xf32>
    %142 = arith.divf %140, %141 : vector<8x128xf32>
    %143 = vector.extract_strided_slice %132 {offsets = [0, 128], sizes = [8, 128], strides = [1, 1]} : vector<8x384xf32> to vector<8x128xf32>
    %144 = vector.extract_strided_slice %134 {offsets = [0, 128], sizes = [8, 128], strides = [1, 1]} : vector<8x384xf32> to vector<8x128xf32>
    %145 = arith.addf %143, %144 : vector<8x128xf32>
    %146 = arith.negf %145 : vector<8x128xf32>
    %147 = math.exp %146 : vector<8x128xf32>
    %cst_41 = arith.constant 1.000000e+00 : f32
    %148 = vector.broadcast %cst_41 : f32 to vector<8x128xf32>
    %149 = arith.addf %148, %147 : vector<8x128xf32>
    %150 = arith.divf %148, %149 : vector<8x128xf32>
    %151 = vector.extract_strided_slice %132 {offsets = [0, 256], sizes = [8, 128], strides = [1, 1]} : vector<8x384xf32> to vector<8x128xf32>
    %152 = vector.extract_strided_slice %134 {offsets = [0, 256], sizes = [8, 128], strides = [1, 1]} : vector<8x384xf32> to vector<8x128xf32>
    %153 = arith.addf %152, %10 : vector<8x128xf32>
    %154 = arith.mulf %142, %153 : vector<8x128xf32>
    %155 = arith.addf %151, %154 : vector<8x128xf32>
    %156 = math.tanh %155 : vector<8x128xf32>
    %cst_42 = arith.constant 1.000000e+00 : f32
    %157 = vector.broadcast %cst_42 : f32 to vector<8x128xf32>
    %158 = arith.subf %157, %150 : vector<8x128xf32>
    %159 = arith.mulf %158, %156 : vector<8x128xf32>
    %160 = arith.mulf %150, %84 : vector<8x128xf32>
    %161 = arith.addf %159, %160 : vector<8x128xf32>
    %162 = arith.truncf %161 : vector<8x128xf32> to vector<8x128xbf16>
    %163 = arith.index_cast %128 : i32 to index
    %c0_43 = arith.constant 0 : index
    %c0_44 = arith.constant 0 : index
    %164 = vector.load %arg8[%163, %c0_43, %c0_44] : memref<8x8x128xbf16, #tpu.memory_space<vmem>>, vector<1x8x128xbf16>
    %165 = vector.shape_cast %164 : vector<1x8x128xbf16> to vector<8x128xbf16>
    %166 = vector.shape_cast %162 : vector<8x128xbf16> to vector<1x8x128xbf16>
    tpu.vector_store %arg8[%163, %c0_43, %c0_44], %166 {strides = array<i32>} : memref<8x8x128xbf16, #tpu.memory_space<vmem>>, vector<1x8x128xbf16>,
    %c2_i32 = arith.constant 2 : i32
    %167 = arith.index_cast %c2_i32 : i32 to index
    %c0_45 = arith.constant 0 : index
    %c0_46 = arith.constant 0 : index
    %168 = vector.load %arg1[%167, %c0_45, %c0_46] : memref<8x8x384xbf16, #tpu.memory_space<vmem>>, vector<1x8x384xbf16>
    %169 = vector.shape_cast %168 : vector<1x8x384xbf16> to vector<8x384xbf16>
    %170 = arith.extf %169 : vector<8x384xbf16> to vector<8x384xf32>
    %171 = arith.truncf %122 : vector<8x128xf32> to vector<8x128xbf16>
    %cst_47 = arith.constant dense<0.000000e+00> : vector<8x384xf32>
    %172 = tpu.matmul %171, %3, %cst_47 {dimension_numbers = #tpu.dot_dimension_numbers<[1], [0], [0], [1], [0, 0, 1, 1], [], []>} : vector<8x128xbf16>, vector<128x384xbf16>, vector<8x384xf32> -> vector<8x384xf32>
    %173 = vector.extract_strided_slice %170 {offsets = [0, 0], sizes = [8, 128], strides = [1, 1]} : vector<8x384xf32> to vector<8x128xf32>
    %174 = vector.extract_strided_slice %172 {offsets = [0, 0], sizes = [8, 128], strides = [1, 1]} : vector<8x384xf32> to vector<8x128xf32>
    %175 = arith.addf %173, %174 : vector<8x128xf32>
    %176 = arith.negf %175 : vector<8x128xf32>
    %177 = math.exp %176 : vector<8x128xf32>
    %cst_48 = arith.constant 1.000000e+00 : f32
    %178 = vector.broadcast %cst_48 : f32 to vector<8x128xf32>
    %179 = arith.addf %178, %177 : vector<8x128xf32>
    %180 = arith.divf %178, %179 : vector<8x128xf32>
    %181 = vector.extract_strided_slice %170 {offsets = [0, 128], sizes = [8, 128], strides = [1, 1]} : vector<8x384xf32> to vector<8x128xf32>
    %182 = vector.extract_strided_slice %172 {offsets = [0, 128], sizes = [8, 128], strides = [1, 1]} : vector<8x384xf32> to vector<8x128xf32>
    %183 = arith.addf %181, %182 : vector<8x128xf32>
    %184 = arith.negf %183 : vector<8x128xf32>
    %185 = math.exp %184 : vector<8x128xf32>
    %cst_49 = arith.constant 1.000000e+00 : f32
    %186 = vector.broadcast %cst_49 : f32 to vector<8x128xf32>
    %187 = arith.addf %186, %185 : vector<8x128xf32>
    %188 = arith.divf %186, %187 : vector<8x128xf32>
    %189 = vector.extract_strided_slice %170 {offsets = [0, 256], sizes = [8, 128], strides = [1, 1]} : vector<8x384xf32> to vector<8x128xf32>
    %190 = vector.extract_strided_slice %172 {offsets = [0, 256], sizes = [8, 128], strides = [1, 1]} : vector<8x384xf32> to vector<8x128xf32>
    %191 = arith.addf %190, %7 : vector<8x128xf32>
    %192 = arith.mulf %180, %191 : vector<8x128xf32>
    %193 = arith.addf %189, %192 : vector<8x128xf32>
    %194 = math.tanh %193 : vector<8x128xf32>
    %cst_50 = arith.constant 1.000000e+00 : f32
    %195 = vector.broadcast %cst_50 : f32 to vector<8x128xf32>
    %196 = arith.subf %195, %188 : vector<8x128xf32>
    %197 = arith.mulf %196, %194 : vector<8x128xf32>
    %198 = arith.mulf %188, %122 : vector<8x128xf32>
    %199 = arith.addf %197, %198 : vector<8x128xf32>
    %200 = arith.truncf %199 : vector<8x128xf32> to vector<8x128xbf16>
    %201 = arith.index_cast %c2_i32 : i32 to index
    %c0_51 = arith.constant 0 : index
    %c0_52 = arith.constant 0 : index
    %202 = vector.load %arg7[%201, %c0_51, %c0_52] : memref<8x8x128xbf16, #tpu.memory_space<vmem>>, vector<1x8x128xbf16>
    %203 = vector.shape_cast %202 : vector<1x8x128xbf16> to vector<8x128xbf16>
    %204 = vector.shape_cast %200 : vector<8x128xbf16> to vector<1x8x128xbf16>
    tpu.vector_store %arg7[%201, %c0_51, %c0_52], %204 {strides = array<i32>} : memref<8x8x128xbf16, #tpu.memory_space<vmem>>, vector<1x8x128xbf16>,
    %c7_i32_53 = arith.constant 7 : i32
    %205 = arith.subi %c7_i32_53, %c2_i32 : i32
    %206 = arith.index_cast %205 : i32 to index
    %c0_54 = arith.constant 0 : index
    %c0_55 = arith.constant 0 : index
    %207 = vector.load %arg2[%206, %c0_54, %c0_55] : memref<8x8x384xbf16, #tpu.memory_space<vmem>>, vector<1x8x384xbf16>
    %208 = vector.shape_cast %207 : vector<1x8x384xbf16> to vector<8x384xbf16>
    %209 = arith.extf %208 : vector<8x384xbf16> to vector<8x384xf32>
    %210 = arith.truncf %161 : vector<8x128xf32> to vector<8x128xbf16>
    %cst_56 = arith.constant dense<0.000000e+00> : vector<8x384xf32>
    %211 = tpu.matmul %210, %4, %cst_56 {dimension_numbers = #tpu.dot_dimension_numbers<[1], [0], [0], [1], [0, 0, 1, 1], [], []>} : vector<8x128xbf16>, vector<128x384xbf16>, vector<8x384xf32> -> vector<8x384xf32>
    %212 = vector.extract_strided_slice %209 {offsets = [0, 0], sizes = [8, 128], strides = [1, 1]} : vector<8x384xf32> to vector<8x128xf32>
    %213 = vector.extract_strided_slice %211 {offsets = [0, 0], sizes = [8, 128], strides = [1, 1]} : vector<8x384xf32> to vector<8x128xf32>
    %214 = arith.addf %212, %213 : vector<8x128xf32>
    %215 = arith.negf %214 : vector<8x128xf32>
    %216 = math.exp %215 : vector<8x128xf32>
    %cst_57 = arith.constant 1.000000e+00 : f32
    %217 = vector.broadcast %cst_57 : f32 to vector<8x128xf32>
    %218 = arith.addf %217, %216 : vector<8x128xf32>
    %219 = arith.divf %217, %218 : vector<8x128xf32>
    %220 = vector.extract_strided_slice %209 {offsets = [0, 128], sizes = [8, 128], strides = [1, 1]} : vector<8x384xf32> to vector<8x128xf32>
    %221 = vector.extract_strided_slice %211 {offsets = [0, 128], sizes = [8, 128], strides = [1, 1]} : vector<8x384xf32> to vector<8x128xf32>
    %222 = arith.addf %220, %221 : vector<8x128xf32>
    %223 = arith.negf %222 : vector<8x128xf32>
    %224 = math.exp %223 : vector<8x128xf32>
    %cst_58 = arith.constant 1.000000e+00 : f32
    %225 = vector.broadcast %cst_58 : f32 to vector<8x128xf32>
    %226 = arith.addf %225, %224 : vector<8x128xf32>
    %227 = arith.divf %225, %226 : vector<8x128xf32>
    %228 = vector.extract_strided_slice %209 {offsets = [0, 256], sizes = [8, 128], strides = [1, 1]} : vector<8x384xf32> to vector<8x128xf32>
    %229 = vector.extract_strided_slice %211 {offsets = [0, 256], sizes = [8, 128], strides = [1, 1]} : vector<8x384xf32> to vector<8x128xf32>
    %230 = arith.addf %229, %10 : vector<8x128xf32>
    %231 = arith.mulf %219, %230 : vector<8x128xf32>
    %232 = arith.addf %228, %231 : vector<8x128xf32>
    %233 = math.tanh %232 : vector<8x128xf32>
    %cst_59 = arith.constant 1.000000e+00 : f32
    %234 = vector.broadcast %cst_59 : f32 to vector<8x128xf32>
    %235 = arith.subf %234, %227 : vector<8x128xf32>
    %236 = arith.mulf %235, %233 : vector<8x128xf32>
    %237 = arith.mulf %227, %161 : vector<8x128xf32>
    %238 = arith.addf %236, %237 : vector<8x128xf32>
    %239 = arith.truncf %238 : vector<8x128xf32> to vector<8x128xbf16>
    %240 = arith.index_cast %205 : i32 to index
    %c0_60 = arith.constant 0 : index
    %c0_61 = arith.constant 0 : index
    %241 = vector.load %arg8[%240, %c0_60, %c0_61] : memref<8x8x128xbf16, #tpu.memory_space<vmem>>, vector<1x8x128xbf16>
    %242 = vector.shape_cast %241 : vector<1x8x128xbf16> to vector<8x128xbf16>
    %243 = vector.shape_cast %239 : vector<8x128xbf16> to vector<1x8x128xbf16>
    tpu.vector_store %arg8[%240, %c0_60, %c0_61], %243 {strides = array<i32>} : memref<8x8x128xbf16, #tpu.memory_space<vmem>>, vector<1x8x128xbf16>,
    %c3_i32 = arith.constant 3 : i32
    %244 = arith.index_cast %c3_i32 : i32 to index
    %c0_62 = arith.constant 0 : index
    %c0_63 = arith.constant 0 : index
    %245 = vector.load %arg1[%244, %c0_62, %c0_63] : memref<8x8x384xbf16, #tpu.memory_space<vmem>>, vector<1x8x384xbf16>
    %246 = vector.shape_cast %245 : vector<1x8x384xbf16> to vector<8x384xbf16>
    %247 = arith.extf %246 : vector<8x384xbf16> to vector<8x384xf32>
    %248 = arith.truncf %199 : vector<8x128xf32> to vector<8x128xbf16>
    %cst_64 = arith.constant dense<0.000000e+00> : vector<8x384xf32>
    %249 = tpu.matmul %248, %3, %cst_64 {dimension_numbers = #tpu.dot_dimension_numbers<[1], [0], [0], [1], [0, 0, 1, 1], [], []>} : vector<8x128xbf16>, vector<128x384xbf16>, vector<8x384xf32> -> vector<8x384xf32>
    %250 = vector.extract_strided_slice %247 {offsets = [0, 0], sizes = [8, 128], strides = [1, 1]} : vector<8x384xf32> to vector<8x128xf32>
    %251 = vector.extract_strided_slice %249 {offsets = [0, 0], sizes = [8, 128], strides = [1, 1]} : vector<8x384xf32> to vector<8x128xf32>
    %252 = arith.addf %250, %251 : vector<8x128xf32>
    %253 = arith.negf %252 : vector<8x128xf32>
    %254 = math.exp %253 : vector<8x128xf32>
    %cst_65 = arith.constant 1.000000e+00 : f32
    %255 = vector.broadcast %cst_65 : f32 to vector<8x128xf32>
    %256 = arith.addf %255, %254 : vector<8x128xf32>
    %257 = arith.divf %255, %256 : vector<8x128xf32>
    %258 = vector.extract_strided_slice %247 {offsets = [0, 128], sizes = [8, 128], strides = [1, 1]} : vector<8x384xf32> to vector<8x128xf32>
    %259 = vector.extract_strided_slice %249 {offsets = [0, 128], sizes = [8, 128], strides = [1, 1]} : vector<8x384xf32> to vector<8x128xf32>
    %260 = arith.addf %258, %259 : vector<8x128xf32>
    %261 = arith.negf %260 : vector<8x128xf32>
    %262 = math.exp %261 : vector<8x128xf32>
    %cst_66 = arith.constant 1.000000e+00 : f32
    %263 = vector.broadcast %cst_66 : f32 to vector<8x128xf32>
    %264 = arith.addf %263, %262 : vector<8x128xf32>
    %265 = arith.divf %263, %264 : vector<8x128xf32>
    %266 = vector.extract_strided_slice %247 {offsets = [0, 256], sizes = [8, 128], strides = [1, 1]} : vector<8x384xf32> to vector<8x128xf32>
    %267 = vector.extract_strided_slice %249 {offsets = [0, 256], sizes = [8, 128], strides = [1, 1]} : vector<8x384xf32> to vector<8x128xf32>
    %268 = arith.addf %267, %7 : vector<8x128xf32>
    %269 = arith.mulf %257, %268 : vector<8x128xf32>
    %270 = arith.addf %266, %269 : vector<8x128xf32>
    %271 = math.tanh %270 : vector<8x128xf32>
    %cst_67 = arith.constant 1.000000e+00 : f32
    %272 = vector.broadcast %cst_67 : f32 to vector<8x128xf32>
    %273 = arith.subf %272, %265 : vector<8x128xf32>
    %274 = arith.mulf %273, %271 : vector<8x128xf32>
    %275 = arith.mulf %265, %199 : vector<8x128xf32>
    %276 = arith.addf %274, %275 : vector<8x128xf32>
    %277 = arith.truncf %276 : vector<8x128xf32> to vector<8x128xbf16>
    %278 = arith.index_cast %c3_i32 : i32 to index
    %c0_68 = arith.constant 0 : index
    %c0_69 = arith.constant 0 : index
    %279 = vector.load %arg7[%278, %c0_68, %c0_69] : memref<8x8x128xbf16, #tpu.memory_space<vmem>>, vector<1x8x128xbf16>
    %280 = vector.shape_cast %279 : vector<1x8x128xbf16> to vector<8x128xbf16>
    %281 = vector.shape_cast %277 : vector<8x128xbf16> to vector<1x8x128xbf16>
    tpu.vector_store %arg7[%278, %c0_68, %c0_69], %281 {strides = array<i32>} : memref<8x8x128xbf16, #tpu.memory_space<vmem>>, vector<1x8x128xbf16>,
    %c7_i32_70 = arith.constant 7 : i32
    %282 = arith.subi %c7_i32_70, %c3_i32 : i32
    %283 = arith.index_cast %282 : i32 to index
    %c0_71 = arith.constant 0 : index
    %c0_72 = arith.constant 0 : index
    %284 = vector.load %arg2[%283, %c0_71, %c0_72] : memref<8x8x384xbf16, #tpu.memory_space<vmem>>, vector<1x8x384xbf16>
    %285 = vector.shape_cast %284 : vector<1x8x384xbf16> to vector<8x384xbf16>
    %286 = arith.extf %285 : vector<8x384xbf16> to vector<8x384xf32>
    %287 = arith.truncf %238 : vector<8x128xf32> to vector<8x128xbf16>
    %cst_73 = arith.constant dense<0.000000e+00> : vector<8x384xf32>
    %288 = tpu.matmul %287, %4, %cst_73 {dimension_numbers = #tpu.dot_dimension_numbers<[1], [0], [0], [1], [0, 0, 1, 1], [], []>} : vector<8x128xbf16>, vector<128x384xbf16>, vector<8x384xf32> -> vector<8x384xf32>
    %289 = vector.extract_strided_slice %286 {offsets = [0, 0], sizes = [8, 128], strides = [1, 1]} : vector<8x384xf32> to vector<8x128xf32>
    %290 = vector.extract_strided_slice %288 {offsets = [0, 0], sizes = [8, 128], strides = [1, 1]} : vector<8x384xf32> to vector<8x128xf32>
    %291 = arith.addf %289, %290 : vector<8x128xf32>
    %292 = arith.negf %291 : vector<8x128xf32>
    %293 = math.exp %292 : vector<8x128xf32>
    %cst_74 = arith.constant 1.000000e+00 : f32
    %294 = vector.broadcast %cst_74 : f32 to vector<8x128xf32>
    %295 = arith.addf %294, %293 : vector<8x128xf32>
    %296 = arith.divf %294, %295 : vector<8x128xf32>
    %297 = vector.extract_strided_slice %286 {offsets = [0, 128], sizes = [8, 128], strides = [1, 1]} : vector<8x384xf32> to vector<8x128xf32>
    %298 = vector.extract_strided_slice %288 {offsets = [0, 128], sizes = [8, 128], strides = [1, 1]} : vector<8x384xf32> to vector<8x128xf32>
    %299 = arith.addf %297, %298 : vector<8x128xf32>
    %300 = arith.negf %299 : vector<8x128xf32>
    %301 = math.exp %300 : vector<8x128xf32>
    %cst_75 = arith.constant 1.000000e+00 : f32
    %302 = vector.broadcast %cst_75 : f32 to vector<8x128xf32>
    %303 = arith.addf %302, %301 : vector<8x128xf32>
    %304 = arith.divf %302, %303 : vector<8x128xf32>
    %305 = vector.extract_strided_slice %286 {offsets = [0, 256], sizes = [8, 128], strides = [1, 1]} : vector<8x384xf32> to vector<8x128xf32>
    %306 = vector.extract_strided_slice %288 {offsets = [0, 256], sizes = [8, 128], strides = [1, 1]} : vector<8x384xf32> to vector<8x128xf32>
    %307 = arith.addf %306, %10 : vector<8x128xf32>
    %308 = arith.mulf %296, %307 : vector<8x128xf32>
    %309 = arith.addf %305, %308 : vector<8x128xf32>
    %310 = math.tanh %309 : vector<8x128xf32>
    %cst_76 = arith.constant 1.000000e+00 : f32
    %311 = vector.broadcast %cst_76 : f32 to vector<8x128xf32>
    %312 = arith.subf %311, %304 : vector<8x128xf32>
    %313 = arith.mulf %312, %310 : vector<8x128xf32>
    %314 = arith.mulf %304, %238 : vector<8x128xf32>
    %315 = arith.addf %313, %314 : vector<8x128xf32>
    %316 = arith.truncf %315 : vector<8x128xf32> to vector<8x128xbf16>
    %317 = arith.index_cast %282 : i32 to index
    %c0_77 = arith.constant 0 : index
    %c0_78 = arith.constant 0 : index
    %318 = vector.load %arg8[%317, %c0_77, %c0_78] : memref<8x8x128xbf16, #tpu.memory_space<vmem>>, vector<1x8x128xbf16>
    %319 = vector.shape_cast %318 : vector<1x8x128xbf16> to vector<8x128xbf16>
    %320 = vector.shape_cast %316 : vector<8x128xbf16> to vector<1x8x128xbf16>
    tpu.vector_store %arg8[%317, %c0_77, %c0_78], %320 {strides = array<i32>} : memref<8x8x128xbf16, #tpu.memory_space<vmem>>, vector<1x8x128xbf16>,
    %c4_i32 = arith.constant 4 : i32
    %321 = arith.index_cast %c4_i32 : i32 to index
    %c0_79 = arith.constant 0 : index
    %c0_80 = arith.constant 0 : index
    %322 = vector.load %arg1[%321, %c0_79, %c0_80] : memref<8x8x384xbf16, #tpu.memory_space<vmem>>, vector<1x8x384xbf16>
    %323 = vector.shape_cast %322 : vector<1x8x384xbf16> to vector<8x384xbf16>
    %324 = arith.extf %323 : vector<8x384xbf16> to vector<8x384xf32>
    %325 = arith.truncf %276 : vector<8x128xf32> to vector<8x128xbf16>
    %cst_81 = arith.constant dense<0.000000e+00> : vector<8x384xf32>
    %326 = tpu.matmul %325, %3, %cst_81 {dimension_numbers = #tpu.dot_dimension_numbers<[1], [0], [0], [1], [0, 0, 1, 1], [], []>} : vector<8x128xbf16>, vector<128x384xbf16>, vector<8x384xf32> -> vector<8x384xf32>
    %327 = vector.extract_strided_slice %324 {offsets = [0, 0], sizes = [8, 128], strides = [1, 1]} : vector<8x384xf32> to vector<8x128xf32>
    %328 = vector.extract_strided_slice %326 {offsets = [0, 0], sizes = [8, 128], strides = [1, 1]} : vector<8x384xf32> to vector<8x128xf32>
    %329 = arith.addf %327, %328 : vector<8x128xf32>
    %330 = arith.negf %329 : vector<8x128xf32>
    %331 = math.exp %330 : vector<8x128xf32>
    %cst_82 = arith.constant 1.000000e+00 : f32
    %332 = vector.broadcast %cst_82 : f32 to vector<8x128xf32>
    %333 = arith.addf %332, %331 : vector<8x128xf32>
    %334 = arith.divf %332, %333 : vector<8x128xf32>
    %335 = vector.extract_strided_slice %324 {offsets = [0, 128], sizes = [8, 128], strides = [1, 1]} : vector<8x384xf32> to vector<8x128xf32>
    %336 = vector.extract_strided_slice %326 {offsets = [0, 128], sizes = [8, 128], strides = [1, 1]} : vector<8x384xf32> to vector<8x128xf32>
    %337 = arith.addf %335, %336 : vector<8x128xf32>
    %338 = arith.negf %337 : vector<8x128xf32>
    %339 = math.exp %338 : vector<8x128xf32>
    %cst_83 = arith.constant 1.000000e+00 : f32
    %340 = vector.broadcast %cst_83 : f32 to vector<8x128xf32>
    %341 = arith.addf %340, %339 : vector<8x128xf32>
    %342 = arith.divf %340, %341 : vector<8x128xf32>
    %343 = vector.extract_strided_slice %324 {offsets = [0, 256], sizes = [8, 128], strides = [1, 1]} : vector<8x384xf32> to vector<8x128xf32>
    %344 = vector.extract_strided_slice %326 {offsets = [0, 256], sizes = [8, 128], strides = [1, 1]} : vector<8x384xf32> to vector<8x128xf32>
    %345 = arith.addf %344, %7 : vector<8x128xf32>
    %346 = arith.mulf %334, %345 : vector<8x128xf32>
    %347 = arith.addf %343, %346 : vector<8x128xf32>
    %348 = math.tanh %347 : vector<8x128xf32>
    %cst_84 = arith.constant 1.000000e+00 : f32
    %349 = vector.broadcast %cst_84 : f32 to vector<8x128xf32>
    %350 = arith.subf %349, %342 : vector<8x128xf32>
    %351 = arith.mulf %350, %348 : vector<8x128xf32>
    %352 = arith.mulf %342, %276 : vector<8x128xf32>
    %353 = arith.addf %351, %352 : vector<8x128xf32>
    %354 = arith.truncf %353 : vector<8x128xf32> to vector<8x128xbf16>
    %355 = arith.index_cast %c4_i32 : i32 to index
    %c0_85 = arith.constant 0 : index
    %c0_86 = arith.constant 0 : index
    %356 = vector.load %arg7[%355, %c0_85, %c0_86] : memref<8x8x128xbf16, #tpu.memory_space<vmem>>, vector<1x8x128xbf16>
    %357 = vector.shape_cast %356 : vector<1x8x128xbf16> to vector<8x128xbf16>
    %358 = vector.shape_cast %354 : vector<8x128xbf16> to vector<1x8x128xbf16>
    tpu.vector_store %arg7[%355, %c0_85, %c0_86], %358 {strides = array<i32>} : memref<8x8x128xbf16, #tpu.memory_space<vmem>>, vector<1x8x128xbf16>,
    %c7_i32_87 = arith.constant 7 : i32
    %359 = arith.subi %c7_i32_87, %c4_i32 : i32
    %360 = arith.index_cast %359 : i32 to index
    %c0_88 = arith.constant 0 : index
    %c0_89 = arith.constant 0 : index
    %361 = vector.load %arg2[%360, %c0_88, %c0_89] : memref<8x8x384xbf16, #tpu.memory_space<vmem>>, vector<1x8x384xbf16>
    %362 = vector.shape_cast %361 : vector<1x8x384xbf16> to vector<8x384xbf16>
    %363 = arith.extf %362 : vector<8x384xbf16> to vector<8x384xf32>
    %364 = arith.truncf %315 : vector<8x128xf32> to vector<8x128xbf16>
    %cst_90 = arith.constant dense<0.000000e+00> : vector<8x384xf32>
    %365 = tpu.matmul %364, %4, %cst_90 {dimension_numbers = #tpu.dot_dimension_numbers<[1], [0], [0], [1], [0, 0, 1, 1], [], []>} : vector<8x128xbf16>, vector<128x384xbf16>, vector<8x384xf32> -> vector<8x384xf32>
    %366 = vector.extract_strided_slice %363 {offsets = [0, 0], sizes = [8, 128], strides = [1, 1]} : vector<8x384xf32> to vector<8x128xf32>
    %367 = vector.extract_strided_slice %365 {offsets = [0, 0], sizes = [8, 128], strides = [1, 1]} : vector<8x384xf32> to vector<8x128xf32>
    %368 = arith.addf %366, %367 : vector<8x128xf32>
    %369 = arith.negf %368 : vector<8x128xf32>
    %370 = math.exp %369 : vector<8x128xf32>
    %cst_91 = arith.constant 1.000000e+00 : f32
    %371 = vector.broadcast %cst_91 : f32 to vector<8x128xf32>
    %372 = arith.addf %371, %370 : vector<8x128xf32>
    %373 = arith.divf %371, %372 : vector<8x128xf32>
    %374 = vector.extract_strided_slice %363 {offsets = [0, 128], sizes = [8, 128], strides = [1, 1]} : vector<8x384xf32> to vector<8x128xf32>
    %375 = vector.extract_strided_slice %365 {offsets = [0, 128], sizes = [8, 128], strides = [1, 1]} : vector<8x384xf32> to vector<8x128xf32>
    %376 = arith.addf %374, %375 : vector<8x128xf32>
    %377 = arith.negf %376 : vector<8x128xf32>
    %378 = math.exp %377 : vector<8x128xf32>
    %cst_92 = arith.constant 1.000000e+00 : f32
    %379 = vector.broadcast %cst_92 : f32 to vector<8x128xf32>
    %380 = arith.addf %379, %378 : vector<8x128xf32>
    %381 = arith.divf %379, %380 : vector<8x128xf32>
    %382 = vector.extract_strided_slice %363 {offsets = [0, 256], sizes = [8, 128], strides = [1, 1]} : vector<8x384xf32> to vector<8x128xf32>
    %383 = vector.extract_strided_slice %365 {offsets = [0, 256], sizes = [8, 128], strides = [1, 1]} : vector<8x384xf32> to vector<8x128xf32>
    %384 = arith.addf %383, %10 : vector<8x128xf32>
    %385 = arith.mulf %373, %384 : vector<8x128xf32>
    %386 = arith.addf %382, %385 : vector<8x128xf32>
    %387 = math.tanh %386 : vector<8x128xf32>
    %cst_93 = arith.constant 1.000000e+00 : f32
    %388 = vector.broadcast %cst_93 : f32 to vector<8x128xf32>
    %389 = arith.subf %388, %381 : vector<8x128xf32>
    %390 = arith.mulf %389, %387 : vector<8x128xf32>
    %391 = arith.mulf %381, %315 : vector<8x128xf32>
    %392 = arith.addf %390, %391 : vector<8x128xf32>
    %393 = arith.truncf %392 : vector<8x128xf32> to vector<8x128xbf16>
    %394 = arith.index_cast %359 : i32 to index
    %c0_94 = arith.constant 0 : index
    %c0_95 = arith.constant 0 : index
    %395 = vector.load %arg8[%394, %c0_94, %c0_95] : memref<8x8x128xbf16, #tpu.memory_space<vmem>>, vector<1x8x128xbf16>
    %396 = vector.shape_cast %395 : vector<1x8x128xbf16> to vector<8x128xbf16>
    %397 = vector.shape_cast %393 : vector<8x128xbf16> to vector<1x8x128xbf16>
    tpu.vector_store %arg8[%394, %c0_94, %c0_95], %397 {strides = array<i32>} : memref<8x8x128xbf16, #tpu.memory_space<vmem>>, vector<1x8x128xbf16>,
    %c5_i32 = arith.constant 5 : i32
    %398 = arith.index_cast %c5_i32 : i32 to index
    %c0_96 = arith.constant 0 : index
    %c0_97 = arith.constant 0 : index
    %399 = vector.load %arg1[%398, %c0_96, %c0_97] : memref<8x8x384xbf16, #tpu.memory_space<vmem>>, vector<1x8x384xbf16>
    %400 = vector.shape_cast %399 : vector<1x8x384xbf16> to vector<8x384xbf16>
    %401 = arith.extf %400 : vector<8x384xbf16> to vector<8x384xf32>
    %402 = arith.truncf %353 : vector<8x128xf32> to vector<8x128xbf16>
    %cst_98 = arith.constant dense<0.000000e+00> : vector<8x384xf32>
    %403 = tpu.matmul %402, %3, %cst_98 {dimension_numbers = #tpu.dot_dimension_numbers<[1], [0], [0], [1], [0, 0, 1, 1], [], []>} : vector<8x128xbf16>, vector<128x384xbf16>, vector<8x384xf32> -> vector<8x384xf32>
    %404 = vector.extract_strided_slice %401 {offsets = [0, 0], sizes = [8, 128], strides = [1, 1]} : vector<8x384xf32> to vector<8x128xf32>
    %405 = vector.extract_strided_slice %403 {offsets = [0, 0], sizes = [8, 128], strides = [1, 1]} : vector<8x384xf32> to vector<8x128xf32>
    %406 = arith.addf %404, %405 : vector<8x128xf32>
    %407 = arith.negf %406 : vector<8x128xf32>
    %408 = math.exp %407 : vector<8x128xf32>
    %cst_99 = arith.constant 1.000000e+00 : f32
    %409 = vector.broadcast %cst_99 : f32 to vector<8x128xf32>
    %410 = arith.addf %409, %408 : vector<8x128xf32>
    %411 = arith.divf %409, %410 : vector<8x128xf32>
    %412 = vector.extract_strided_slice %401 {offsets = [0, 128], sizes = [8, 128], strides = [1, 1]} : vector<8x384xf32> to vector<8x128xf32>
    %413 = vector.extract_strided_slice %403 {offsets = [0, 128], sizes = [8, 128], strides = [1, 1]} : vector<8x384xf32> to vector<8x128xf32>
    %414 = arith.addf %412, %413 : vector<8x128xf32>
    %415 = arith.negf %414 : vector<8x128xf32>
    %416 = math.exp %415 : vector<8x128xf32>
    %cst_100 = arith.constant 1.000000e+00 : f32
    %417 = vector.broadcast %cst_100 : f32 to vector<8x128xf32>
    %418 = arith.addf %417, %416 : vector<8x128xf32>
    %419 = arith.divf %417, %418 : vector<8x128xf32>
    %420 = vector.extract_strided_slice %401 {offsets = [0, 256], sizes = [8, 128], strides = [1, 1]} : vector<8x384xf32> to vector<8x128xf32>
    %421 = vector.extract_strided_slice %403 {offsets = [0, 256], sizes = [8, 128], strides = [1, 1]} : vector<8x384xf32> to vector<8x128xf32>
    %422 = arith.addf %421, %7 : vector<8x128xf32>
    %423 = arith.mulf %411, %422 : vector<8x128xf32>
    %424 = arith.addf %420, %423 : vector<8x128xf32>
    %425 = math.tanh %424 : vector<8x128xf32>
    %cst_101 = arith.constant 1.000000e+00 : f32
    %426 = vector.broadcast %cst_101 : f32 to vector<8x128xf32>
    %427 = arith.subf %426, %419 : vector<8x128xf32>
    %428 = arith.mulf %427, %425 : vector<8x128xf32>
    %429 = arith.mulf %419, %353 : vector<8x128xf32>
    %430 = arith.addf %428, %429 : vector<8x128xf32>
    %431 = arith.truncf %430 : vector<8x128xf32> to vector<8x128xbf16>
    %432 = arith.index_cast %c5_i32 : i32 to index
    %c0_102 = arith.constant 0 : index
    %c0_103 = arith.constant 0 : index
    %433 = vector.load %arg7[%432, %c0_102, %c0_103] : memref<8x8x128xbf16, #tpu.memory_space<vmem>>, vector<1x8x128xbf16>
    %434 = vector.shape_cast %433 : vector<1x8x128xbf16> to vector<8x128xbf16>
    %435 = vector.shape_cast %431 : vector<8x128xbf16> to vector<1x8x128xbf16>
    tpu.vector_store %arg7[%432, %c0_102, %c0_103], %435 {strides = array<i32>} : memref<8x8x128xbf16, #tpu.memory_space<vmem>>, vector<1x8x128xbf16>,
    %c7_i32_104 = arith.constant 7 : i32
    %436 = arith.subi %c7_i32_104, %c5_i32 : i32
    %437 = arith.index_cast %436 : i32 to index
    %c0_105 = arith.constant 0 : index
    %c0_106 = arith.constant 0 : index
    %438 = vector.load %arg2[%437, %c0_105, %c0_106] : memref<8x8x384xbf16, #tpu.memory_space<vmem>>, vector<1x8x384xbf16>
    %439 = vector.shape_cast %438 : vector<1x8x384xbf16> to vector<8x384xbf16>
    %440 = arith.extf %439 : vector<8x384xbf16> to vector<8x384xf32>
    %441 = arith.truncf %392 : vector<8x128xf32> to vector<8x128xbf16>
    %cst_107 = arith.constant dense<0.000000e+00> : vector<8x384xf32>
    %442 = tpu.matmul %441, %4, %cst_107 {dimension_numbers = #tpu.dot_dimension_numbers<[1], [0], [0], [1], [0, 0, 1, 1], [], []>} : vector<8x128xbf16>, vector<128x384xbf16>, vector<8x384xf32> -> vector<8x384xf32>
    %443 = vector.extract_strided_slice %440 {offsets = [0, 0], sizes = [8, 128], strides = [1, 1]} : vector<8x384xf32> to vector<8x128xf32>
    %444 = vector.extract_strided_slice %442 {offsets = [0, 0], sizes = [8, 128], strides = [1, 1]} : vector<8x384xf32> to vector<8x128xf32>
    %445 = arith.addf %443, %444 : vector<8x128xf32>
    %446 = arith.negf %445 : vector<8x128xf32>
    %447 = math.exp %446 : vector<8x128xf32>
    %cst_108 = arith.constant 1.000000e+00 : f32
    %448 = vector.broadcast %cst_108 : f32 to vector<8x128xf32>
    %449 = arith.addf %448, %447 : vector<8x128xf32>
    %450 = arith.divf %448, %449 : vector<8x128xf32>
    %451 = vector.extract_strided_slice %440 {offsets = [0, 128], sizes = [8, 128], strides = [1, 1]} : vector<8x384xf32> to vector<8x128xf32>
    %452 = vector.extract_strided_slice %442 {offsets = [0, 128], sizes = [8, 128], strides = [1, 1]} : vector<8x384xf32> to vector<8x128xf32>
    %453 = arith.addf %451, %452 : vector<8x128xf32>
    %454 = arith.negf %453 : vector<8x128xf32>
    %455 = math.exp %454 : vector<8x128xf32>
    %cst_109 = arith.constant 1.000000e+00 : f32
    %456 = vector.broadcast %cst_109 : f32 to vector<8x128xf32>
    %457 = arith.addf %456, %455 : vector<8x128xf32>
    %458 = arith.divf %456, %457 : vector<8x128xf32>
    %459 = vector.extract_strided_slice %440 {offsets = [0, 256], sizes = [8, 128], strides = [1, 1]} : vector<8x384xf32> to vector<8x128xf32>
    %460 = vector.extract_strided_slice %442 {offsets = [0, 256], sizes = [8, 128], strides = [1, 1]} : vector<8x384xf32> to vector<8x128xf32>
    %461 = arith.addf %460, %10 : vector<8x128xf32>
    %462 = arith.mulf %450, %461 : vector<8x128xf32>
    %463 = arith.addf %459, %462 : vector<8x128xf32>
    %464 = math.tanh %463 : vector<8x128xf32>
    %cst_110 = arith.constant 1.000000e+00 : f32
    %465 = vector.broadcast %cst_110 : f32 to vector<8x128xf32>
    %466 = arith.subf %465, %458 : vector<8x128xf32>
    %467 = arith.mulf %466, %464 : vector<8x128xf32>
    %468 = arith.mulf %458, %392 : vector<8x128xf32>
    %469 = arith.addf %467, %468 : vector<8x128xf32>
    %470 = arith.truncf %469 : vector<8x128xf32> to vector<8x128xbf16>
    %471 = arith.index_cast %436 : i32 to index
    %c0_111 = arith.constant 0 : index
    %c0_112 = arith.constant 0 : index
    %472 = vector.load %arg8[%471, %c0_111, %c0_112] : memref<8x8x128xbf16, #tpu.memory_space<vmem>>, vector<1x8x128xbf16>
    %473 = vector.shape_cast %472 : vector<1x8x128xbf16> to vector<8x128xbf16>
    %474 = vector.shape_cast %470 : vector<8x128xbf16> to vector<1x8x128xbf16>
    tpu.vector_store %arg8[%471, %c0_111, %c0_112], %474 {strides = array<i32>} : memref<8x8x128xbf16, #tpu.memory_space<vmem>>, vector<1x8x128xbf16>,
    %c6_i32 = arith.constant 6 : i32
    %475 = arith.index_cast %c6_i32 : i32 to index
    %c0_113 = arith.constant 0 : index
    %c0_114 = arith.constant 0 : index
    %476 = vector.load %arg1[%475, %c0_113, %c0_114] : memref<8x8x384xbf16, #tpu.memory_space<vmem>>, vector<1x8x384xbf16>
    %477 = vector.shape_cast %476 : vector<1x8x384xbf16> to vector<8x384xbf16>
    %478 = arith.extf %477 : vector<8x384xbf16> to vector<8x384xf32>
    %479 = arith.truncf %430 : vector<8x128xf32> to vector<8x128xbf16>
    %cst_115 = arith.constant dense<0.000000e+00> : vector<8x384xf32>
    %480 = tpu.matmul %479, %3, %cst_115 {dimension_numbers = #tpu.dot_dimension_numbers<[1], [0], [0], [1], [0, 0, 1, 1], [], []>} : vector<8x128xbf16>, vector<128x384xbf16>, vector<8x384xf32> -> vector<8x384xf32>
    %481 = vector.extract_strided_slice %478 {offsets = [0, 0], sizes = [8, 128], strides = [1, 1]} : vector<8x384xf32> to vector<8x128xf32>
    %482 = vector.extract_strided_slice %480 {offsets = [0, 0], sizes = [8, 128], strides = [1, 1]} : vector<8x384xf32> to vector<8x128xf32>
    %483 = arith.addf %481, %482 : vector<8x128xf32>
    %484 = arith.negf %483 : vector<8x128xf32>
    %485 = math.exp %484 : vector<8x128xf32>
    %cst_116 = arith.constant 1.000000e+00 : f32
    %486 = vector.broadcast %cst_116 : f32 to vector<8x128xf32>
    %487 = arith.addf %486, %485 : vector<8x128xf32>
    %488 = arith.divf %486, %487 : vector<8x128xf32>
    %489 = vector.extract_strided_slice %478 {offsets = [0, 128], sizes = [8, 128], strides = [1, 1]} : vector<8x384xf32> to vector<8x128xf32>
    %490 = vector.extract_strided_slice %480 {offsets = [0, 128], sizes = [8, 128], strides = [1, 1]} : vector<8x384xf32> to vector<8x128xf32>
    %491 = arith.addf %489, %490 : vector<8x128xf32>
    %492 = arith.negf %491 : vector<8x128xf32>
    %493 = math.exp %492 : vector<8x128xf32>
    %cst_117 = arith.constant 1.000000e+00 : f32
    %494 = vector.broadcast %cst_117 : f32 to vector<8x128xf32>
    %495 = arith.addf %494, %493 : vector<8x128xf32>
    %496 = arith.divf %494, %495 : vector<8x128xf32>
    %497 = vector.extract_strided_slice %478 {offsets = [0, 256], sizes = [8, 128], strides = [1, 1]} : vector<8x384xf32> to vector<8x128xf32>
    %498 = vector.extract_strided_slice %480 {offsets = [0, 256], sizes = [8, 128], strides = [1, 1]} : vector<8x384xf32> to vector<8x128xf32>
    %499 = arith.addf %498, %7 : vector<8x128xf32>
    %500 = arith.mulf %488, %499 : vector<8x128xf32>
    %501 = arith.addf %497, %500 : vector<8x128xf32>
    %502 = math.tanh %501 : vector<8x128xf32>
    %cst_118 = arith.constant 1.000000e+00 : f32
    %503 = vector.broadcast %cst_118 : f32 to vector<8x128xf32>
    %504 = arith.subf %503, %496 : vector<8x128xf32>
    %505 = arith.mulf %504, %502 : vector<8x128xf32>
    %506 = arith.mulf %496, %430 : vector<8x128xf32>
    %507 = arith.addf %505, %506 : vector<8x128xf32>
    %508 = arith.truncf %507 : vector<8x128xf32> to vector<8x128xbf16>
    %509 = arith.index_cast %c6_i32 : i32 to index
    %c0_119 = arith.constant 0 : index
    %c0_120 = arith.constant 0 : index
    %510 = vector.load %arg7[%509, %c0_119, %c0_120] : memref<8x8x128xbf16, #tpu.memory_space<vmem>>, vector<1x8x128xbf16>
    %511 = vector.shape_cast %510 : vector<1x8x128xbf16> to vector<8x128xbf16>
    %512 = vector.shape_cast %508 : vector<8x128xbf16> to vector<1x8x128xbf16>
    tpu.vector_store %arg7[%509, %c0_119, %c0_120], %512 {strides = array<i32>} : memref<8x8x128xbf16, #tpu.memory_space<vmem>>, vector<1x8x128xbf16>,
    %c7_i32_121 = arith.constant 7 : i32
    %513 = arith.subi %c7_i32_121, %c6_i32 : i32
    %514 = arith.index_cast %513 : i32 to index
    %c0_122 = arith.constant 0 : index
    %c0_123 = arith.constant 0 : index
    %515 = vector.load %arg2[%514, %c0_122, %c0_123] : memref<8x8x384xbf16, #tpu.memory_space<vmem>>, vector<1x8x384xbf16>
    %516 = vector.shape_cast %515 : vector<1x8x384xbf16> to vector<8x384xbf16>
    %517 = arith.extf %516 : vector<8x384xbf16> to vector<8x384xf32>
    %518 = arith.truncf %469 : vector<8x128xf32> to vector<8x128xbf16>
    %cst_124 = arith.constant dense<0.000000e+00> : vector<8x384xf32>
    %519 = tpu.matmul %518, %4, %cst_124 {dimension_numbers = #tpu.dot_dimension_numbers<[1], [0], [0], [1], [0, 0, 1, 1], [], []>} : vector<8x128xbf16>, vector<128x384xbf16>, vector<8x384xf32> -> vector<8x384xf32>
    %520 = vector.extract_strided_slice %517 {offsets = [0, 0], sizes = [8, 128], strides = [1, 1]} : vector<8x384xf32> to vector<8x128xf32>
    %521 = vector.extract_strided_slice %519 {offsets = [0, 0], sizes = [8, 128], strides = [1, 1]} : vector<8x384xf32> to vector<8x128xf32>
    %522 = arith.addf %520, %521 : vector<8x128xf32>
    %523 = arith.negf %522 : vector<8x128xf32>
    %524 = math.exp %523 : vector<8x128xf32>
    %cst_125 = arith.constant 1.000000e+00 : f32
    %525 = vector.broadcast %cst_125 : f32 to vector<8x128xf32>
    %526 = arith.addf %525, %524 : vector<8x128xf32>
    %527 = arith.divf %525, %526 : vector<8x128xf32>
    %528 = vector.extract_strided_slice %517 {offsets = [0, 128], sizes = [8, 128], strides = [1, 1]} : vector<8x384xf32> to vector<8x128xf32>
    %529 = vector.extract_strided_slice %519 {offsets = [0, 128], sizes = [8, 128], strides = [1, 1]} : vector<8x384xf32> to vector<8x128xf32>
    %530 = arith.addf %528, %529 : vector<8x128xf32>
    %531 = arith.negf %530 : vector<8x128xf32>
    %532 = math.exp %531 : vector<8x128xf32>
    %cst_126 = arith.constant 1.000000e+00 : f32
    %533 = vector.broadcast %cst_126 : f32 to vector<8x128xf32>
    %534 = arith.addf %533, %532 : vector<8x128xf32>
    %535 = arith.divf %533, %534 : vector<8x128xf32>
    %536 = vector.extract_strided_slice %517 {offsets = [0, 256], sizes = [8, 128], strides = [1, 1]} : vector<8x384xf32> to vector<8x128xf32>
    %537 = vector.extract_strided_slice %519 {offsets = [0, 256], sizes = [8, 128], strides = [1, 1]} : vector<8x384xf32> to vector<8x128xf32>
    %538 = arith.addf %537, %10 : vector<8x128xf32>
    %539 = arith.mulf %527, %538 : vector<8x128xf32>
    %540 = arith.addf %536, %539 : vector<8x128xf32>
    %541 = math.tanh %540 : vector<8x128xf32>
    %cst_127 = arith.constant 1.000000e+00 : f32
    %542 = vector.broadcast %cst_127 : f32 to vector<8x128xf32>
    %543 = arith.subf %542, %535 : vector<8x128xf32>
    %544 = arith.mulf %543, %541 : vector<8x128xf32>
    %545 = arith.mulf %535, %469 : vector<8x128xf32>
    %546 = arith.addf %544, %545 : vector<8x128xf32>
    %547 = arith.truncf %546 : vector<8x128xf32> to vector<8x128xbf16>
    %548 = arith.index_cast %513 : i32 to index
    %c0_128 = arith.constant 0 : index
    %c0_129 = arith.constant 0 : index
    %549 = vector.load %arg8[%548, %c0_128, %c0_129] : memref<8x8x128xbf16, #tpu.memory_space<vmem>>, vector<1x8x128xbf16>
    %550 = vector.shape_cast %549 : vector<1x8x128xbf16> to vector<8x128xbf16>
    %551 = vector.shape_cast %547 : vector<8x128xbf16> to vector<1x8x128xbf16>
    tpu.vector_store %arg8[%548, %c0_128, %c0_129], %551 {strides = array<i32>} : memref<8x8x128xbf16, #tpu.memory_space<vmem>>, vector<1x8x128xbf16>,
    %c7_i32_130 = arith.constant 7 : i32
    %552 = arith.index_cast %c7_i32_130 : i32 to index
    %c0_131 = arith.constant 0 : index
    %c0_132 = arith.constant 0 : index
    %553 = vector.load %arg1[%552, %c0_131, %c0_132] : memref<8x8x384xbf16, #tpu.memory_space<vmem>>, vector<1x8x384xbf16>
    %554 = vector.shape_cast %553 : vector<1x8x384xbf16> to vector<8x384xbf16>
    %555 = arith.extf %554 : vector<8x384xbf16> to vector<8x384xf32>
    %556 = arith.truncf %507 : vector<8x128xf32> to vector<8x128xbf16>
    %cst_133 = arith.constant dense<0.000000e+00> : vector<8x384xf32>
    %557 = tpu.matmul %556, %3, %cst_133 {dimension_numbers = #tpu.dot_dimension_numbers<[1], [0], [0], [1], [0, 0, 1, 1], [], []>} : vector<8x128xbf16>, vector<128x384xbf16>, vector<8x384xf32> -> vector<8x384xf32>
    %558 = vector.extract_strided_slice %555 {offsets = [0, 0], sizes = [8, 128], strides = [1, 1]} : vector<8x384xf32> to vector<8x128xf32>
    %559 = vector.extract_strided_slice %557 {offsets = [0, 0], sizes = [8, 128], strides = [1, 1]} : vector<8x384xf32> to vector<8x128xf32>
    %560 = arith.addf %558, %559 : vector<8x128xf32>
    %561 = arith.negf %560 : vector<8x128xf32>
    %562 = math.exp %561 : vector<8x128xf32>
    %cst_134 = arith.constant 1.000000e+00 : f32
    %563 = vector.broadcast %cst_134 : f32 to vector<8x128xf32>
    %564 = arith.addf %563, %562 : vector<8x128xf32>
    %565 = arith.divf %563, %564 : vector<8x128xf32>
    %566 = vector.extract_strided_slice %555 {offsets = [0, 128], sizes = [8, 128], strides = [1, 1]} : vector<8x384xf32> to vector<8x128xf32>
    %567 = vector.extract_strided_slice %557 {offsets = [0, 128], sizes = [8, 128], strides = [1, 1]} : vector<8x384xf32> to vector<8x128xf32>
    %568 = arith.addf %566, %567 : vector<8x128xf32>
    %569 = arith.negf %568 : vector<8x128xf32>
    %570 = math.exp %569 : vector<8x128xf32>
    %cst_135 = arith.constant 1.000000e+00 : f32
    %571 = vector.broadcast %cst_135 : f32 to vector<8x128xf32>
    %572 = arith.addf %571, %570 : vector<8x128xf32>
    %573 = arith.divf %571, %572 : vector<8x128xf32>
    %574 = vector.extract_strided_slice %555 {offsets = [0, 256], sizes = [8, 128], strides = [1, 1]} : vector<8x384xf32> to vector<8x128xf32>
    %575 = vector.extract_strided_slice %557 {offsets = [0, 256], sizes = [8, 128], strides = [1, 1]} : vector<8x384xf32> to vector<8x128xf32>
    %576 = arith.addf %575, %7 : vector<8x128xf32>
    %577 = arith.mulf %565, %576 : vector<8x128xf32>
    %578 = arith.addf %574, %577 : vector<8x128xf32>
    %579 = math.tanh %578 : vector<8x128xf32>
    %cst_136 = arith.constant 1.000000e+00 : f32
    %580 = vector.broadcast %cst_136 : f32 to vector<8x128xf32>
    %581 = arith.subf %580, %573 : vector<8x128xf32>
    %582 = arith.mulf %581, %579 : vector<8x128xf32>
    %583 = arith.mulf %573, %507 : vector<8x128xf32>
    %584 = arith.addf %582, %583 : vector<8x128xf32>
    %585 = arith.truncf %584 : vector<8x128xf32> to vector<8x128xbf16>
    %586 = arith.index_cast %c7_i32_130 : i32 to index
    %c0_137 = arith.constant 0 : index
    %c0_138 = arith.constant 0 : index
    %587 = vector.load %arg7[%586, %c0_137, %c0_138] : memref<8x8x128xbf16, #tpu.memory_space<vmem>>, vector<1x8x128xbf16>
    %588 = vector.shape_cast %587 : vector<1x8x128xbf16> to vector<8x128xbf16>
    %589 = vector.shape_cast %585 : vector<8x128xbf16> to vector<1x8x128xbf16>
    tpu.vector_store %arg7[%586, %c0_137, %c0_138], %589 {strides = array<i32>} : memref<8x8x128xbf16, #tpu.memory_space<vmem>>, vector<1x8x128xbf16>,
    %c7_i32_139 = arith.constant 7 : i32
    %590 = arith.subi %c7_i32_139, %c7_i32_130 : i32
    %591 = arith.index_cast %590 : i32 to index
    %c0_140 = arith.constant 0 : index
    %c0_141 = arith.constant 0 : index
    %592 = vector.load %arg2[%591, %c0_140, %c0_141] : memref<8x8x384xbf16, #tpu.memory_space<vmem>>, vector<1x8x384xbf16>
    %593 = vector.shape_cast %592 : vector<1x8x384xbf16> to vector<8x384xbf16>
    %594 = arith.extf %593 : vector<8x384xbf16> to vector<8x384xf32>
    %595 = arith.truncf %546 : vector<8x128xf32> to vector<8x128xbf16>
    %cst_142 = arith.constant dense<0.000000e+00> : vector<8x384xf32>
    %596 = tpu.matmul %595, %4, %cst_142 {dimension_numbers = #tpu.dot_dimension_numbers<[1], [0], [0], [1], [0, 0, 1, 1], [], []>} : vector<8x128xbf16>, vector<128x384xbf16>, vector<8x384xf32> -> vector<8x384xf32>
    %597 = vector.extract_strided_slice %594 {offsets = [0, 0], sizes = [8, 128], strides = [1, 1]} : vector<8x384xf32> to vector<8x128xf32>
    %598 = vector.extract_strided_slice %596 {offsets = [0, 0], sizes = [8, 128], strides = [1, 1]} : vector<8x384xf32> to vector<8x128xf32>
    %599 = arith.addf %597, %598 : vector<8x128xf32>
    %600 = arith.negf %599 : vector<8x128xf32>
    %601 = math.exp %600 : vector<8x128xf32>
    %cst_143 = arith.constant 1.000000e+00 : f32
    %602 = vector.broadcast %cst_143 : f32 to vector<8x128xf32>
    %603 = arith.addf %602, %601 : vector<8x128xf32>
    %604 = arith.divf %602, %603 : vector<8x128xf32>
    %605 = vector.extract_strided_slice %594 {offsets = [0, 128], sizes = [8, 128], strides = [1, 1]} : vector<8x384xf32> to vector<8x128xf32>
    %606 = vector.extract_strided_slice %596 {offsets = [0, 128], sizes = [8, 128], strides = [1, 1]} : vector<8x384xf32> to vector<8x128xf32>
    %607 = arith.addf %605, %606 : vector<8x128xf32>
    %608 = arith.negf %607 : vector<8x128xf32>
    %609 = math.exp %608 : vector<8x128xf32>
    %cst_144 = arith.constant 1.000000e+00 : f32
    %610 = vector.broadcast %cst_144 : f32 to vector<8x128xf32>
    %611 = arith.addf %610, %609 : vector<8x128xf32>
    %612 = arith.divf %610, %611 : vector<8x128xf32>
    %613 = vector.extract_strided_slice %594 {offsets = [0, 256], sizes = [8, 128], strides = [1, 1]} : vector<8x384xf32> to vector<8x128xf32>
    %614 = vector.extract_strided_slice %596 {offsets = [0, 256], sizes = [8, 128], strides = [1, 1]} : vector<8x384xf32> to vector<8x128xf32>
    %615 = arith.addf %614, %10 : vector<8x128xf32>
    %616 = arith.mulf %604, %615 : vector<8x128xf32>
    %617 = arith.addf %613, %616 : vector<8x128xf32>
    %618 = math.tanh %617 : vector<8x128xf32>
    %cst_145 = arith.constant 1.000000e+00 : f32
    %619 = vector.broadcast %cst_145 : f32 to vector<8x128xf32>
    %620 = arith.subf %619, %612 : vector<8x128xf32>
    %621 = arith.mulf %620, %618 : vector<8x128xf32>
    %622 = arith.mulf %612, %546 : vector<8x128xf32>
    %623 = arith.addf %621, %622 : vector<8x128xf32>
    %624 = arith.truncf %623 : vector<8x128xf32> to vector<8x128xbf16>
    %625 = arith.index_cast %590 : i32 to index
    %c0_146 = arith.constant 0 : index
    %c0_147 = arith.constant 0 : index
    %626 = vector.load %arg8[%625, %c0_146, %c0_147] : memref<8x8x128xbf16, #tpu.memory_space<vmem>>, vector<1x8x128xbf16>
    %627 = vector.shape_cast %626 : vector<1x8x128xbf16> to vector<8x128xbf16>
    %628 = vector.shape_cast %624 : vector<8x128xbf16> to vector<1x8x128xbf16>
    tpu.vector_store %arg8[%625, %c0_146, %c0_147], %628 {strides = array<i32>} : memref<8x8x128xbf16, #tpu.memory_space<vmem>>, vector<1x8x128xbf16>,
    %c8_i32 = arith.constant 8 : i32
    %c0_148 = arith.constant 0 : index
    %c0_149 = arith.constant 0 : index
    %629 = vector.load %arg9[%c0_148, %c0_149] : memref<8x128xf32, #tpu.memory_space<vmem>>, vector<8x128xf32>
    tpu.vector_store %arg9[%c0_148, %c0_149], %584 {strides = array<i32>} : memref<8x128xf32, #tpu.memory_space<vmem>>, vector<8x128xf32>,
    %c0_150 = arith.constant 0 : index
    %c0_151 = arith.constant 0 : index
    %630 = vector.load %arg10[%c0_150, %c0_151] : memref<8x128xf32, #tpu.memory_space<vmem>>, vector<8x128xf32>
    tpu.vector_store %arg10[%c0_150, %c0_151], %623 {strides = array<i32>} : memref<8x128xf32, #tpu.memory_space<vmem>>, vector<8x128xf32>,
    return
  }
  func.func @transform_0(%arg0: i32) -> (i32, i32, i32) {
    %c0_i32 = arith.constant 0 : i32
    %c0_i32_0 = arith.constant 0 : i32
    %c0_i32_1 = arith.constant 0 : i32
    return %arg0, %c0_i32, %c0_i32_0 : i32, i32, i32
  }
  func.func @transform_1(%arg0: i32) -> (i32, i32, i32) {
    %c0_i32 = arith.constant 0 : i32
    %0 = arith.subi %c0_i32, %arg0 : i32
    %c0_i32_0 = arith.constant 0 : i32
    %c0_i32_1 = arith.constant 0 : i32
    %c0_i32_2 = arith.constant 0 : i32
    return %0, %c0_i32_0, %c0_i32_1 : i32, i32, i32
  }
  func.func @transform_2(%arg0: i32) -> (i32, i32) {
    %c0_i32 = arith.constant 0 : i32
    %c0_i32_0 = arith.constant 0 : i32
    %c0_i32_1 = arith.constant 0 : i32
    return %c0_i32, %c0_i32_0 : i32, i32
  }
  func.func @transform_3(%arg0: i32) -> (i32, i32) {
    %c0_i32 = arith.constant 0 : i32
    %c0_i32_0 = arith.constant 0 : i32
    %c0_i32_1 = arith.constant 0 : i32
    return %c0_i32, %c0_i32_0 : i32, i32
  }
  func.func @transform_4(%arg0: i32) -> (i32, i32) {
    %c0_i32 = arith.constant 0 : i32
    %c0_i32_0 = arith.constant 0 : i32
    %c0_i32_1 = arith.constant 0 : i32
    return %c0_i32, %c0_i32_0 : i32, i32
  }
  func.func @transform_5(%arg0: i32) -> (i32, i32) {
    %c0_i32 = arith.constant 0 : i32
    %c0_i32_0 = arith.constant 0 : i32
    %c0_i32_1 = arith.constant 0 : i32
    return %c0_i32, %c0_i32_0 : i32, i32
  }
  func.func @transform_6(%arg0: i32) -> (i32, i32, i32) {
    %c0_i32 = arith.constant 0 : i32
    %c0_i32_0 = arith.constant 0 : i32
    %c0_i32_1 = arith.constant 0 : i32
    return %arg0, %c0_i32, %c0_i32_0 : i32, i32, i32
  }
  func.func @transform_7(%arg0: i32) -> (i32, i32, i32) {
    %c0_i32 = arith.constant 0 : i32
    %0 = arith.subi %c0_i32, %arg0 : i32
    %c0_i32_0 = arith.constant 0 : i32
    %c0_i32_1 = arith.constant 0 : i32
    %c0_i32_2 = arith.constant 0 : i32
    return %0, %c0_i32_0, %c0_i32_1 : i32, i32, i32
  }
}

</mosaic_0001>

<bundles_post_ra>
// kernel: encoder_forward.2
= control target key start
LH: loop header
LB: loop body
LE: loop exit
PB: predicated region body
PF: predicated region fallthrough
CT: control target
= control target key end

     0   :  { %v4455_v1 = vmov 0.0   ;;  %v4453_v2 = vmov 0   ;;  %vm3103_vm0 = vmmov 0   ;;  %v3104_v28 = vmov 0.0|0.0   ;;  %s4445_s2 = inlined_call_operand.vmem [shape: bf16[128,384], index: 2, kind: input, shape index: {}]   ;;  %s4446_s3 = inlined_call_operand.vmem [shape: bf16[128,384], index: 3, kind: input, shape index: {}]   ;;  %s4447_s0 = inlined_call_operand.vmem [shape: bf16[8,8,384], index: 0, kind: input, shape index: {}]   ;;  %s4448_s1 = inlined_call_operand.vmem [shape: bf16[8,8,384], index: 1, kind: input, shape index: {}]   ;;  %s4449_s4 = inlined_call_operand.vmem [shape: f32[1,128], index: 4, kind: input, shape index: {}]   ;;  %s4450_s6 = inlined_call_operand.vmem [shape: bf16[8,8,128], index: 6, kind: output, shape index: {0}]   ;;  %s4451_s5 = inlined_call_operand.vmem [shape: f32[1,128], index: 5, kind: input, shape index: {}]   ;;  %s4452_s7 = inlined_call_operand.vmem [shape: bf16[8,8,128], index: 7, kind: output, shape index: {1}]  }
   0x1   :  { %v3148_v0 = vld [vmem:[%s4445_s2 + $0xac] ss:$12 sps:$4 sm:$0xff]   ;;  %2503 = vmatprep.subr.bf16.mxu1 %v4455_v1  ;;  %317 = vmatprep.mubr.bf16.mxu0 %v4453_v2  ;;  %v3155_v3 = vld [vmem:[%s4445_s2 + $0xa8] ss:$12 sps:$4 sm:$0xff]   ;;  %v3169_v5 = vld [vmem:[%s4445_s2 + $0x90] ss:$12 sps:$4 sm:$0xff]  }
   0x2   :  { %2519 = vmatprep.mubr.msk.bf16.mxu1 %vm3103_vm0, %v4455_v1  ;;  %285 = vmatprep.subr.bf16.mxu0 %v3148_v0  ;;  %v3163_v4 = vld [vmem:[%s4445_s2 + $0x94] ss:$12 sps:$4 sm:$0xff]   ;;  %v3175_v6 = vld [vmem:[%s4445_s2 + $0x7c] ss:$12 sps:$4 sm:$0xff]   ;;  %v3181_v7 = vld [vmem:[%s4445_s2 + $0x78] ss:$12 sps:$4 sm:$0xff]  }
   0x3   :  { %286 = vmatpush1.bf16.msra.mxu0 %v3155_v3  ;;  %v3187_v8 = vld [vmem:[%s4445_s2 + $0x64] ss:$12 sps:$4 sm:$0xff]   ;;  %v3198_v10 = vld [vmem:[%s4445_s2 + $0x60] ss:$12 sps:$4 sm:$0xff]   ;;  %v3216_v13 = vld [vmem:[%s4445_s2 + $0x48] ss:$12 sps:$4 sm:$0xff]  }
   0x4   :  { %287 = vmatprep.subr.bf16.mxu0 %v3163_v4  ;;  %v3192_v9 = vld [vmem:[%s4445_s2 + $0xb0] ss:$12 sps:$4 sm:$0xff]   ;;  %v3203_v11 = vld [vmem:[%s4445_s2 + $0x4c] ss:$12 sps:$4 sm:$0xff]   ;;  %4510 = vst [vmem:[#allocation5_spill] sm:$0xff] %v3216_v13  ;;  %v151_v51 = vld [vmem:[%s4447_s0] sm:$0xff] }
   0x5   :  { %4509 = vst [vmem:[#allocation4_spill] sm:$0xff] %v3203_v11  ;;  %2504 = vmatpush3.bf16.msra.mxu1 %v3192_v9  ;;  %v3210_v12 = vld [vmem:[%s4445_s2 + $0x98] ss:$12 sps:$4 sm:$0xff]   ;;  %v3222_v14 = vld [vmem:[%s4445_s2 + $0x34] ss:$12 sps:$4 sm:$0xff]   ;;  %v153_v52 = vunpack.c.l.bf16 %v151_v51  ;;  %v154_v57 = vunpack.c.h.bf16 %v151_v51 }
   0x6   :  { %2505 = vmatprep.subr.bf16.mxu1 %v4455_v1  ;;  %4511 = vst [vmem:[#allocation6_spill] sm:$0xff] %v3222_v14  ;;  %v3229_v15 = vld [vmem:[%s4445_s2 + $0x80] ss:$12 sps:$4 sm:$0xff]   ;;  %v3236_v16 = vld [vmem:[%s4445_s2 + $0x30] ss:$12 sps:$4 sm:$0xff]  }
   0x7   :  { %288 = vmatpush1.bf16.msra.mxu0 %v3169_v5  ;;  %4512 = vst [vmem:[#allocation7_spill] sm:$0xff] %v3236_v16  ;;  %v3242_v17 = vld [vmem:[%s4445_s2 + $0x1c] ss:$12 sps:$4 sm:$0xff]   ;;  %v3254_v19 = vld [vmem:[%s4445_s2 + $0x18] ss:$12 sps:$4 sm:$0xff]  }
   0x8   :  { %289 = vmatprep.subr.bf16.mxu0 %v3175_v6  ;;  %4513 = vst [vmem:[#allocation8_spill] sm:$0xff] %v3242_v17  ;;  %v3248_v18 = vld [vmem:[%s4445_s2 + $0x68] ss:$12 sps:$4 sm:$0xff]   ;;  %4514 = vst [vmem:[#allocation9_spill] sm:$0xff] %v3254_v19  ;;  %v3260_v20 = vld [vmem:[%s4445_s2 + $0x4] ss:$12 sps:$4 sm:$0xff]  }
   0x9   :  { %2506 = vmatpush3.bf16.msra.mxu1 %v3210_v12  ;;  %4515 = vst [vmem:[#allocation10_spill] sm:$0xff] %v3260_v20  ;;  %v3267_v21 = vld [vmem:[%s4445_s2 + $0x50] ss:$12 sps:$4 sm:$0xff]   ;;  %v3274_v22 = vld [vmem:[%s4445_s2] ss:$12 sps:$4 sm:$0xff]  }
   0xa   :  { %2507 = vmatprep.subr.bf16.mxu1 %v4455_v1  ;;  %4516 = vst [vmem:[#allocation11_spill] sm:$0xff] %v3267_v21  ;;  %4517 = vst [vmem:[#allocation12_spill] sm:$0xff] %v3274_v22  ;;  %v3279_v23 = vld [vmem:[%s4446_s3 + $0xac] ss:$12 sps:$4 sm:$0xff]   ;;  %v3292_v25 = vld [vmem:[%s4446_s3 + $0xa8] ss:$12 sps:$4 sm:$0xff]  }
   0xb   :  { %290 = vmatpush1.bf16.msra.mxu0 %v3181_v7  ;;  %4518 = vst [vmem:[#allocation13_spill] sm:$0xff] %v3279_v23  ;;  %v3286_v24 = vld [vmem:[%s4445_s2 + $0x38] ss:$12 sps:$4 sm:$0xff]   ;;  %v3298_v26 = vld [vmem:[%s4446_s3 + $0x94] ss:$12 sps:$4 sm:$0xff]  }
   0xc   :  { %291 = vmatprep.subr.bf16.mxu0 %v3187_v8  ;;  %4519 = vst [vmem:[#allocation14_spill] sm:$0xff] %v3286_v24  ;;  %v3305_v27 = vld [vmem:[%s4445_s2 + $0x20] ss:$12 sps:$4 sm:$0xff]   ;;  %v3312_v29 = vld [vmem:[%s4446_s3 + $0x90] ss:$12 sps:$4 sm:$0xff]  }
   0xd   :  { %2508 = vmatpush3.bf16.msra.mxu1 %v3229_v15  ;;  %4520 = vst [vmem:[#allocation15_spill] sm:$0xff] %v3305_v27  ;;  %v3318_v30 = vld [vmem:[%s4446_s3 + $0x7c] ss:$12 sps:$4 sm:$0xff]   ;;  %v3333_v32 = vld [vmem:[%s4446_s3 + $0x78] ss:$12 sps:$4 sm:$0xff]  }
   0xe   :  { %2509 = vmatprep.subr.bf16.mxu1 %v4455_v1  ;;  %v3326_v31 = vld [vmem:[%s4445_s2 + $0x8] ss:$12 sps:$4 sm:$0xff]   ;;  %v3339_v33 = vld [vmem:[%s4446_s3 + $0x64] ss:$12 sps:$4 sm:$0xff]   ;;  %v3352_v35 = vld [vmem:[%s4446_s3 + $0x60] ss:$12 sps:$4 sm:$0xff]  }
   0xf   :  { %292 = vmatpush1.bf16.msra.mxu0 %v3198_v10  ;;  %4521 = vst [vmem:[#allocation16_spill] sm:$0xff] %v3326_v31  ;;  %v3345_v34 = vld [vmem:[%s4446_s3 + $0xb0] ss:$12 sps:$4 sm:$0xff]   ;;  %v3359_v36 = vld [vmem:[%s4446_s3 + $0x4c] ss:$12 sps:$4 sm:$0xff]  }
  0x10   :  { %293 = vmatprep.subr.bf16.mxu0 %v3203_v11  ;;  %v3365_v37 = vld [vmem:[%s4446_s3 + $0x98] ss:$12 sps:$4 sm:$0xff]   ;;  %v3374_v38 = vld [vmem:[%s4446_s3 + $0x48] ss:$12 sps:$4 sm:$0xff]   ;;  %v3386_v40 = vld [vmem:[%s4446_s3 + $0x80] ss:$12 sps:$4 sm:$0xff]  }
  0x11   :  { %2510 = vmatpush3.bf16.msra.mxu1 %v3248_v18  ;;  %v3380_v39 = vld [vmem:[%s4446_s3 + $0x34] ss:$12 sps:$4 sm:$0xff]   ;;  %v3393_v41 = vld [vmem:[%s4446_s3 + $0x30] ss:$12 sps:$4 sm:$0xff]   ;;  %v3412_v44 = vld [vmem:[%s4446_s3 + $0x18] ss:$12 sps:$4 sm:$0xff]  }
  0x12   :  { %2511 = vmatprep.subr.bf16.mxu1 %v4455_v1  ;;  %v3399_v42 = vld [vmem:[%s4446_s3 + $0x1c] ss:$12 sps:$4 sm:$0xff]   ;;  %v3418_v45 = vld [vmem:[%s4446_s3 + $0x4] ss:$12 sps:$4 sm:$0xff]   ;;  %v3431_v47 = vld [vmem:[%s4446_s3] ss:$12 sps:$4 sm:$0xff]  }
  0x13   :  { %294 = vmatpush1.bf16.msra.mxu0 %v3216_v13  ;;  %v3405_v43 = vld [vmem:[%s4446_s3 + $0x68] ss:$12 sps:$4 sm:$0xff]   ;;  %v3424_v46 = vld [vmem:[%s4446_s3 + $0x50] ss:$12 sps:$4 sm:$0xff]   ;;  %v3438_v48 = vld [vmem:[%s4446_s3 + $0x38] ss:$12 sps:$4 sm:$0xff]  }
  0x14   :  { %295 = vmatprep.subr.bf16.mxu0 %v3222_v14  ;;  %v3446_v49 = vld [vmem:[%s4446_s3 + $0x20] ss:$12 sps:$4 sm:$0xff]   ;;  %v3457_v50 = vld [vmem:[%s4446_s3 + $0x8] ss:$12 sps:$4 sm:$0xff]  }
  0x15   :  { %2512 = vmatpush3.bf16.msra.mxu1 %v3267_v21  ;;  %v3505_v51 = vld [vmem:[%s4449_s4] ss:$0 sm:$0xff] }
  0x16   :  { %2513 = vmatprep.subr.bf16.mxu1 %v4455_v1  ;;  %4522 = vst [vmem:[#allocation17_spill] sm:$0xff] %v3505_v51 }
  0x17   :  { %296 = vmatpush1.bf16.msra.mxu0 %v3236_v16 }
  0x18   :  { %297 = vmatprep.subr.bf16.mxu0 %v3242_v17 }
  0x19   :  { %2514 = vmatpush3.bf16.msra.mxu1 %v3286_v24 }
  0x1a   :  { %2515 = vmatprep.subr.bf16.mxu1 %v4455_v1 }
  0x1b   :  { %298 = vmatpush1.bf16.msra.mxu0 %v3254_v19 }
  0x1c   :  { %299 = vmatprep.subr.bf16.mxu0 %v3260_v20 }
  0x1d   :  { %2516 = vmatpush3.bf16.msra.mxu1 %v3305_v27 }
  0x1e   :  { %2517 = vmatprep.subr.bf16.mxu1 %v4455_v1 }
  0x1f   :  { %300 = vmatpush1.bf16.msra.mxu0 %v3274_v22 }
  0x20   :  { %525 = vmatprep.subr.bf16.mxu0 %v3279_v23 }
  0x21   :  { %2518 = vmatpush3.bf16.msra.mxu1 %v3326_v31 }
  0x22   :  { %318 = vmatmul.mubr.bf16.vlgmr.msra.gmra.mxu0 %v3104_v28  ;;  %2523 = vmatprep.subr.bf16.mxu1 %v4455_v1 }
  0x23   :  { %526 = vmatpush1.bf16.msra.mxu0 %v3292_v25  ;;  %557 = vmatprep.mubr.bf16.mxu0 %v4453_v2 }
  0x24   :  { %527 = vmatprep.subr.bf16.mxu0 %v3298_v26  ;;  %2520 = vmatmul.mubr.bf16.vlgmr.msra.gmra.mxu1 %v3104_v28 }
  0x25   :  { %2524 = vmatpush3.bf16.msra.mxu1 %v3345_v34  ;;  %2539 = vmatprep.mubr.msk.bf16.mxu1 %vm3103_vm0, %v4455_v1 }
  0x26   :  { %2525 = vmatprep.subr.bf16.mxu1 %v4455_v1 }
  0x27   :  { %528 = vmatpush1.bf16.msra.mxu0 %v3312_v29 }
  0x28   :  { %529 = vmatprep.subr.bf16.mxu0 %v3318_v30 }
  0x29   :  { %2526 = vmatpush3.bf16.msra.mxu1 %v3365_v37 }
  0x2a   :  { %2527 = vmatprep.subr.bf16.mxu1 %v4455_v1 }
  0x2b   :  { %530 = vmatpush1.bf16.msra.mxu0 %v3333_v32 }
  0x2c   :  { %531 = vmatprep.subr.bf16.mxu0 %v3339_v33 }
  0x2d   :  { %2528 = vmatpush3.bf16.msra.mxu1 %v3386_v40 }
  0x2e   :  { %2529 = vmatprep.subr.bf16.mxu1 %v4455_v1 }
  0x2f   :  { %532 = vmatpush1.bf16.msra.mxu0 %v3352_v35 }
  0x30   :  { %533 = vmatprep.subr.bf16.mxu0 %v3359_v36 }
  0x31   :  { %2530 = vmatpush3.bf16.msra.mxu1 %v3405_v43 }
  0x32   :  { %2531 = vmatprep.subr.bf16.mxu1 %v4455_v1 }
  0x33   :  { %534 = vmatpush1.bf16.msra.mxu0 %v3374_v38 }
  0x34   :  { %535 = vmatprep.subr.bf16.mxu0 %v3380_v39 }
  0x35   :  { %2532 = vmatpush3.bf16.msra.mxu1 %v3424_v46 }
  0x36   :  { %2533 = vmatprep.subr.bf16.mxu1 %v4455_v1 }
  0x37   :  { %536 = vmatpush1.bf16.msra.mxu0 %v3393_v41 }
  0x38   :  { %537 = vmatprep.subr.bf16.mxu0 %v3399_v42 }
  0x39   :  { %2534 = vmatpush3.bf16.msra.mxu1 %v3438_v48 }
  0x3a   :  { %2535 = vmatprep.subr.bf16.mxu1 %v4455_v1 }
  0x3b   :  { %538 = vmatpush1.bf16.msra.mxu0 %v3412_v44 }
  0x3c   :  { %539 = vmatprep.subr.bf16.mxu0 %v3418_v45 }
  0x3d   :  { %2536 = vmatpush3.bf16.msra.mxu1 %v3446_v49 }
  0x3e   :  { %2537 = vmatprep.subr.bf16.mxu1 %v4455_v1 }
  0x3f   :  { %540 = vmatpush1.bf16.msra.mxu0 %v3431_v47 }
  0x40   :  { %637 = vmatprep.subr.bf16.mxu0 %v3148_v0 }
  0x41   :  { %2538 = vmatpush3.bf16.msra.mxu1 %v3457_v50 }
  0x42   :  { %558 = vmatmul.mubr.bf16.vlgmr.msra.gmra.mxu0 %v3104_v28  ;;  %2543 = vmatprep.subr.bf16.mxu1 %v4455_v1 }
  0x43   :  { %638 = vmatpush1.bf16.msra.mxu0 %v3155_v3  ;;  %669 = vmatprep.mubr.bf16.mxu0 %v4453_v2 }
  0x44   :  { %639 = vmatprep.subr.bf16.mxu0 %v3163_v4  ;;  %2540 = vmatmul.mubr.bf16.vlgmr.msra.gmra.mxu1 %v3104_v28 }
  0x45   :  { %2544 = vmatpush3.bf16.msra.mxu1 %v3192_v9  ;;  %2559 = vmatprep.mubr.msk.bf16.mxu1 %vm3103_vm0, %v4455_v1 }
  0x46   :  { %2545 = vmatprep.subr.bf16.mxu1 %v4455_v1 }
  0x47   :  { %640 = vmatpush1.bf16.msra.mxu0 %v3169_v5 }
  0x48   :  { %641 = vmatprep.subr.bf16.mxu0 %v3175_v6 }
  0x49   :  { %2546 = vmatpush3.bf16.msra.mxu1 %v3210_v12 }
  0x4a   :  { %2547 = vmatprep.subr.bf16.mxu1 %v4455_v1 }
  0x4b   :  { %642 = vmatpush1.bf16.msra.mxu0 %v3181_v7 }
  0x4c   :  { %643 = vmatprep.subr.bf16.mxu0 %v3187_v8 }
  0x4d   :  { %2548 = vmatpush3.bf16.msra.mxu1 %v3229_v15 }
  0x4e   :  { %2549 = vmatprep.subr.bf16.mxu1 %v4455_v1 }
  0x4f   :  { %644 = vmatpush1.bf16.msra.mxu0 %v3198_v10 }
  0x50   :  { %645 = vmatprep.subr.bf16.mxu0 %v3203_v11 }
  0x51   :  { %2550 = vmatpush3.bf16.msra.mxu1 %v3248_v18 }
  0x52   :  { %2551 = vmatprep.subr.bf16.mxu1 %v4455_v1 }
  0x53   :  { %646 = vmatpush1.bf16.msra.mxu0 %v3216_v13 }
  0x54   :  { %647 = vmatprep.subr.bf16.mxu0 %v3222_v14 }
  0x55   :  { %2552 = vmatpush3.bf16.msra.mxu1 %v3267_v21 }
  0x56   :  { %2553 = vmatprep.subr.bf16.mxu1 %v4455_v1 }
  0x57   :  { %648 = vmatpush1.bf16.msra.mxu0 %v3236_v16 }
  0x58   :  { %649 = vmatprep.subr.bf16.mxu0 %v3242_v17 }
  0x59   :  { %2554 = vmatpush3.bf16.msra.mxu1 %v3286_v24 }
  0x5a   :  { %2555 = vmatprep.subr.bf16.mxu1 %v4455_v1 }
  0x5b   :  { %650 = vmatpush1.bf16.msra.mxu0 %v3254_v19 }
  0x5c   :  { %651 = vmatprep.subr.bf16.mxu0 %v3260_v20 }
  0x5d   :  { %2556 = vmatpush3.bf16.msra.mxu1 %v3305_v27 }
  0x5e   :  { %2557 = vmatprep.subr.bf16.mxu1 %v4455_v1 }
  0x5f   :  { %652 = vmatpush1.bf16.msra.mxu0 %v3274_v22 }
  0x60   :  { %749 = vmatprep.subr.bf16.mxu0 %v3279_v23 }
  0x61   :  { %2558 = vmatpush3.bf16.msra.mxu1 %v3326_v31 }
  0x62   :  { %2563 = vmatprep.subr.bf16.mxu1 %v4455_v1 }
  0xe2   :  { %v319_v53 = vpop.f32.mrf.mxu0 }
  0xe3   :  { %v366_v54 = vadd.f32 %v319_v53, %v153_v52  ;;  %v2263_v52 = vld [vmem:[%s4448_s1 + $0x54] sm:$0xff] }
  0xe4   :  { %v321_v55 = vpop.f32.mrf.mxu0  ;;  %v360_v61 = vpop.f32.mrf.mxu1 }
  0xe5   :  { %v2261_v56 = vmul.f32 -1.442695, %v366_v54  ;;  %v373_v60 = vadd.f32 %v321_v55, %v154_v57  ;;  %v393_v54 = vunpack.c.l.bf16 %v2263_v52  ;;  %v152_v55 = vld [vmem:[%s4447_s0 + $0x8] sm:$0xf] }
  0xe6   :  { %v323_v58 = vpop.f32.mrf.mxu0  ;;  %v2521_v63 = vpop.f32.mrf.mxu1 }
  0xe7   :  { %2891 = vpow2.f32 %v2261_v56  ;;  %v2262_v62 = vmul.f32 -1.442695, %v373_v60  ;;  %v394_v63 = vunpack.c.h.bf16 %v2263_v52 }
  0xe8   :  { %v324_v59 = vpop.f32.mrf.mxu0  ;;  %v363_v28 = vpop.f32.mrf.mxu1 }
  0xe9   :  { %2893 = vpow2.f32 %v2262_v62 }
  0xea   :  { %v2522_v2 = vpop.f32.mrf.mxu1 }
  0xeb   :  { %v380_v2 = vadd.f32 %v3505_v51, %v360_v61 }
  0xf4   :  { %v2892_v1 = vpop.eup %2891 }
  0xf5   :  { %v370_v23 = vadd.f32 1.0, %v2892_v1 }
  0xf6   :  { %v2894_v53 = vpop.eup %2893 }
  0xf7   :  { %2895 = vrcp.f32 %v370_v23  ;;  %v377_v56 = vadd.f32 1.0, %v2894_v53  ;;  %v155_v23 = vunpack.c.l.bf16 %v152_v55 }
  0xf9   :  { %2897 = vrcp.f32 %v377_v56 }
 0x102   :  { %v559_v1 = vpop.f32.mrf.mxu0 }
 0x103   :  { %v606_v57 = vadd.f32 %v559_v1, %v393_v54 }
 0x104   :  { %v2896_v58 = vpop.eup %2895  ;;  %v561_v59 = vpop.f32.mrf.mxu0 }
 0x105   :  { %v381_v60 = vmul.f32 %v2896_v58, %v380_v2  ;;  %v2289_v62 = vmul.f32 -1.442695, %v606_v57  ;;  %v613_v20 = vadd.f32 %v561_v59, %v394_v63  ;;  %v600_v27 = vpop.f32.mrf.mxu1 }
 0x106   :  { %v563_v28 = vpop.f32.mrf.mxu0  ;;  %v2898_v55 = vpop.eup %2897 }
 0x107   :  { %v382_v31 = vadd.f32 %v381_v60, %v155_v23  ;;  %2899 = vpow2.f32 %v2289_v62  ;;  %v2290_v19 = vmul.f32 -1.442695, %v613_v20  ;;  %v2541_v53 = vpop.f32.mrf.mxu1  ;;  %v384_v51 = vsub.f32 1.0, %v2898_v55 }
 0x108   :  { %v564_v22 = vpop.f32.mrf.mxu0  ;;  %v386_v52 = vmul.f32 0.0, %v2898_v55  ;;  %v4523_v20 = vmov 0.0  }
 0x109   :  { %2901 = vtanh.f32 %v382_v31  ;;  %v603_v17 = vpop.f32.mrf.mxu1  ;;  %v2264_v31 = vld [vmem:[%s4448_s1 + $0x5c] sm:$0xf] }
 0x10a   :  { %2903 = vpow2.f32 %v2290_v19  ;;  %v3521_v19 = vld [vmem:[%s4451_s5] ss:$0 sm:$0xff]  ;;  %v395_v59 = vunpack.c.l.bf16 %v2264_v31 }
 0x10b   :  { %v2542_v61 = vpop.f32.mrf.mxu1  ;;  %v620_v58 = vadd.f32 %v3521_v19, %v600_v27  ;;  %v4530_v31 = vld [vmem:[#allocation16_spill] sm:$0xff] }
 0x114   :  { %v2900_v54 = vpop.eup %2899 }
 0x115   :  { %v610_v1 = vadd.f32 1.0, %v2900_v54 }
 0x116   :  { %v2902_v56 = vpop.eup %2901 }
 0x117   :  { %2905 = vrcp.f32 %v610_v1  ;;  %v385_v2 = vmul.f32 %v2902_v56, %v384_v51  ;;  %v2904_v17 = vpop.eup %2903  ;;  %v4524_v51 = vmov 0   ;;  %v4525_v56 = vld [vmem:[#allocation8_spill] sm:$0xff] }
 0x118   :  { %v617_v23 = vadd.f32 1.0, %v2904_v17  ;;  %v4529_v17 = vld [vmem:[#allocation12_spill] sm:$0xff] }
 0x119   :  { %v3511_v57 = vadd.f32 %v386_v52, %v385_v2  ;;  %v4526_v2 = vld [vmem:[#allocation9_spill] sm:$0xff]  ;;  %v4527_v52 = vld [vmem:[#allocation15_spill] sm:$0xff] }
 0x11a   :  { %2907 = vrcp.f32 %v617_v23  ;;  %v4531_v23 = vld [vmem:[#allocation13_spill] sm:$0xff] }
 0x11b   :  { %v388_v22 = vpack.c.bf16 %v3511_v57, %v3511_v57 }
 0x11d   :  { %389 = vst [vmem:[%s4450_s6] sm:$0xf] %v388_v22  ;;  %670 = vmatmul.mubr.bf16.vlgmr.msra.gmra.mxu0 %v388_v22  ;;  %2560 = vmatmul.mubr.bf16.vlgmr.msra.gmra.mxu1 %v388_v22  ;;  %v4528_v22 = vld [vmem:[#allocation10_spill] sm:$0xff] }
 0x11e   :  { %750 = vmatpush1.bf16.msra.mxu0 %v3292_v25  ;;  %2564 = vmatpush3.bf16.msra.mxu1 %v3345_v34 }
 0x11f   :  { %751 = vmatprep.subr.bf16.mxu0 %v3298_v26  ;;  %2565 = vmatprep.subr.bf16.mxu1 %v4523_v20 }
 0x120   :  { %781 = vmatprep.mubr.bf16.mxu0 %v4524_v51  ;;  %2579 = vmatprep.mubr.msk.bf16.mxu1 %vm3103_vm0, %v4523_v20 }
 0x122   :  { %752 = vmatpush1.bf16.msra.mxu0 %v3312_v29  ;;  %2566 = vmatpush3.bf16.msra.mxu1 %v3365_v37 }
 0x123   :  { %753 = vmatprep.subr.bf16.mxu0 %v3318_v30  ;;  %2567 = vmatprep.subr.bf16.mxu1 %v4523_v20 }
 0x124   :  { %v2906_v60 = vpop.eup %2905 }
 0x125   :  { %v621_v62 = vmul.f32 %v2906_v60, %v620_v58  ;;  %v2292_v58 = vld [vmem:[%s4447_s0 + $0xc] sm:$0xff] }
 0x126   :  { %754 = vmatpush1.bf16.msra.mxu0 %v3333_v32  ;;  %2568 = vmatpush3.bf16.msra.mxu1 %v3386_v40 }
 0x127   :  { %v622_v63 = vadd.f32 %v621_v62, %v395_v59  ;;  %755 = vmatprep.subr.bf16.mxu0 %v3339_v33  ;;  %2569 = vmatprep.subr.bf16.mxu1 %v4523_v20  ;;  %v2908_v27 = vpop.eup %2907  ;;  %v634_v59 = vunpack.c.l.bf16 %v2292_v58 }
 0x128   :  { %v624_v28 = vsub.f32 1.0, %v2908_v27  ;;  %v626_v55 = vmul.f32 0.0, %v2908_v27 }
 0x129   :  { %2909 = vtanh.f32 %v622_v63 }
 0x12a   :  { %756 = vmatpush1.bf16.msra.mxu0 %v3352_v35  ;;  %2570 = vmatpush3.bf16.msra.mxu1 %v3405_v43 }
 0x12b   :  { %757 = vmatprep.subr.bf16.mxu0 %v3359_v36  ;;  %2571 = vmatprep.subr.bf16.mxu1 %v4523_v20 }
 0x12e   :  { %758 = vmatpush1.bf16.msra.mxu0 %v3374_v38  ;;  %2572 = vmatpush3.bf16.msra.mxu1 %v3424_v46 }
 0x12f   :  { %759 = vmatprep.subr.bf16.mxu0 %v3380_v39  ;;  %2573 = vmatprep.subr.bf16.mxu1 %v4523_v20 }
 0x132   :  { %760 = vmatpush1.bf16.msra.mxu0 %v3393_v41  ;;  %2574 = vmatpush3.bf16.msra.mxu1 %v3438_v48 }
 0x133   :  { %761 = vmatprep.subr.bf16.mxu0 %v3399_v42  ;;  %2575 = vmatprep.subr.bf16.mxu1 %v4523_v20 }
 0x136   :  { %v2910_v53 = vpop.eup %2909  ;;  %762 = vmatpush1.bf16.msra.mxu0 %v3412_v44  ;;  %2576 = vmatpush3.bf16.msra.mxu1 %v3446_v49 }
 0x137   :  { %763 = vmatprep.subr.bf16.mxu0 %v3418_v45  ;;  %2577 = vmatprep.subr.bf16.mxu1 %v4523_v20  ;;  %v625_v61 = vmul.f32 %v2910_v53, %v624_v28 }
 0x139   :  { %v3558_v54 = vadd.f32 %v626_v55, %v625_v61  ;;  %v635_v61 = vunpack.c.h.bf16 %v2292_v58  ;;  %v3613_v58 = vld [vmem:[%s4447_s0 + $0x14] ss:$12 sps:$4 sm:$0xff]  }
 0x13a   :  { %764 = vmatpush1.bf16.msra.mxu0 %v3431_v47  ;;  %2578 = vmatpush3.bf16.msra.mxu1 %v3457_v50  ;;  %4532 = vst [vmem:[#allocation18_spill] sm:$0xff] %v3613_v58 }
 0x13b   :  { %v628_v1 = vpack.c.bf16 %v3558_v54, %v3558_v54  ;;  %861 = vmatprep.subr.bf16.mxu0 %v3148_v0  ;;  %2583 = vmatprep.subr.bf16.mxu1 %v4523_v20 }
 0x13d   :  { %2291 = vst [vmem:[%s4452_s7 + $0x1c] sm:$0xf] %v628_v1  ;;  %782 = vmatmul.mubr.bf16.vlgmr.msra.gmra.mxu0 %v628_v1  ;;  %2580 = vmatmul.mubr.bf16.vlgmr.msra.gmra.mxu1 %v628_v1 }
 0x13e   :  { %862 = vmatpush1.bf16.msra.mxu0 %v3155_v3  ;;  %2584 = vmatpush3.bf16.msra.mxu1 %v3192_v9 }
 0x13f   :  { %863 = vmatprep.subr.bf16.mxu0 %v3163_v4  ;;  %2585 = vmatprep.subr.bf16.mxu1 %v4523_v20 }
 0x140   :  { %893 = vmatprep.mubr.bf16.mxu0 %v4524_v51  ;;  %2599 = vmatprep.mubr.msk.bf16.mxu1 %vm3103_vm0, %v4523_v20 }
 0x142   :  { %864 = vmatpush1.bf16.msra.mxu0 %v3169_v5  ;;  %2586 = vmatpush3.bf16.msra.mxu1 %v3210_v12 }
 0x143   :  { %865 = vmatprep.subr.bf16.mxu0 %v3175_v6  ;;  %2587 = vmatprep.subr.bf16.mxu1 %v4523_v20 }
 0x146   :  { %866 = vmatpush1.bf16.msra.mxu0 %v3181_v7  ;;  %2588 = vmatpush3.bf16.msra.mxu1 %v3229_v15 }
 0x147   :  { %867 = vmatprep.subr.bf16.mxu0 %v3187_v8  ;;  %2589 = vmatprep.subr.bf16.mxu1 %v4523_v20 }
 0x14a   :  { %868 = vmatpush1.bf16.msra.mxu0 %v3198_v10  ;;  %2590 = vmatpush3.bf16.msra.mxu1 %v3248_v18 }
 0x14b   :  { %869 = vmatprep.subr.bf16.mxu0 %v3203_v11  ;;  %2591 = vmatprep.subr.bf16.mxu1 %v4523_v20 }
 0x14e   :  { %870 = vmatpush1.bf16.msra.mxu0 %v3216_v13  ;;  %2592 = vmatpush3.bf16.msra.mxu1 %v3267_v21 }
 0x14f   :  { %871 = vmatprep.subr.bf16.mxu0 %v3222_v14  ;;  %2593 = vmatprep.subr.bf16.mxu1 %v4523_v20 }
 0x152   :  { %872 = vmatpush1.bf16.msra.mxu0 %v3236_v16  ;;  %2594 = vmatpush3.bf16.msra.mxu1 %v3286_v24 }
 0x153   :  { %873 = vmatprep.subr.bf16.mxu0 %v4525_v56  ;;  %2595 = vmatprep.subr.bf16.mxu1 %v4523_v20  ;;  %v2297_v56 = vld [vmem:[%s4448_s1 + $0x48] sm:$0xff] }
 0x156   :  { %874 = vmatpush1.bf16.msra.mxu0 %v4526_v2  ;;  %2596 = vmatpush3.bf16.msra.mxu1 %v4527_v52 }
 0x157   :  { %875 = vmatprep.subr.bf16.mxu0 %v4528_v22  ;;  %2597 = vmatprep.subr.bf16.mxu1 %v4523_v20 }
 0x15a   :  { %876 = vmatpush1.bf16.msra.mxu0 %v4529_v17  ;;  %2598 = vmatpush3.bf16.msra.mxu1 %v4530_v31 }
 0x15b   :  { %973 = vmatprep.subr.bf16.mxu0 %v4531_v23  ;;  %2603 = vmatprep.subr.bf16.mxu1 %v4523_v20 }
 0x1dd   :  { %v671_v60 = vpop.f32.mrf.mxu0  ;;  %v712_v62 = vpop.f32.mrf.mxu1 }
 0x1de   :  { %v718_v63 = vadd.f32 %v671_v60, %v634_v59  ;;  %v746_v60 = vunpack.c.l.bf16 %v2297_v56 }
 0x1df   :  { %v673_v27 = vpop.f32.mrf.mxu0  ;;  %v2561_v28 = vpop.f32.mrf.mxu1 }
 0x1e0   :  { %v2294_v53 = vmul.f32 -1.442695, %v718_v63  ;;  %v725_v23 = vadd.f32 %v673_v27, %v635_v61 }
 0x1e1   :  { %v675_v55 = vpop.f32.mrf.mxu0  ;;  %v715_v1 = vpop.f32.mrf.mxu1 }
 0x1e2   :  { %2911 = vpow2.f32 %v2294_v53  ;;  %v2295_v22 = vmul.f32 -1.442695, %v725_v23  ;;  %v636_v23 = vunpack.c.l.bf16 %v3613_v58  ;;  %v747_v1 = vunpack.c.h.bf16 %v2297_v56 }
 0x1e3   :  { %v676_v31 = vpop.f32.mrf.mxu0  ;;  %v2562_v17 = vpop.f32.mrf.mxu1 }
 0x1e4   :  { %2913 = vpow2.f32 %v2295_v22  ;;  %v4533_v22 = vld [vmem:[#allocation17_spill] sm:$0xff] }
 0x1e5   :  { %v732_v27 = vadd.f32 %v4533_v22, %v712_v62 }
 0x1ef   :  { %v2912_v52 = vpop.eup %2911 }
 0x1f0   :  { %v722_v2 = vadd.f32 1.0, %v2912_v52 }
 0x1f1   :  { %v2914_v59 = vpop.eup %2913 }
 0x1f2   :  { %2915 = vrcp.f32 %v722_v2  ;;  %v729_v63 = vadd.f32 1.0, %v2914_v59 }
 0x1f4   :  { %2917 = vrcp.f32 %v729_v63 }
 0x1fd   :  { %v783_v31 = vpop.f32.mrf.mxu0  ;;  %v824_v17 = vpop.f32.mrf.mxu1 }
 0x1fe   :  { %v830_v52 = vadd.f32 %v783_v31, %v746_v60 }
 0x1ff   :  { %v2916_v2 = vpop.eup %2915  ;;  %v785_v28 = vpop.f32.mrf.mxu0 }
 0x200   :  { %v2581_v53 = vpop.f32.mrf.mxu1  ;;  %v733_v61 = vmul.f32 %v2916_v2, %v732_v27  ;;  %v2299_v55 = vmul.f32 -1.442695, %v830_v52  ;;  %v837_v13 = vadd.f32 %v785_v28, %v747_v1 }
 0x201   :  { %v787_v24 = vpop.f32.mrf.mxu0  ;;  %v2918_v58 = vpop.eup %2917 }
 0x202   :  { %v827_v16 = vpop.f32.mrf.mxu1  ;;  %v734_v14 = vadd.f32 %v733_v61, %v636_v23  ;;  %2919 = vpow2.f32 %v2299_v55  ;;  %v2300_v11 = vmul.f32 -1.442695, %v837_v13  ;;  %v736_v31 = vsub.f32 1.0, %v2918_v58  ;;  %v3632_v13 = vld [vmem:[%s4448_s1 + $0x44] ss:$12 sps:$4 sm:$0xff]   ;;  %v2302_v55 = vld [vmem:[%s4447_s0 + $0x18] sm:$0xff] }
 0x203   :  { %v788_v21 = vpop.f32.mrf.mxu0  ;;  %v738_v63 = vmul.f32 %v2918_v58, %v3511_v57  ;;  %v844_v24 = vadd.f32 %v3521_v19, %v824_v17  ;;  %v858_v1 = vunpack.c.l.bf16 %v2302_v55 }
 0x204   :  { %v2582_v59 = vpop.f32.mrf.mxu1  ;;  %2921 = vtanh.f32 %v734_v14  ;;  %v748_v21 = vunpack.c.h.bf16 %v3632_v13 }
 0x205   :  { %2923 = vpow2.f32 %v2300_v11 }
 0x20f   :  { %v2920_v62 = vpop.eup %2919 }
 0x210   :  { %v834_v60 = vadd.f32 1.0, %v2920_v62 }
 0x211   :  { %v2922_v22 = vpop.eup %2921 }
 0x212   :  { %2925 = vrcp.f32 %v834_v60  ;;  %v737_v27 = vmul.f32 %v2922_v22, %v736_v31  ;;  %v2924_v11 = vpop.eup %2923 }
 0x213   :  { %v841_v14 = vadd.f32 1.0, %v2924_v11 }
 0x214   :  { %v3618_v56 = vadd.f32 %v738_v63, %v737_v27 }
 0x215   :  { %2927 = vrcp.f32 %v841_v14 }
 0x216   :  { %v740_v16 = vpack.c.bf16 %v3618_v56, %v3618_v56 }
 0x218   :  { %2296 = vst [vmem:[%s4450_s6 + $0x4] sm:$0xf] %v740_v16  ;;  %894 = vmatmul.mubr.bf16.vlgmr.msra.gmra.mxu0 %v740_v16  ;;  %2600 = vmatmul.mubr.bf16.vlgmr.msra.gmra.mxu1 %v740_v16  ;;  %v859_v16 = vunpack.c.h.bf16 %v2302_v55 }
 0x219   :  { %974 = vmatpush1.bf16.msra.mxu0 %v3292_v25  ;;  %2604 = vmatpush3.bf16.msra.mxu1 %v3345_v34 }
 0x21a   :  { %975 = vmatprep.subr.bf16.mxu0 %v3298_v26  ;;  %2605 = vmatprep.subr.bf16.mxu1 %v4523_v20 }
 0x21b   :  { %1005 = vmatprep.mubr.bf16.mxu0 %v4524_v51  ;;  %2619 = vmatprep.mubr.msk.bf16.mxu1 %vm3103_vm0, %v4523_v20 }
 0x21d   :  { %976 = vmatpush1.bf16.msra.mxu0 %v3312_v29  ;;  %2606 = vmatpush3.bf16.msra.mxu1 %v3365_v37 }
 0x21e   :  { %977 = vmatprep.subr.bf16.mxu0 %v3318_v30  ;;  %2607 = vmatprep.subr.bf16.mxu1 %v4523_v20 }
 0x21f   :  { %v2926_v57 = vpop.eup %2925 }
 0x220   :  { %v845_v58 = vmul.f32 %v2926_v57, %v844_v24 }
 0x221   :  { %978 = vmatpush1.bf16.msra.mxu0 %v3333_v32  ;;  %2608 = vmatpush3.bf16.msra.mxu1 %v3386_v40 }
 0x222   :  { %v846_v23 = vadd.f32 %v845_v58, %v748_v21  ;;  %979 = vmatprep.subr.bf16.mxu0 %v3339_v33  ;;  %2609 = vmatprep.subr.bf16.mxu1 %v4523_v20  ;;  %v2928_v17 = vpop.eup %2927 }
 0x223   :  { %v848_v22 = vsub.f32 1.0, %v2928_v17  ;;  %v850_v28 = vmul.f32 %v2928_v17, %v3558_v54  ;;  %v4546_v54 = vld [vmem:[#allocation13_spill] sm:$0xff] }
 0x224   :  { %2929 = vtanh.f32 %v846_v23 }
 0x225   :  { %980 = vmatpush1.bf16.msra.mxu0 %v3352_v35  ;;  %2610 = vmatpush3.bf16.msra.mxu1 %v3405_v43 }
 0x226   :  { %981 = vmatprep.subr.bf16.mxu0 %v3359_v36  ;;  %2611 = vmatprep.subr.bf16.mxu1 %v4523_v20 }
 0x229   :  { %982 = vmatpush1.bf16.msra.mxu0 %v3374_v38  ;;  %2612 = vmatpush3.bf16.msra.mxu1 %v3424_v46 }
 0x22a   :  { %983 = vmatprep.subr.bf16.mxu0 %v3380_v39  ;;  %2613 = vmatprep.subr.bf16.mxu1 %v4523_v20 }
 0x22d   :  { %984 = vmatpush1.bf16.msra.mxu0 %v3393_v41  ;;  %2614 = vmatpush3.bf16.msra.mxu1 %v3438_v48 }
 0x22e   :  { %985 = vmatprep.subr.bf16.mxu0 %v3399_v42  ;;  %2615 = vmatprep.subr.bf16.mxu1 %v4523_v20 }
 0x231   :  { %v2930_v52 = vpop.eup %2929  ;;  %986 = vmatpush1.bf16.msra.mxu0 %v3412_v44  ;;  %2616 = vmatpush3.bf16.msra.mxu1 %v3446_v49 }
 0x232   :  { %987 = vmatprep.subr.bf16.mxu0 %v3418_v45  ;;  %2617 = vmatprep.subr.bf16.mxu1 %v4523_v20  ;;  %v849_v2 = vmul.f32 %v2930_v52, %v848_v22  ;;  %v2307_v22 = vld [vmem:[%s4448_s1 + $0x3c] sm:$0xff] }
 0x234   :  { %v3664_v53 = vadd.f32 %v850_v28, %v849_v2  ;;  %v970_v2 = vunpack.c.l.bf16 %v2307_v22 }
 0x235   :  { %988 = vmatpush1.bf16.msra.mxu0 %v3431_v47  ;;  %2618 = vmatpush3.bf16.msra.mxu1 %v3457_v50 }
 0x236   :  { %v852_v61 = vpack.c.bf16 %v3664_v53, %v3664_v53  ;;  %1085 = vmatprep.subr.bf16.mxu0 %v3148_v0  ;;  %2623 = vmatprep.subr.bf16.mxu1 %v4523_v20  ;;  %v4534_v0 = vld [vmem:[#allocation4_spill] sm:$0xff] }
 0x238   :  { %2301 = vst [vmem:[%s4452_s7 + $0x18] sm:$0xf] %v852_v61  ;;  %1006 = vmatmul.mubr.bf16.vlgmr.msra.gmra.mxu0 %v852_v61  ;;  %2620 = vmatmul.mubr.bf16.vlgmr.msra.gmra.mxu1 %v852_v61 }
 0x239   :  { %1086 = vmatpush1.bf16.msra.mxu0 %v3155_v3  ;;  %2624 = vmatpush3.bf16.msra.mxu1 %v3192_v9  ;;  %v4535_v3 = vld [vmem:[#allocation5_spill] sm:$0xff] }
 0x23a   :  { %1087 = vmatprep.subr.bf16.mxu0 %v3163_v4  ;;  %2625 = vmatprep.subr.bf16.mxu1 %v4523_v20  ;;  %v4536_v4 = vld [vmem:[#allocation11_spill] sm:$0xff]  ;;  %v4541_v9 = vld [vmem:[#allocation9_spill] sm:$0xff] }
 0x23b   :  { %1117 = vmatprep.mubr.bf16.mxu0 %v4524_v51  ;;  %2639 = vmatprep.mubr.msk.bf16.mxu1 %vm3103_vm0, %v4523_v20 }
 0x23d   :  { %1088 = vmatpush1.bf16.msra.mxu0 %v3169_v5  ;;  %2626 = vmatpush3.bf16.msra.mxu1 %v3210_v12  ;;  %v4537_v5 = vld [vmem:[#allocation6_spill] sm:$0xff] }
 0x23e   :  { %1089 = vmatprep.subr.bf16.mxu0 %v3175_v6  ;;  %2627 = vmatprep.subr.bf16.mxu1 %v4523_v20  ;;  %v4538_v6 = vld [vmem:[#allocation7_spill] sm:$0xff]  ;;  %v4543_v12 = vld [vmem:[#allocation10_spill] sm:$0xff] }
 0x241   :  { %1090 = vmatpush1.bf16.msra.mxu0 %v3181_v7  ;;  %2628 = vmatpush3.bf16.msra.mxu1 %v3229_v15  ;;  %v4539_v7 = vld [vmem:[#allocation14_spill] sm:$0xff]  ;;  %v4544_v15 = vld [vmem:[#allocation12_spill] sm:$0xff] }
 0x242   :  { %1091 = vmatprep.subr.bf16.mxu0 %v3187_v8  ;;  %2629 = vmatprep.subr.bf16.mxu1 %v4523_v20  ;;  %v4540_v8 = vld [vmem:[#allocation8_spill] sm:$0xff] }
 0x245   :  { %1092 = vmatpush1.bf16.msra.mxu0 %v3198_v10  ;;  %2630 = vmatpush3.bf16.msra.mxu1 %v3248_v18  ;;  %v4542_v10 = vld [vmem:[#allocation15_spill] sm:$0xff]  ;;  %v4545_v18 = vld [vmem:[#allocation16_spill] sm:$0xff] }
 0x246   :  { %1093 = vmatprep.subr.bf16.mxu0 %v4534_v0  ;;  %2631 = vmatprep.subr.bf16.mxu1 %v4523_v20 }
 0x249   :  { %1094 = vmatpush1.bf16.msra.mxu0 %v4535_v3  ;;  %2632 = vmatpush3.bf16.msra.mxu1 %v4536_v4  ;;  %v4547_v3 = vld [vmem:[#allocation18_spill] sm:$0xff] }
 0x24a   :  { %1095 = vmatprep.subr.bf16.mxu0 %v4537_v5  ;;  %2633 = vmatprep.subr.bf16.mxu1 %v4523_v20  ;;  %v860_v4 = vunpack.c.h.bf16 %v4547_v3  ;;  %v4548_v5 = vld [vmem:[#allocation17_spill] sm:$0xff] }
 0x24b   :  { %v3902_v3 = vld [vmem:[%s4445_s2 + $0x20] ss:$12 sps:$4 sm:$0xff]  }
 0x24c   :  { %4557 = vst [vmem:[#allocation15_spill] sm:$0xff] %v3902_v3 }
 0x24d   :  { %1096 = vmatpush1.bf16.msra.mxu0 %v4538_v6  ;;  %2634 = vmatpush3.bf16.msra.mxu1 %v4539_v7 }
 0x24e   :  { %1097 = vmatprep.subr.bf16.mxu0 %v4540_v8  ;;  %2635 = vmatprep.subr.bf16.mxu1 %v4523_v20 }
 0x251   :  { %1098 = vmatpush1.bf16.msra.mxu0 %v4541_v9  ;;  %2636 = vmatpush3.bf16.msra.mxu1 %v4542_v10 }
 0x252   :  { %1099 = vmatprep.subr.bf16.mxu0 %v4543_v12  ;;  %2637 = vmatprep.subr.bf16.mxu1 %v4523_v20 }
 0x255   :  { %1100 = vmatpush1.bf16.msra.mxu0 %v4544_v15  ;;  %2638 = vmatpush3.bf16.msra.mxu1 %v4545_v18  ;;  %v971_v18 = vunpack.c.h.bf16 %v2307_v22 }
 0x256   :  { %1197 = vmatprep.subr.bf16.mxu0 %v4546_v54  ;;  %2643 = vmatprep.subr.bf16.mxu1 %v4523_v20 }
 0x2d8   :  { %v895_v59 = vpop.f32.mrf.mxu0  ;;  %v936_v62 = vpop.f32.mrf.mxu1 }
 0x2d9   :  { %v942_v60 = vadd.f32 %v895_v59, %v858_v1  ;;  %v956_v6 = vadd.f32 %v4548_v5, %v936_v62 }
 0x2da   :  { %v897_v31 = vpop.f32.mrf.mxu0  ;;  %v2601_v27 = vpop.f32.mrf.mxu1 }
 0x2db   :  { %v2304_v63 = vmul.f32 -1.442695, %v942_v60  ;;  %v949_v57 = vadd.f32 %v897_v31, %v859_v16 }
 0x2dc   :  { %v899_v11 = vpop.f32.mrf.mxu0  ;;  %v939_v14 = vpop.f32.mrf.mxu1 }
 0x2dd   :  { %2931 = vpow2.f32 %v2304_v63  ;;  %v2305_v58 = vmul.f32 -1.442695, %v949_v57 }
 0x2de   :  { %v900_v21 = vpop.f32.mrf.mxu0  ;;  %v2602_v24 = vpop.f32.mrf.mxu1 }
 0x2df   :  { %2933 = vpow2.f32 %v2305_v58 }
 0x2ea   :  { %v2932_v23 = vpop.eup %2931 }
 0x2eb   :  { %v946_v17 = vadd.f32 1.0, %v2932_v23 }
 0x2ec   :  { %v2934_v52 = vpop.eup %2933 }
 0x2ed   :  { %2935 = vrcp.f32 %v946_v17  ;;  %v953_v28 = vadd.f32 1.0, %v2934_v52  ;;  %v972_v17 = vunpack.c.l.bf16 %v3632_v13  ;;  %v3858_v13 = vld [vmem:[%s4445_s2 + $0x48] ss:$12 sps:$4 sm:$0xff]  }
 0x2ee   :  { %4550 = vst [vmem:[#allocation5_spill] sm:$0xff] %v3858_v13  ;;  %v3870_v52 = vld [vmem:[%s4445_s2 + $0x34] ss:$12 sps:$4 sm:$0xff]  }
 0x2ef   :  { %2937 = vrcp.f32 %v953_v28  ;;  %4552 = vst [vmem:[#allocation6_spill] sm:$0xff] %v3870_v52  ;;  %v3883_v28 = vld [vmem:[%s4445_s2 + $0x38] ss:$12 sps:$4 sm:$0xff]  }
 0x2f0   :  { %4554 = vst [vmem:[#allocation14_spill] sm:$0xff] %v3883_v28 }
 0x2f8   :  { %v1007_v61 = vpop.f32.mrf.mxu0  ;;  %v1048_v0 = vpop.f32.mrf.mxu1 }
 0x2f9   :  { %v1054_v7 = vadd.f32 %v1007_v61, %v970_v2  ;;  %v3877_v2 = vld [vmem:[%s4445_s2 + $0x30] ss:$12 sps:$4 sm:$0xff]  }
 0x2fa   :  { %v2936_v8 = vpop.eup %2935  ;;  %v1009_v9 = vpop.f32.mrf.mxu0  ;;  %4553 = vst [vmem:[#allocation7_spill] sm:$0xff] %v3877_v2  ;;  %v3889_v61 = vld [vmem:[%s4445_s2 + $0x1c] ss:$12 sps:$4 sm:$0xff]  }
 0x2fb   :  { %v2621_v10 = vpop.f32.mrf.mxu1  ;;  %v957_v12 = vmul.f32 %v2936_v8, %v956_v6  ;;  %v2309_v15 = vmul.f32 -1.442695, %v1054_v7  ;;  %v1061_v31 = vadd.f32 %v1009_v9, %v971_v18  ;;  %4555 = vst [vmem:[#allocation8_spill] sm:$0xff] %v3889_v61  ;;  %v3915_v6 = vld [vmem:[%s4445_s2] ss:$12 sps:$4 sm:$0xff]   ;;  %v2312_v9 = vld [vmem:[%s4447_s0 + $0x24] sm:$0xff] }
 0x2fc   :  { %v1011_v54 = vpop.f32.mrf.mxu0  ;;  %v2938_v63 = vpop.eup %2937  ;;  %4559 = vst [vmem:[#allocation12_spill] sm:$0xff] %v3915_v6  ;;  %v3921_v7 = vld [vmem:[%s4445_s2 + $0x8] ss:$12 sps:$4 sm:$0xff]   ;;  %v3927_v8 = vld [vmem:[%s4446_s3 + $0xac] ss:$12 sps:$4 sm:$0xff]   ;;  %v1082_v10 = vunpack.c.l.bf16 %v2312_v9 }
 0x2fd   :  { %v1051_v55 = vpop.f32.mrf.mxu1  ;;  %v958_v1 = vadd.f32 %v957_v12, %v860_v4  ;;  %2939 = vpow2.f32 %v2309_v15  ;;  %v2310_v27 = vmul.f32 -1.442695, %v1061_v31  ;;  %v960_v11 = vsub.f32 1.0, %v2938_v63  ;;  %v3908_v4 = vld [vmem:[%s4445_s2 + $0x4] ss:$12 sps:$4 sm:$0xff]   ;;  %4560 = vst [vmem:[#allocation16_spill] sm:$0xff] %v3921_v7 }
 0x2fe   :  { %v1012_v59 = vpop.f32.mrf.mxu0  ;;  %v962_v24 = vmul.f32 %v2938_v63, %v3618_v56  ;;  %4558 = vst [vmem:[#allocation10_spill] sm:$0xff] %v3908_v4  ;;  %4561 = vst [vmem:[#allocation13_spill] sm:$0xff] %v3927_v8 }
 0x2ff   :  { %v2622_v60 = vpop.f32.mrf.mxu1  ;;  %2941 = vtanh.f32 %v958_v1  ;;  %v1083_v59 = vunpack.c.h.bf16 %v2312_v9 }
 0x300   :  { %2943 = vpow2.f32 %v2310_v27 }
 0x30a   :  { %v2940_v62 = vpop.eup %2939 }
 0x30b   :  { %v1058_v16 = vadd.f32 1.0, %v2940_v62 }
 0x30c   :  { %v2942_v14 = vpop.eup %2941 }
 0x30d   :  { %2945 = vrcp.f32 %v1058_v16  ;;  %v961_v21 = vmul.f32 %v2942_v14, %v960_v11  ;;  %v2944_v23 = vpop.eup %2943 }
 0x30e   :  { %v1065_v56 = vadd.f32 1.0, %v2944_v23  ;;  %v3940_v23 = vld [vmem:[%s4447_s0 + $0x2c] ss:$12 sps:$4 sm:$0xff]  }
 0x30f   :  { %v3719_v57 = vadd.f32 %v962_v24, %v961_v21  ;;  %v2317_v21 = vld [vmem:[%s4448_s1 + $0x30] sm:$0xff] }
 0x310   :  { %2947 = vrcp.f32 %v1065_v56 }
 0x311   :  { %v964_v58 = vpack.c.bf16 %v3719_v57, %v3719_v57 }
 0x313   :  { %2306 = vst [vmem:[%s4450_s6 + $0x8] sm:$0xf] %v964_v58  ;;  %1118 = vmatmul.mubr.bf16.vlgmr.msra.gmra.mxu0 %v964_v58  ;;  %2640 = vmatmul.mubr.bf16.vlgmr.msra.gmra.mxu1 %v964_v58  ;;  %v1194_v58 = vunpack.c.l.bf16 %v2317_v21 }
 0x314   :  { %1198 = vmatpush1.bf16.msra.mxu0 %v3292_v25  ;;  %2644 = vmatpush3.bf16.msra.mxu1 %v3345_v34  ;;  %v1068_v25 = vadd.f32 %v3521_v19, %v1048_v0  ;;  %v3896_v0 = vld [vmem:[%s4445_s2 + $0x18] ss:$12 sps:$4 sm:$0xff]  }
 0x315   :  { %1199 = vmatprep.subr.bf16.mxu0 %v3298_v26  ;;  %2645 = vmatprep.subr.bf16.mxu1 %v4523_v20  ;;  %4556 = vst [vmem:[#allocation9_spill] sm:$0xff] %v3896_v0 }
 0x316   :  { %1229 = vmatprep.mubr.bf16.mxu0 %v4524_v51  ;;  %2659 = vmatprep.mubr.msk.bf16.mxu1 %vm3103_vm0, %v4523_v20 }
 0x318   :  { %1200 = vmatpush1.bf16.msra.mxu0 %v3312_v29  ;;  %2646 = vmatpush3.bf16.msra.mxu1 %v3365_v37 }
 0x319   :  { %1201 = vmatprep.subr.bf16.mxu0 %v3318_v30  ;;  %2647 = vmatprep.subr.bf16.mxu1 %v4523_v20 }
 0x31a   :  { %v2946_v26 = vpop.eup %2945 }
 0x31b   :  { %v1069_v34 = vmul.f32 %v2946_v26, %v1068_v25  ;;  %v1084_v26 = vunpack.c.l.bf16 %v3940_v23 }
 0x31c   :  { %1202 = vmatpush1.bf16.msra.mxu0 %v3333_v32  ;;  %2648 = vmatpush3.bf16.msra.mxu1 %v3386_v40  ;;  %v3785_v40 = vld [vmem:[%s4445_s2 + $0xb0] ss:$12 sps:$4 sm:$0xff]  }
 0x31d   :  { %v1070_v22 = vadd.f32 %v1069_v34, %v972_v17  ;;  %1203 = vmatprep.subr.bf16.mxu0 %v3339_v33  ;;  %2649 = vmatprep.subr.bf16.mxu1 %v4523_v20  ;;  %v2948_v29 = vpop.eup %2947 }
 0x31e   :  { %v1072_v30 = vsub.f32 1.0, %v2948_v29 }
 0x31f   :  { %2949 = vtanh.f32 %v1070_v22 }
 0x320   :  { %1204 = vmatpush1.bf16.msra.mxu0 %v3352_v35  ;;  %2650 = vmatpush3.bf16.msra.mxu1 %v3405_v43  ;;  %v1074_v35 = vmul.f32 %v2948_v29, %v3664_v53  ;;  %v3807_v43 = vld [vmem:[%s4445_s2 + $0x98] ss:$12 sps:$4 sm:$0xff]   ;;  %v3864_v53 = vld [vmem:[%s4445_s2 + $0x50] ss:$12 sps:$4 sm:$0xff]  }
 0x321   :  { %1205 = vmatprep.subr.bf16.mxu0 %v3359_v36  ;;  %2651 = vmatprep.subr.bf16.mxu1 %v4523_v20  ;;  %4551 = vst [vmem:[#allocation11_spill] sm:$0xff] %v3864_v53 }
 0x324   :  { %1206 = vmatpush1.bf16.msra.mxu0 %v3374_v38  ;;  %2652 = vmatpush3.bf16.msra.mxu1 %v3424_v46  ;;  %v3769_v38 = vld [vmem:[%s4445_s2 + $0xac] ss:$12 sps:$4 sm:$0xff]  }
 0x325   :  { %1207 = vmatprep.subr.bf16.mxu0 %v3380_v39  ;;  %2653 = vmatprep.subr.bf16.mxu1 %v4523_v20  ;;  %v3779_v39 = vld [vmem:[%s4445_s2 + $0xa8] ss:$12 sps:$4 sm:$0xff]   ;;  %v3826_v46 = vld [vmem:[%s4445_s2 + $0x80] ss:$12 sps:$4 sm:$0xff]  }
 0x328   :  { %1208 = vmatpush1.bf16.msra.mxu0 %v3393_v41  ;;  %2654 = vmatpush3.bf16.msra.mxu1 %v3438_v48  ;;  %v3791_v41 = vld [vmem:[%s4445_s2 + $0x94] ss:$12 sps:$4 sm:$0xff]  }
 0x329   :  { %1209 = vmatprep.subr.bf16.mxu0 %v3399_v42  ;;  %2655 = vmatprep.subr.bf16.mxu1 %v4523_v20  ;;  %v3801_v42 = vld [vmem:[%s4445_s2 + $0x90] ss:$12 sps:$4 sm:$0xff]   ;;  %v3839_v48 = vld [vmem:[%s4445_s2 + $0x60] ss:$12 sps:$4 sm:$0xff]  }
 0x32c   :  { %v2950_v32 = vpop.eup %2949  ;;  %1210 = vmatpush1.bf16.msra.mxu0 %v3412_v44  ;;  %2656 = vmatpush3.bf16.msra.mxu1 %v3446_v49  ;;  %v3813_v44 = vld [vmem:[%s4445_s2 + $0x7c] ss:$12 sps:$4 sm:$0xff]  }
 0x32d   :  { %1211 = vmatprep.subr.bf16.mxu0 %v3418_v45  ;;  %2657 = vmatprep.subr.bf16.mxu1 %v4523_v20  ;;  %v1073_v33 = vmul.f32 %v2950_v32, %v1072_v30  ;;  %v3820_v45 = vld [vmem:[%s4445_s2 + $0x78] ss:$12 sps:$4 sm:$0xff]   ;;  %v3845_v49 = vld [vmem:[%s4445_s2 + $0x68] ss:$12 sps:$4 sm:$0xff]  }
 0x32f   :  { %v3760_v36 = vadd.f32 %v1074_v35, %v1073_v33 }
 0x330   :  { %1212 = vmatpush1.bf16.msra.mxu0 %v3431_v47  ;;  %2658 = vmatpush3.bf16.msra.mxu1 %v3457_v50  ;;  %v3832_v47 = vld [vmem:[%s4445_s2 + $0x64] ss:$12 sps:$4 sm:$0xff]   ;;  %v3851_v50 = vld [vmem:[%s4445_s2 + $0x4c] ss:$12 sps:$4 sm:$0xff]  }
 0x331   :  { %v1076_v37 = vpack.c.bf16 %v3760_v36, %v3760_v36  ;;  %1309 = vmatprep.subr.bf16.mxu0 %v3769_v38  ;;  %2663 = vmatprep.subr.bf16.mxu1 %v4523_v20  ;;  %4549 = vst [vmem:[#allocation4_spill] sm:$0xff] %v3851_v50 }
 0x333   :  { %2311 = vst [vmem:[%s4452_s7 + $0x14] sm:$0xf] %v1076_v37  ;;  %1230 = vmatmul.mubr.bf16.vlgmr.msra.gmra.mxu0 %v1076_v37  ;;  %2660 = vmatmul.mubr.bf16.vlgmr.msra.gmra.mxu1 %v1076_v37  ;;  %v1195_v37 = vunpack.c.h.bf16 %v2317_v21  ;;  %v3967_v21 = vld [vmem:[%s4446_s3 + $0x94] ss:$12 sps:$4 sm:$0xff]  }
 0x334   :  { %1310 = vmatpush1.bf16.msra.mxu0 %v3779_v39  ;;  %2664 = vmatpush3.bf16.msra.mxu1 %v3785_v40 }
 0x335   :  { %1311 = vmatprep.subr.bf16.mxu0 %v3791_v41  ;;  %2665 = vmatprep.subr.bf16.mxu1 %v4523_v20 }
 0x336   :  { %1341 = vmatprep.mubr.bf16.mxu0 %v4524_v51  ;;  %2679 = vmatprep.mubr.msk.bf16.mxu1 %vm3103_vm0, %v4523_v20 }
 0x338   :  { %1312 = vmatpush1.bf16.msra.mxu0 %v3801_v42  ;;  %2666 = vmatpush3.bf16.msra.mxu1 %v3807_v43 }
 0x339   :  { %1313 = vmatprep.subr.bf16.mxu0 %v3813_v44  ;;  %2667 = vmatprep.subr.bf16.mxu1 %v4523_v20 }
 0x33c   :  { %1314 = vmatpush1.bf16.msra.mxu0 %v3820_v45  ;;  %2668 = vmatpush3.bf16.msra.mxu1 %v3826_v46 }
 0x33d   :  { %1315 = vmatprep.subr.bf16.mxu0 %v3832_v47  ;;  %2669 = vmatprep.subr.bf16.mxu1 %v4523_v20 }
 0x340   :  { %1316 = vmatpush1.bf16.msra.mxu0 %v3839_v48  ;;  %2670 = vmatpush3.bf16.msra.mxu1 %v3845_v49 }
 0x341   :  { %1317 = vmatprep.subr.bf16.mxu0 %v3851_v50  ;;  %2671 = vmatprep.subr.bf16.mxu1 %v4523_v20 }
 0x344   :  { %1318 = vmatpush1.bf16.msra.mxu0 %v3858_v13  ;;  %2672 = vmatpush3.bf16.msra.mxu1 %v3864_v53 }
 0x345   :  { %1319 = vmatprep.subr.bf16.mxu0 %v3870_v52  ;;  %2673 = vmatprep.subr.bf16.mxu1 %v4523_v20 }
 0x348   :  { %1320 = vmatpush1.bf16.msra.mxu0 %v3877_v2  ;;  %2674 = vmatpush3.bf16.msra.mxu1 %v3883_v28 }
 0x349   :  { %1321 = vmatprep.subr.bf16.mxu0 %v3889_v61  ;;  %2675 = vmatprep.subr.bf16.mxu1 %v4523_v20 }
 0x34c   :  { %1322 = vmatpush1.bf16.msra.mxu0 %v3896_v0  ;;  %2676 = vmatpush3.bf16.msra.mxu1 %v3902_v3 }
 0x34d   :  { %1323 = vmatprep.subr.bf16.mxu0 %v3908_v4  ;;  %2677 = vmatprep.subr.bf16.mxu1 %v4523_v20 }
 0x350   :  { %1324 = vmatpush1.bf16.msra.mxu0 %v3915_v6  ;;  %2678 = vmatpush3.bf16.msra.mxu1 %v3921_v7 }
 0x351   :  { %1421 = vmatprep.subr.bf16.mxu0 %v3927_v8  ;;  %2683 = vmatprep.subr.bf16.mxu1 %v4523_v20 }
 0x3d3   :  { %v1119_v12 = vpop.f32.mrf.mxu0  ;;  %v1160_v15 = vpop.f32.mrf.mxu1 }
 0x3d4   :  { %v1166_v18 = vadd.f32 %v1119_v12, %v1082_v10  ;;  %v1180_v34 = vadd.f32 %v4548_v5, %v1160_v15 }
 0x3d5   :  { %v1121_v54 = vpop.f32.mrf.mxu0  ;;  %v2641_v55 = vpop.f32.mrf.mxu1 }
 0x3d6   :  { %v2314_v1 = vmul.f32 -1.442695, %v1166_v18  ;;  %v1173_v62 = vadd.f32 %v1121_v54, %v1083_v59 }
 0x3d7   :  { %v1123_v60 = vpop.f32.mrf.mxu0  ;;  %v1163_v31 = vpop.f32.mrf.mxu1 }
 0x3d8   :  { %2951 = vpow2.f32 %v2314_v1  ;;  %v2315_v16 = vmul.f32 -1.442695, %v1173_v62 }
 0x3d9   :  { %v1124_v27 = vpop.f32.mrf.mxu0  ;;  %v2642_v63 = vpop.f32.mrf.mxu1 }
 0x3da   :  { %2953 = vpow2.f32 %v2315_v16 }
 0x3e5   :  { %v2952_v11 = vpop.eup %2951 }
 0x3e6   :  { %v1170_v14 = vadd.f32 1.0, %v2952_v11 }
 0x3e7   :  { %v2954_v24 = vpop.eup %2953 }
 0x3e8   :  { %2955 = vrcp.f32 %v1170_v14  ;;  %v1177_v56 = vadd.f32 1.0, %v2954_v24  ;;  %v3955_v14 = vld [vmem:[%s4446_s3 + $0xa8] ss:$12 sps:$4 sm:$0xff]   ;;  %v3974_v24 = vld [vmem:[%s4448_s1 + $0x2c] ss:$12 sps:$4 sm:$0xff]  }
 0x3ea   :  { %2957 = vrcp.f32 %v1177_v56  ;;  %v3982_v56 = vld [vmem:[%s4446_s3 + $0x90] ss:$12 sps:$4 sm:$0xff]  }
 0x3f3   :  { %v1231_v17 = vpop.f32.mrf.mxu0  ;;  %v1272_v25 = vpop.f32.mrf.mxu1 }
 0x3f4   :  { %v1278_v22 = vadd.f32 %v1231_v17, %v1194_v58  ;;  %v3988_v17 = vld [vmem:[%s4446_s3 + $0x98] ss:$12 sps:$4 sm:$0xff]  }
 0x3f5   :  { %v2956_v29 = vpop.eup %2955  ;;  %v1233_v30 = vpop.f32.mrf.mxu0 }
 0x3f6   :  { %v2661_v32 = vpop.f32.mrf.mxu1  ;;  %v1181_v33 = vmul.f32 %v2956_v29, %v1180_v34  ;;  %v2319_v35 = vmul.f32 -1.442695, %v1278_v22  ;;  %v1285_v55 = vadd.f32 %v1233_v30, %v1195_v37  ;;  %v1292_v34 = vadd.f32 %v3521_v19, %v1272_v25  ;;  %v3996_v22 = vld [vmem:[%s4446_s3 + $0x7c] ss:$12 sps:$4 sm:$0xff]   ;;  %v4009_v19 = vld [vmem:[%s4446_s3 + $0x80] ss:$12 sps:$4 sm:$0xff]  }
 0x3f7   :  { %v1235_v9 = vpop.f32.mrf.mxu0  ;;  %v2958_v59 = vpop.eup %2957  ;;  %v4003_v32 = vld [vmem:[%s4446_s3 + $0x78] ss:$12 sps:$4 sm:$0xff]   ;;  %v4028_v37 = vld [vmem:[%s4446_s3 + $0x68] ss:$12 sps:$4 sm:$0xff]  }
 0x3f8   :  { %v1275_v10 = vpop.f32.mrf.mxu1  ;;  %v1182_v12 = vadd.f32 %v1181_v33, %v1084_v26  ;;  %2959 = vpow2.f32 %v2319_v35  ;;  %v2320_v1 = vmul.f32 -1.442695, %v1285_v55  ;;  %v1184_v60 = vsub.f32 1.0, %v2958_v59  ;;  %v4015_v33 = vld [vmem:[%s4446_s3 + $0x64] ss:$12 sps:$4 sm:$0xff]  }
 0x3f9   :  { %v1236_v18 = vpop.f32.mrf.mxu0  ;;  %v1186_v63 = vmul.f32 %v2958_v59, %v3719_v57  ;;  %v3961_v57 = vld [vmem:[%s4446_s3 + $0xb0] ss:$12 sps:$4 sm:$0xff]   ;;  %v1196_v26 = vunpack.c.h.bf16 %v3974_v24  ;;  %v4022_v35 = vld [vmem:[%s4446_s3 + $0x60] ss:$12 sps:$4 sm:$0xff]   ;;  %v4041_v10 = vld [vmem:[%s4446_s3 + $0x48] ss:$12 sps:$4 sm:$0xff]  }
 0x3fa   :  { %v2662_v54 = vpop.f32.mrf.mxu1  ;;  %2961 = vtanh.f32 %v1182_v12  ;;  %v4034_v9 = vld [vmem:[%s4446_s3 + $0x4c] ss:$12 sps:$4 sm:$0xff]   ;;  %v4047_v12 = vld [vmem:[%s4446_s3 + $0x50] ss:$12 sps:$4 sm:$0xff]   ;;  %v4053_v18 = vld [vmem:[%s4446_s3 + $0x34] ss:$12 sps:$4 sm:$0xff]  }
 0x3fb   :  { %2963 = vpow2.f32 %v2320_v1  ;;  %v4060_v55 = vld [vmem:[%s4446_s3 + $0x30] ss:$12 sps:$4 sm:$0xff]   ;;  %v4066_v1 = vld [vmem:[%s4446_s3 + $0x38] ss:$12 sps:$4 sm:$0xff]  }
 0x3fc   :  { %v4072_v59 = vld [vmem:[%s4446_s3 + $0x1c] ss:$12 sps:$4 sm:$0xff]  }
 0x405   :  { %v2960_v5 = vpop.eup %2959 }
 0x406   :  { %v1282_v15 = vadd.f32 1.0, %v2960_v5 }
 0x407   :  { %v2962_v31 = vpop.eup %2961 }
 0x408   :  { %2965 = vrcp.f32 %v1282_v15  ;;  %v1185_v27 = vmul.f32 %v2962_v31, %v1184_v60  ;;  %v2964_v11 = vpop.eup %2963  ;;  %v4079_v60 = vld [vmem:[%s4446_s3 + $0x18] ss:$12 sps:$4 sm:$0xff]   ;;  %v4085_v31 = vld [vmem:[%s4446_s3 + $0x20] ss:$12 sps:$4 sm:$0xff]  }
 0x409   :  { %v1289_v58 = vadd.f32 1.0, %v2964_v11 }
 0x40a   :  { %v3945_v62 = vadd.f32 %v1186_v63, %v1185_v27  ;;  %v4091_v27 = vld [vmem:[%s4446_s3 + $0x4] ss:$12 sps:$4 sm:$0xff]  }
 0x40b   :  { %2967 = vrcp.f32 %v1289_v58  ;;  %v4101_v58 = vld [vmem:[%s4446_s3] ss:$12 sps:$4 sm:$0xff]  }
 0x40c   :  { %v1188_v16 = vpack.c.bf16 %v3945_v62, %v3945_v62 }
 0x40e   :  { %2316 = vst [vmem:[%s4450_s6 + $0xc] sm:$0xf] %v1188_v16  ;;  %1342 = vmatmul.mubr.bf16.vlgmr.msra.gmra.mxu0 %v1188_v16  ;;  %2680 = vmatmul.mubr.bf16.vlgmr.msra.gmra.mxu1 %v1188_v16 }
 0x40f   :  { %1422 = vmatpush1.bf16.msra.mxu0 %v3955_v14  ;;  %2684 = vmatpush3.bf16.msra.mxu1 %v3961_v57 }
 0x410   :  { %1423 = vmatprep.subr.bf16.mxu0 %v3967_v21  ;;  %2685 = vmatprep.subr.bf16.mxu1 %v4523_v20 }
 0x411   :  { %1453 = vmatprep.mubr.bf16.mxu0 %v4524_v51  ;;  %2699 = vmatprep.mubr.msk.bf16.mxu1 %vm3103_vm0, %v4523_v20 }
 0x413   :  { %1424 = vmatpush1.bf16.msra.mxu0 %v3982_v56  ;;  %2686 = vmatpush3.bf16.msra.mxu1 %v3988_v17 }
 0x414   :  { %1425 = vmatprep.subr.bf16.mxu0 %v3996_v22  ;;  %2687 = vmatprep.subr.bf16.mxu1 %v4523_v20 }
 0x415   :  { %v2966_v29 = vpop.eup %2965 }
 0x416   :  { %v1293_v30 = vmul.f32 %v2966_v29, %v1292_v34 }
 0x417   :  { %1426 = vmatpush1.bf16.msra.mxu0 %v4003_v32  ;;  %2688 = vmatpush3.bf16.msra.mxu1 %v4009_v19 }
 0x418   :  { %v1294_v25 = vadd.f32 %v1293_v30, %v1196_v26  ;;  %1427 = vmatprep.subr.bf16.mxu0 %v4015_v33  ;;  %2689 = vmatprep.subr.bf16.mxu1 %v4523_v20  ;;  %v2968_v54 = vpop.eup %2967  ;;  %v4107_v26 = vld [vmem:[%s4446_s3 + $0x8] ss:$12 sps:$4 sm:$0xff]  }
 0x419   :  { %v1296_v5 = vsub.f32 1.0, %v2968_v54  ;;  %v1298_v16 = vmul.f32 %v2968_v54, %v3760_v36  ;;  %v2322_v36 = vld [vmem:[%s4447_s0 + $0x30] sm:$0xff] }
 0x41a   :  { %2969 = vtanh.f32 %v1294_v25  ;;  %v1306_v29 = vunpack.c.l.bf16 %v2322_v36 }
 0x41b   :  { %1428 = vmatpush1.bf16.msra.mxu0 %v4022_v35  ;;  %2690 = vmatpush3.bf16.msra.mxu1 %v4028_v37 }
 0x41c   :  { %1429 = vmatprep.subr.bf16.mxu0 %v4034_v9  ;;  %2691 = vmatprep.subr.bf16.mxu1 %v4523_v20 }
 0x41f   :  { %1430 = vmatpush1.bf16.msra.mxu0 %v4041_v10  ;;  %2692 = vmatpush3.bf16.msra.mxu1 %v4047_v12 }
 0x420   :  { %1431 = vmatprep.subr.bf16.mxu0 %v4053_v18  ;;  %2693 = vmatprep.subr.bf16.mxu1 %v4523_v20 }
 0x423   :  { %1432 = vmatpush1.bf16.msra.mxu0 %v4060_v55  ;;  %2694 = vmatpush3.bf16.msra.mxu1 %v4066_v1 }
 0x424   :  { %1433 = vmatprep.subr.bf16.mxu0 %v4072_v59  ;;  %2695 = vmatprep.subr.bf16.mxu1 %v4523_v20 }
 0x427   :  { %v2970_v15 = vpop.eup %2969  ;;  %1434 = vmatpush1.bf16.msra.mxu0 %v4079_v60  ;;  %2696 = vmatpush3.bf16.msra.mxu1 %v4085_v31 }
 0x428   :  { %1435 = vmatprep.subr.bf16.mxu0 %v4091_v27  ;;  %2697 = vmatprep.subr.bf16.mxu1 %v4523_v20  ;;  %v1297_v63 = vmul.f32 %v2970_v15, %v1296_v5 }
 0x42a   :  { %v4096_v11 = vadd.f32 %v1298_v16, %v1297_v63  ;;  %v1307_v16 = vunpack.c.h.bf16 %v2322_v36 }
 0x42b   :  { %1436 = vmatpush1.bf16.msra.mxu0 %v4101_v58  ;;  %2698 = vmatpush3.bf16.msra.mxu1 %v4107_v26 }
 0x42c   :  { %v1300_v34 = vpack.c.bf16 %v4096_v11, %v4096_v11  ;;  %1533 = vmatprep.subr.bf16.mxu0 %v3769_v38  ;;  %2703 = vmatprep.subr.bf16.mxu1 %v4523_v20 }
 0x42e   :  { %2321 = vst [vmem:[%s4452_s7 + $0x10] sm:$0xf] %v1300_v34  ;;  %1454 = vmatmul.mubr.bf16.vlgmr.msra.gmra.mxu0 %v1300_v34  ;;  %2700 = vmatmul.mubr.bf16.vlgmr.msra.gmra.mxu1 %v1300_v34 }
 0x42f   :  { %1534 = vmatpush1.bf16.msra.mxu0 %v3779_v39  ;;  %2704 = vmatpush3.bf16.msra.mxu1 %v3785_v40 }
 0x430   :  { %1535 = vmatprep.subr.bf16.mxu0 %v3791_v41  ;;  %2705 = vmatprep.subr.bf16.mxu1 %v4523_v20 }
 0x431   :  { %1565 = vmatprep.mubr.bf16.mxu0 %v4524_v51  ;;  %2719 = vmatprep.mubr.msk.bf16.mxu1 %vm3103_vm0, %v4523_v20 }
 0x433   :  { %1536 = vmatpush1.bf16.msra.mxu0 %v3801_v42  ;;  %2706 = vmatpush3.bf16.msra.mxu1 %v3807_v43 }
 0x434   :  { %1537 = vmatprep.subr.bf16.mxu0 %v3813_v44  ;;  %2707 = vmatprep.subr.bf16.mxu1 %v4523_v20 }
 0x437   :  { %1538 = vmatpush1.bf16.msra.mxu0 %v3820_v45  ;;  %2708 = vmatpush3.bf16.msra.mxu1 %v3826_v46 }
 0x438   :  { %1539 = vmatprep.subr.bf16.mxu0 %v3832_v47  ;;  %2709 = vmatprep.subr.bf16.mxu1 %v4523_v20 }
 0x43b   :  { %1540 = vmatpush1.bf16.msra.mxu0 %v3839_v48  ;;  %2710 = vmatpush3.bf16.msra.mxu1 %v3845_v49 }
 0x43c   :  { %1541 = vmatprep.subr.bf16.mxu0 %v3851_v50  ;;  %2711 = vmatprep.subr.bf16.mxu1 %v4523_v20 }
 0x43f   :  { %1542 = vmatpush1.bf16.msra.mxu0 %v3858_v13  ;;  %2712 = vmatpush3.bf16.msra.mxu1 %v3864_v53 }
 0x440   :  { %1543 = vmatprep.subr.bf16.mxu0 %v3870_v52  ;;  %2713 = vmatprep.subr.bf16.mxu1 %v4523_v20 }
 0x443   :  { %1544 = vmatpush1.bf16.msra.mxu0 %v3877_v2  ;;  %2714 = vmatpush3.bf16.msra.mxu1 %v3883_v28  ;;  %v2327_v28 = vld [vmem:[%s4448_s1 + $0x24] sm:$0xff] }
 0x444   :  { %1545 = vmatprep.subr.bf16.mxu0 %v3889_v61  ;;  %2715 = vmatprep.subr.bf16.mxu1 %v4523_v20 }
 0x447   :  { %1546 = vmatpush1.bf16.msra.mxu0 %v3896_v0  ;;  %2716 = vmatpush3.bf16.msra.mxu1 %v3902_v3 }
 0x448   :  { %1547 = vmatprep.subr.bf16.mxu0 %v3908_v4  ;;  %2717 = vmatprep.subr.bf16.mxu1 %v4523_v20 }
 0x44b   :  { %1548 = vmatpush1.bf16.msra.mxu0 %v3915_v6  ;;  %2718 = vmatpush3.bf16.msra.mxu1 %v3921_v7 }
 0x44c   :  { %1645 = vmatprep.subr.bf16.mxu0 %v3927_v8  ;;  %2723 = vmatprep.subr.bf16.mxu1 %v4523_v20 }
 0x4ce   :  { %v1343_v30 = vpop.f32.mrf.mxu0  ;;  %v1384_v25 = vpop.f32.mrf.mxu1 }
 0x4cf   :  { %v1390_v54 = vadd.f32 %v1343_v30, %v1306_v29  ;;  %v1418_v30 = vunpack.c.l.bf16 %v2327_v28 }
 0x4d0   :  { %v1345_v5 = vpop.f32.mrf.mxu0  ;;  %v2681_v15 = vpop.f32.mrf.mxu1 }
 0x4d1   :  { %v2324_v63 = vmul.f32 -1.442695, %v1390_v54  ;;  %v1397_v8 = vadd.f32 %v1345_v5, %v1307_v16  ;;  %v1419_v16 = vunpack.c.h.bf16 %v2327_v28 }
 0x4d2   :  { %v1347_v34 = vpop.f32.mrf.mxu0  ;;  %v1387_v6 = vpop.f32.mrf.mxu1 }
 0x4d3   :  { %2971 = vpow2.f32 %v2324_v63  ;;  %v2325_v3 = vmul.f32 -1.442695, %v1397_v8  ;;  %v1308_v6 = vunpack.c.h.bf16 %v3940_v23 }
 0x4d4   :  { %v1348_v7 = vpop.f32.mrf.mxu0  ;;  %v2682_v4 = vpop.f32.mrf.mxu1 }
 0x4d5   :  { %2973 = vpow2.f32 %v2325_v3  ;;  %v4162_v4 = vld [vmem:[%s4449_s4] ss:$0 sm:$0xff] }
 0x4d6   :  { %4562 = vst [vmem:[#allocation18_spill] sm:$0xff] %v4162_v4  ;;  %v1404_v3 = vadd.f32 %v4162_v4, %v1384_v25 }
 0x4e0   :  { %v2972_v0 = vpop.eup %2971 }
 0x4e1   :  { %v1394_v61 = vadd.f32 1.0, %v2972_v0 }
 0x4e2   :  { %v2974_v29 = vpop.eup %2973 }
 0x4e3   :  { %2975 = vrcp.f32 %v1394_v61  ;;  %v1401_v15 = vadd.f32 1.0, %v2974_v29 }
 0x4e5   :  { %2977 = vrcp.f32 %v1401_v15 }
 0x4ee   :  { %v1455_v54 = vpop.f32.mrf.mxu0  ;;  %v1496_v36 = vpop.f32.mrf.mxu1 }
 0x4ef   :  { %v1502_v0 = vadd.f32 %v1455_v54, %v1418_v30 }
 0x4f0   :  { %v2976_v61 = vpop.eup %2975  ;;  %v1457_v7 = vpop.f32.mrf.mxu0 }
 0x4f1   :  { %v2701_v8 = vpop.f32.mrf.mxu1  ;;  %v1405_v5 = vmul.f32 %v2976_v61, %v1404_v3  ;;  %v2329_v63 = vmul.f32 -1.442695, %v1502_v0  ;;  %v1509_v53 = vadd.f32 %v1457_v7, %v1419_v16  ;;  %v4564_v16 = vld [vmem:[#allocation5_spill] sm:$0xff] }
 0x4f2   :  { %v1459_v34 = vpop.f32.mrf.mxu0  ;;  %v2978_v50 = vpop.eup %2977 }
 0x4f3   :  { %v1499_v29 = vpop.f32.mrf.mxu1  ;;  %v1406_v2 = vadd.f32 %v1405_v5, %v1308_v6  ;;  %2979 = vpow2.f32 %v2329_v63  ;;  %v2330_v13 = vmul.f32 -1.442695, %v1509_v53  ;;  %v1408_v54 = vsub.f32 1.0, %v2978_v50  ;;  %v4565_v34 = vld [vmem:[#allocation11_spill] sm:$0xff] }
 0x4f4   :  { %v1460_v23 = vpop.f32.mrf.mxu0  ;;  %v1410_v15 = vmul.f32 %v2978_v50, %v3945_v62  ;;  %v1420_v53 = vunpack.c.l.bf16 %v3974_v24  ;;  %v4566_v29 = vld [vmem:[#allocation6_spill] sm:$0xff] }
 0x4f5   :  { %v2702_v52 = vpop.f32.mrf.mxu1  ;;  %2981 = vtanh.f32 %v1406_v2  ;;  %v4567_v23 = vld [vmem:[#allocation7_spill] sm:$0xff] }
 0x4f6   :  { %2983 = vpow2.f32 %v2330_v13  ;;  %v4186_v52 = vld [vmem:[%s4451_s5] ss:$0 sm:$0xff] }
 0x4f7   :  { %v1516_v2 = vadd.f32 %v4186_v52, %v1496_v36 }
 0x500   :  { %v2980_v25 = vpop.eup %2979 }
 0x501   :  { %v1506_v30 = vadd.f32 1.0, %v2980_v25  ;;  %v4568_v25 = vld [vmem:[#allocation14_spill] sm:$0xff] }
 0x502   :  { %v2982_v4 = vpop.eup %2981 }
 0x503   :  { %2985 = vrcp.f32 %v1506_v30  ;;  %v1409_v3 = vmul.f32 %v2982_v4, %v1408_v54  ;;  %v2984_v13 = vpop.eup %2983  ;;  %v4569_v30 = vld [vmem:[#allocation8_spill] sm:$0xff]  ;;  %v4570_v54 = vld [vmem:[#allocation9_spill] sm:$0xff] }
 0x504   :  { %v1513_v50 = vadd.f32 1.0, %v2984_v13  ;;  %v4574_v13 = vld [vmem:[#allocation16_spill] sm:$0xff] }
 0x505   :  { %v4166_v28 = vadd.f32 %v1410_v15, %v1409_v3  ;;  %v4571_v3 = vld [vmem:[#allocation15_spill] sm:$0xff]  ;;  %v4572_v15 = vld [vmem:[#allocation10_spill] sm:$0xff] }
 0x506   :  { %2987 = vrcp.f32 %v1513_v50  ;;  %v4575_v50 = vld [vmem:[#allocation13_spill] sm:$0xff] }
 0x507   :  { %v1412_v6 = vpack.c.bf16 %v4166_v28, %v4166_v28 }
 0x509   :  { %2326 = vst [vmem:[%s4450_s6 + $0x10] sm:$0xf] %v1412_v6  ;;  %1566 = vmatmul.mubr.bf16.vlgmr.msra.gmra.mxu0 %v1412_v6  ;;  %2720 = vmatmul.mubr.bf16.vlgmr.msra.gmra.mxu1 %v1412_v6  ;;  %v4573_v6 = vld [vmem:[#allocation12_spill] sm:$0xff] }
 0x50a   :  { %1646 = vmatpush1.bf16.msra.mxu0 %v3955_v14  ;;  %2724 = vmatpush3.bf16.msra.mxu1 %v3961_v57 }
 0x50b   :  { %1647 = vmatprep.subr.bf16.mxu0 %v3967_v21  ;;  %2725 = vmatprep.subr.bf16.mxu1 %v4523_v20 }
 0x50c   :  { %1677 = vmatprep.mubr.bf16.mxu0 %v4524_v51  ;;  %2739 = vmatprep.mubr.msk.bf16.mxu1 %vm3103_vm0, %v4523_v20 }
 0x50e   :  { %1648 = vmatpush1.bf16.msra.mxu0 %v3982_v56  ;;  %2726 = vmatpush3.bf16.msra.mxu1 %v3988_v17 }
 0x50f   :  { %1649 = vmatprep.subr.bf16.mxu0 %v3996_v22  ;;  %2727 = vmatprep.subr.bf16.mxu1 %v4523_v20 }
 0x510   :  { %v2986_v62 = vpop.eup %2985 }
 0x511   :  { %v1517_v4 = vmul.f32 %v2986_v62, %v1516_v2 }
 0x512   :  { %1650 = vmatpush1.bf16.msra.mxu0 %v4003_v32  ;;  %2728 = vmatpush3.bf16.msra.mxu1 %v4009_v19 }
 0x513   :  { %v1518_v0 = vadd.f32 %v1517_v4, %v1420_v53  ;;  %1651 = vmatprep.subr.bf16.mxu0 %v4015_v33  ;;  %2729 = vmatprep.subr.bf16.mxu1 %v4523_v20  ;;  %v2988_v24 = vpop.eup %2987  ;;  %v2332_v53 = vld [vmem:[%s4447_s0 + $0x3c] sm:$0xff] }
 0x514   :  { %v1520_v36 = vsub.f32 1.0, %v2988_v24  ;;  %v1522_v8 = vmul.f32 %v2988_v24, %v4096_v11  ;;  %v4563_v11 = vld [vmem:[#allocation4_spill] sm:$0xff]  ;;  %v1530_v2 = vunpack.c.l.bf16 %v2332_v53 }
 0x515   :  { %2989 = vtanh.f32 %v1518_v0 }
 0x516   :  { %1652 = vmatpush1.bf16.msra.mxu0 %v4022_v35  ;;  %2730 = vmatpush3.bf16.msra.mxu1 %v4028_v37 }
 0x517   :  { %1653 = vmatprep.subr.bf16.mxu0 %v4034_v9  ;;  %2731 = vmatprep.subr.bf16.mxu1 %v4523_v20 }
 0x51a   :  { %1654 = vmatpush1.bf16.msra.mxu0 %v4041_v10  ;;  %2732 = vmatpush3.bf16.msra.mxu1 %v4047_v12 }
 0x51b   :  { %1655 = vmatprep.subr.bf16.mxu0 %v4053_v18  ;;  %2733 = vmatprep.subr.bf16.mxu1 %v4523_v20 }
 0x51e   :  { %1656 = vmatpush1.bf16.msra.mxu0 %v4060_v55  ;;  %2734 = vmatpush3.bf16.msra.mxu1 %v4066_v1 }
 0x51f   :  { %1657 = vmatprep.subr.bf16.mxu0 %v4072_v59  ;;  %2735 = vmatprep.subr.bf16.mxu1 %v4523_v20 }
 0x522   :  { %v2990_v61 = vpop.eup %2989  ;;  %1658 = vmatpush1.bf16.msra.mxu0 %v4079_v60  ;;  %2736 = vmatpush3.bf16.msra.mxu1 %v4085_v31 }
 0x523   :  { %1659 = vmatprep.subr.bf16.mxu0 %v4091_v27  ;;  %2737 = vmatprep.subr.bf16.mxu1 %v4523_v20  ;;  %v1521_v7 = vmul.f32 %v2990_v61, %v1520_v36 }
 0x525   :  { %v4212_v5 = vadd.f32 %v1522_v8, %v1521_v7  ;;  %v1531_v7 = vunpack.c.h.bf16 %v2332_v53  ;;  %v4267_v53 = vld [vmem:[%s4447_s0 + $0x44] ss:$12 sps:$4 sm:$0xff]  }
 0x526   :  { %1660 = vmatpush1.bf16.msra.mxu0 %v4101_v58  ;;  %2738 = vmatpush3.bf16.msra.mxu1 %v4107_v26  ;;  %4576 = vst [vmem:[#allocation17_spill] sm:$0xff] %v4267_v53 }
 0x527   :  { %v1524_v63 = vpack.c.bf16 %v4212_v5, %v4212_v5  ;;  %1757 = vmatprep.subr.bf16.mxu0 %v3769_v38  ;;  %2743 = vmatprep.subr.bf16.mxu1 %v4523_v20 }
 0x529   :  { %2331 = vst [vmem:[%s4452_s7 + $0xc] sm:$0xf] %v1524_v63  ;;  %1678 = vmatmul.mubr.bf16.vlgmr.msra.gmra.mxu0 %v1524_v63  ;;  %2740 = vmatmul.mubr.bf16.vlgmr.msra.gmra.mxu1 %v1524_v63 }
 0x52a   :  { %1758 = vmatpush1.bf16.msra.mxu0 %v3779_v39  ;;  %2744 = vmatpush3.bf16.msra.mxu1 %v3785_v40 }
 0x52b   :  { %1759 = vmatprep.subr.bf16.mxu0 %v3791_v41  ;;  %2745 = vmatprep.subr.bf16.mxu1 %v4523_v20 }
 0x52c   :  { %1789 = vmatprep.mubr.bf16.mxu0 %v4524_v51  ;;  %2759 = vmatprep.mubr.msk.bf16.mxu1 %vm3103_vm0, %v4523_v20 }
 0x52e   :  { %1760 = vmatpush1.bf16.msra.mxu0 %v3801_v42  ;;  %2746 = vmatpush3.bf16.msra.mxu1 %v3807_v43 }
 0x52f   :  { %1761 = vmatprep.subr.bf16.mxu0 %v3813_v44  ;;  %2747 = vmatprep.subr.bf16.mxu1 %v4523_v20 }
 0x532   :  { %1762 = vmatpush1.bf16.msra.mxu0 %v3820_v45  ;;  %2748 = vmatpush3.bf16.msra.mxu1 %v3826_v46 }
 0x533   :  { %1763 = vmatprep.subr.bf16.mxu0 %v3832_v47  ;;  %2749 = vmatprep.subr.bf16.mxu1 %v4523_v20 }
 0x536   :  { %1764 = vmatpush1.bf16.msra.mxu0 %v3839_v48  ;;  %2750 = vmatpush3.bf16.msra.mxu1 %v3845_v49 }
 0x537   :  { %1765 = vmatprep.subr.bf16.mxu0 %v4563_v11  ;;  %2751 = vmatprep.subr.bf16.mxu1 %v4523_v20 }
 0x53a   :  { %1766 = vmatpush1.bf16.msra.mxu0 %v4564_v16  ;;  %2752 = vmatpush3.bf16.msra.mxu1 %v4565_v34 }
 0x53b   :  { %1767 = vmatprep.subr.bf16.mxu0 %v4566_v29  ;;  %2753 = vmatprep.subr.bf16.mxu1 %v4523_v20 }
 0x53e   :  { %1768 = vmatpush1.bf16.msra.mxu0 %v4567_v23  ;;  %2754 = vmatpush3.bf16.msra.mxu1 %v4568_v25 }
 0x53f   :  { %1769 = vmatprep.subr.bf16.mxu0 %v4569_v30  ;;  %2755 = vmatprep.subr.bf16.mxu1 %v4523_v20  ;;  %v2337_v30 = vld [vmem:[%s4448_s1 + $0x18] sm:$0xff] }
 0x542   :  { %1770 = vmatpush1.bf16.msra.mxu0 %v4570_v54  ;;  %2756 = vmatpush3.bf16.msra.mxu1 %v4571_v3 }
 0x543   :  { %1771 = vmatprep.subr.bf16.mxu0 %v4572_v15  ;;  %2757 = vmatprep.subr.bf16.mxu1 %v4523_v20 }
 0x546   :  { %1772 = vmatpush1.bf16.msra.mxu0 %v4573_v6  ;;  %2758 = vmatpush3.bf16.msra.mxu1 %v4574_v13 }
 0x547   :  { %1869 = vmatprep.subr.bf16.mxu0 %v4575_v50  ;;  %2763 = vmatprep.subr.bf16.mxu1 %v4523_v20 }
 0x5c9   :  { %v1567_v62 = vpop.f32.mrf.mxu0  ;;  %v1608_v4 = vpop.f32.mrf.mxu1 }
 0x5ca   :  { %v1614_v0 = vadd.f32 %v1567_v62, %v1530_v2  ;;  %v1642_v62 = vunpack.c.l.bf16 %v2337_v30 }
 0x5cb   :  { %v1569_v24 = vpop.f32.mrf.mxu0  ;;  %v2721_v36 = vpop.f32.mrf.mxu1 }
 0x5cc   :  { %v2334_v61 = vmul.f32 -1.442695, %v1614_v0  ;;  %v1621_v50 = vadd.f32 %v1569_v24, %v1531_v7 }
 0x5cd   :  { %v1571_v8 = vpop.f32.mrf.mxu0  ;;  %v1611_v63 = vpop.f32.mrf.mxu1 }
 0x5ce   :  { %2991 = vpow2.f32 %v2334_v61  ;;  %v2335_v15 = vmul.f32 -1.442695, %v1621_v50  ;;  %v1532_v50 = vunpack.c.l.bf16 %v4267_v53  ;;  %v1643_v63 = vunpack.c.h.bf16 %v2337_v30 }
 0x5cf   :  { %v1572_v13 = vpop.f32.mrf.mxu0  ;;  %v2722_v6 = vpop.f32.mrf.mxu1 }
 0x5d0   :  { %2993 = vpow2.f32 %v2335_v15  ;;  %v4577_v15 = vld [vmem:[#allocation18_spill] sm:$0xff] }
 0x5d1   :  { %v1628_v24 = vadd.f32 %v4577_v15, %v1608_v4 }
 0x5db   :  { %v2992_v3 = vpop.eup %2991 }
 0x5dc   :  { %v1618_v54 = vadd.f32 1.0, %v2992_v3 }
 0x5dd   :  { %v2994_v2 = vpop.eup %2993 }
 0x5de   :  { %2995 = vrcp.f32 %v1618_v54  ;;  %v1625_v0 = vadd.f32 1.0, %v2994_v2 }
 0x5e0   :  { %2997 = vrcp.f32 %v1625_v0 }
 0x5e9   :  { %v1679_v13 = vpop.f32.mrf.mxu0  ;;  %v1720_v6 = vpop.f32.mrf.mxu1 }
 0x5ea   :  { %v1726_v3 = vadd.f32 %v1679_v13, %v1642_v62 }
 0x5eb   :  { %v2996_v54 = vpop.eup %2995  ;;  %v1681_v36 = vpop.f32.mrf.mxu0 }
 0x5ec   :  { %v2741_v61 = vpop.f32.mrf.mxu1  ;;  %v1629_v7 = vmul.f32 %v2996_v54, %v1628_v24  ;;  %v2339_v8 = vmul.f32 -1.442695, %v1726_v3  ;;  %v1733_v16 = vadd.f32 %v1681_v36, %v1643_v63 }
 0x5ed   :  { %v1683_v25 = vpop.f32.mrf.mxu0  ;;  %v2998_v53 = vpop.eup %2997 }
 0x5ee   :  { %v1723_v23 = vpop.f32.mrf.mxu1  ;;  %v1630_v29 = vadd.f32 %v1629_v7, %v1532_v50  ;;  %2999 = vpow2.f32 %v2339_v8  ;;  %v2340_v11 = vmul.f32 -1.442695, %v1733_v16  ;;  %v1632_v13 = vsub.f32 1.0, %v2998_v53  ;;  %v2342_v8 = vld [vmem:[%s4447_s0 + $0x48] sm:$0xff] }
 0x5ef   :  { %v1684_v34 = vpop.f32.mrf.mxu0  ;;  %v1634_v0 = vmul.f32 %v2998_v53, %v4166_v28  ;;  %v4286_v28 = vld [vmem:[%s4448_s1 + $0x14] ss:$12 sps:$4 sm:$0xff]   ;;  %v1754_v63 = vunpack.c.l.bf16 %v2342_v8 }
 0x5f0   :  { %v2742_v2 = vpop.f32.mrf.mxu1  ;;  %3001 = vtanh.f32 %v1630_v29  ;;  %v1644_v34 = vunpack.c.h.bf16 %v4286_v28  ;;  %v1740_v29 = vadd.f32 %v4186_v52, %v1720_v6 }
 0x5f1   :  { %3003 = vpow2.f32 %v2340_v11 }
 0x5fb   :  { %v3000_v4 = vpop.eup %2999 }
 0x5fc   :  { %v1730_v62 = vadd.f32 1.0, %v3000_v4 }
 0x5fd   :  { %v3002_v15 = vpop.eup %3001 }
 0x5fe   :  { %3005 = vrcp.f32 %v1730_v62  ;;  %v1633_v24 = vmul.f32 %v3002_v15, %v1632_v13  ;;  %v3004_v11 = vpop.eup %3003 }
 0x5ff   :  { %v1737_v16 = vadd.f32 1.0, %v3004_v11 }
 0x600   :  { %v4272_v30 = vadd.f32 %v1634_v0, %v1633_v24 }
 0x601   :  { %3007 = vrcp.f32 %v1737_v16 }
 0x602   :  { %v1636_v23 = vpack.c.bf16 %v4272_v30, %v4272_v30 }
 0x604   :  { %2336 = vst [vmem:[%s4450_s6 + $0x14] sm:$0xf] %v1636_v23  ;;  %1790 = vmatmul.mubr.bf16.vlgmr.msra.gmra.mxu0 %v1636_v23  ;;  %2760 = vmatmul.mubr.bf16.vlgmr.msra.gmra.mxu1 %v1636_v23  ;;  %v1755_v23 = vunpack.c.h.bf16 %v2342_v8 }
 0x605   :  { %1870 = vmatpush1.bf16.msra.mxu0 %v3955_v14  ;;  %2764 = vmatpush3.bf16.msra.mxu1 %v3961_v57 }
 0x606   :  { %1871 = vmatprep.subr.bf16.mxu0 %v3967_v21  ;;  %2765 = vmatprep.subr.bf16.mxu1 %v4523_v20 }
 0x607   :  { %1901 = vmatprep.mubr.bf16.mxu0 %v4524_v51  ;;  %2779 = vmatprep.mubr.msk.bf16.mxu1 %vm3103_vm0, %v4523_v20 }
 0x609   :  { %1872 = vmatpush1.bf16.msra.mxu0 %v3982_v56  ;;  %2766 = vmatpush3.bf16.msra.mxu1 %v3988_v17 }
 0x60a   :  { %1873 = vmatprep.subr.bf16.mxu0 %v3996_v22  ;;  %2767 = vmatprep.subr.bf16.mxu1 %v4523_v20 }
 0x60b   :  { %v3006_v25 = vpop.eup %3005 }
 0x60c   :  { %v1741_v53 = vmul.f32 %v3006_v25, %v1740_v29 }
 0x60d   :  { %1874 = vmatpush1.bf16.msra.mxu0 %v4003_v32  ;;  %2768 = vmatpush3.bf16.msra.mxu1 %v4009_v19 }
 0x60e   :  { %v1742_v50 = vadd.f32 %v1741_v53, %v1644_v34  ;;  %1875 = vmatprep.subr.bf16.mxu0 %v4015_v33  ;;  %2769 = vmatprep.subr.bf16.mxu1 %v4523_v20  ;;  %v3008_v6 = vpop.eup %3007 }
 0x60f   :  { %v1744_v15 = vsub.f32 1.0, %v3008_v6  ;;  %v1746_v36 = vmul.f32 %v3008_v6, %v4212_v5  ;;  %v4590_v5 = vld [vmem:[#allocation13_spill] sm:$0xff] }
 0x610   :  { %3009 = vtanh.f32 %v1742_v50 }
 0x611   :  { %1876 = vmatpush1.bf16.msra.mxu0 %v4022_v35  ;;  %2770 = vmatpush3.bf16.msra.mxu1 %v4028_v37 }
 0x612   :  { %1877 = vmatprep.subr.bf16.mxu0 %v4034_v9  ;;  %2771 = vmatprep.subr.bf16.mxu1 %v4523_v20 }
 0x615   :  { %1878 = vmatpush1.bf16.msra.mxu0 %v4041_v10  ;;  %2772 = vmatpush3.bf16.msra.mxu1 %v4047_v12 }
 0x616   :  { %1879 = vmatprep.subr.bf16.mxu0 %v4053_v18  ;;  %2773 = vmatprep.subr.bf16.mxu1 %v4523_v20 }
 0x619   :  { %1880 = vmatpush1.bf16.msra.mxu0 %v4060_v55  ;;  %2774 = vmatpush3.bf16.msra.mxu1 %v4066_v1 }
 0x61a   :  { %1881 = vmatprep.subr.bf16.mxu0 %v4072_v59  ;;  %2775 = vmatprep.subr.bf16.mxu1 %v4523_v20 }
 0x61d   :  { %v3010_v3 = vpop.eup %3009  ;;  %1882 = vmatpush1.bf16.msra.mxu0 %v4079_v60  ;;  %2776 = vmatpush3.bf16.msra.mxu1 %v4085_v31 }
 0x61e   :  { %1883 = vmatprep.subr.bf16.mxu0 %v4091_v27  ;;  %2777 = vmatprep.subr.bf16.mxu1 %v4523_v20  ;;  %v1745_v54 = vmul.f32 %v3010_v3, %v1744_v15  ;;  %v2347_v15 = vld [vmem:[%s4448_s1 + $0xc] sm:$0xff] }
 0x620   :  { %v4318_v61 = vadd.f32 %v1746_v36, %v1745_v54  ;;  %v1866_v54 = vunpack.c.l.bf16 %v2347_v15 }
 0x621   :  { %1884 = vmatpush1.bf16.msra.mxu0 %v4101_v58  ;;  %2778 = vmatpush3.bf16.msra.mxu1 %v4107_v26 }
 0x622   :  { %v1748_v7 = vpack.c.bf16 %v4318_v61, %v4318_v61  ;;  %1981 = vmatprep.subr.bf16.mxu0 %v3769_v38  ;;  %2783 = vmatprep.subr.bf16.mxu1 %v4523_v20  ;;  %v4578_v38 = vld [vmem:[#allocation4_spill] sm:$0xff] }
 0x624   :  { %2341 = vst [vmem:[%s4452_s7 + $0x8] sm:$0xf] %v1748_v7  ;;  %1902 = vmatmul.mubr.bf16.vlgmr.msra.gmra.mxu0 %v1748_v7  ;;  %2780 = vmatmul.mubr.bf16.vlgmr.msra.gmra.mxu1 %v1748_v7 }
 0x625   :  { %1982 = vmatpush1.bf16.msra.mxu0 %v3779_v39  ;;  %2784 = vmatpush3.bf16.msra.mxu1 %v3785_v40  ;;  %v4579_v39 = vld [vmem:[#allocation5_spill] sm:$0xff]  ;;  %v4580_v40 = vld [vmem:[#allocation11_spill] sm:$0xff] }
 0x626   :  { %1983 = vmatprep.subr.bf16.mxu0 %v3791_v41  ;;  %2785 = vmatprep.subr.bf16.mxu1 %v4523_v20  ;;  %v4581_v41 = vld [vmem:[#allocation6_spill] sm:$0xff] }
 0x627   :  { %2013 = vmatprep.mubr.bf16.mxu0 %v4524_v51  ;;  %2799 = vmatprep.mubr.msk.bf16.mxu1 %vm3103_vm0, %v4523_v20 }
 0x629   :  { %1984 = vmatpush1.bf16.msra.mxu0 %v3801_v42  ;;  %2786 = vmatpush3.bf16.msra.mxu1 %v3807_v43  ;;  %v4582_v42 = vld [vmem:[#allocation7_spill] sm:$0xff]  ;;  %v4583_v43 = vld [vmem:[#allocation14_spill] sm:$0xff] }
 0x62a   :  { %1985 = vmatprep.subr.bf16.mxu0 %v3813_v44  ;;  %2787 = vmatprep.subr.bf16.mxu1 %v4523_v20  ;;  %v4584_v44 = vld [vmem:[#allocation8_spill] sm:$0xff] }
 0x62d   :  { %1986 = vmatpush1.bf16.msra.mxu0 %v3820_v45  ;;  %2788 = vmatpush3.bf16.msra.mxu1 %v3826_v46  ;;  %v4585_v45 = vld [vmem:[#allocation9_spill] sm:$0xff]  ;;  %v4586_v46 = vld [vmem:[#allocation15_spill] sm:$0xff] }
 0x62e   :  { %1987 = vmatprep.subr.bf16.mxu0 %v3832_v47  ;;  %2789 = vmatprep.subr.bf16.mxu1 %v4523_v20  ;;  %v4587_v47 = vld [vmem:[#allocation10_spill] sm:$0xff] }
 0x631   :  { %1988 = vmatpush1.bf16.msra.mxu0 %v3839_v48  ;;  %2790 = vmatpush3.bf16.msra.mxu1 %v3845_v49  ;;  %v4588_v48 = vld [vmem:[#allocation12_spill] sm:$0xff] }
 0x632   :  { %1989 = vmatprep.subr.bf16.mxu0 %v4578_v38  ;;  %2791 = vmatprep.subr.bf16.mxu1 %v4523_v20  ;;  %v4589_v49 = vld [vmem:[#allocation16_spill] sm:$0xff] }
 0x635   :  { %1990 = vmatpush1.bf16.msra.mxu0 %v4579_v39  ;;  %2792 = vmatpush3.bf16.msra.mxu1 %v4580_v40  ;;  %v4591_v39 = vld [vmem:[#allocation17_spill] sm:$0xff] }
 0x636   :  { %1991 = vmatprep.subr.bf16.mxu0 %v4581_v41  ;;  %2793 = vmatprep.subr.bf16.mxu1 %v4523_v20  ;;  %v1756_v40 = vunpack.c.h.bf16 %v4591_v39  ;;  %v4592_v41 = vld [vmem:[#allocation18_spill] sm:$0xff] }
 0x639   :  { %1992 = vmatpush1.bf16.msra.mxu0 %v4582_v42  ;;  %2794 = vmatpush3.bf16.msra.mxu1 %v4583_v43 }
 0x63a   :  { %1993 = vmatprep.subr.bf16.mxu0 %v4584_v44  ;;  %2795 = vmatprep.subr.bf16.mxu1 %v4523_v20 }
 0x63d   :  { %1994 = vmatpush1.bf16.msra.mxu0 %v4585_v45  ;;  %2796 = vmatpush3.bf16.msra.mxu1 %v4586_v46 }
 0x63e   :  { %1995 = vmatprep.subr.bf16.mxu0 %v4587_v47  ;;  %2797 = vmatprep.subr.bf16.mxu1 %v4523_v20 }
 0x641   :  { %1996 = vmatpush1.bf16.msra.mxu0 %v4588_v48  ;;  %2798 = vmatpush3.bf16.msra.mxu1 %v4589_v49  ;;  %v1867_v49 = vunpack.c.h.bf16 %v2347_v15 }
 0x642   :  { %2092 = vmatprep.subr.bf16.mxu0 %v4590_v5  ;;  %2803 = vmatprep.subr.bf16.mxu1 %v4523_v20 }
 0x6c4   :  { %v1791_v2 = vpop.f32.mrf.mxu0  ;;  %v1832_v4 = vpop.f32.mrf.mxu1 }
 0x6c5   :  { %v1838_v62 = vadd.f32 %v1791_v2, %v1754_v63  ;;  %v1852_v42 = vadd.f32 %v4592_v41, %v1832_v4 }
 0x6c6   :  { %v1793_v13 = vpop.f32.mrf.mxu0  ;;  %v2761_v24 = vpop.f32.mrf.mxu1 }
 0x6c7   :  { %v2344_v0 = vmul.f32 -1.442695, %v1838_v62  ;;  %v1845_v25 = vadd.f32 %v1793_v13, %v1755_v23 }
 0x6c8   :  { %v1795_v11 = vpop.f32.mrf.mxu0  ;;  %v1835_v16 = vpop.f32.mrf.mxu1 }
 0x6c9   :  { %3011 = vpow2.f32 %v2344_v0  ;;  %v2345_v53 = vmul.f32 -1.442695, %v1845_v25 }
 0x6ca   :  { %v1796_v34 = vpop.f32.mrf.mxu0  ;;  %v2762_v29 = vpop.f32.mrf.mxu1 }
 0x6cb   :  { %3013 = vpow2.f32 %v2345_v53 }
 0x6d6   :  { %v3012_v50 = vpop.eup %3011 }
 0x6d7   :  { %v1842_v6 = vadd.f32 1.0, %v3012_v50 }
 0x6d8   :  { %v3014_v3 = vpop.eup %3013 }
 0x6d9   :  { %3015 = vrcp.f32 %v1842_v6  ;;  %v1849_v36 = vadd.f32 1.0, %v3014_v3  ;;  %v1868_v6 = vunpack.c.l.bf16 %v4286_v28  ;;  %v2087_v3 = vld [vmem:[%s4448_s1] sm:$0xff] }
 0x6db   :  { %3017 = vrcp.f32 %v1849_v36  ;;  %v2089_v36 = vunpack.c.l.bf16 %v2087_v3 }
 0x6e4   :  { %v1903_v7 = vpop.f32.mrf.mxu0  ;;  %v1944_v38 = vpop.f32.mrf.mxu1 }
 0x6e5   :  { %v1950_v43 = vadd.f32 %v1903_v7, %v1866_v54  ;;  %v2353_v7 = vld [vmem:[%s4447_s0 + $0x5c] sm:$0xf] }
 0x6e6   :  { %v3016_v44 = vpop.eup %3015  ;;  %v1905_v45 = vpop.f32.mrf.mxu0 }
 0x6e7   :  { %v2781_v46 = vpop.f32.mrf.mxu1  ;;  %v1853_v47 = vmul.f32 %v3016_v44, %v1852_v42  ;;  %v2349_v48 = vmul.f32 -1.442695, %v1950_v43  ;;  %v1957_v13 = vadd.f32 %v1905_v45, %v1867_v49  ;;  %v1980_v42 = vunpack.c.l.bf16 %v2353_v7 }
 0x6e8   :  { %v1907_v5 = vpop.f32.mrf.mxu0  ;;  %v3018_v0 = vpop.eup %3017 }
 0x6e9   :  { %v1947_v8 = vpop.f32.mrf.mxu1  ;;  %v1854_v63 = vadd.f32 %v1853_v47, %v1756_v40  ;;  %3019 = vpow2.f32 %v2349_v48  ;;  %v2350_v24 = vmul.f32 -1.442695, %v1957_v13  ;;  %v1856_v11 = vsub.f32 1.0, %v3018_v0 }
 0x6ea   :  { %v1908_v2 = vpop.f32.mrf.mxu0  ;;  %v1858_v29 = vmul.f32 %v3018_v0, %v4272_v30  ;;  %v2090_v5 = vunpack.c.h.bf16 %v2087_v3 }
 0x6eb   :  { %v2782_v62 = vpop.f32.mrf.mxu1  ;;  %3021 = vtanh.f32 %v1854_v63 }
 0x6ec   :  { %3023 = vpow2.f32 %v2350_v24 }
 0x6f6   :  { %v3020_v4 = vpop.eup %3019 }
 0x6f7   :  { %v1954_v23 = vadd.f32 1.0, %v3020_v4 }
 0x6f8   :  { %v3022_v16 = vpop.eup %3021 }
 0x6f9   :  { %3025 = vrcp.f32 %v1954_v23  ;;  %v1857_v34 = vmul.f32 %v3022_v16, %v1856_v11  ;;  %v3024_v50 = vpop.eup %3023 }
 0x6fa   :  { %v1961_v30 = vadd.f32 1.0, %v3024_v50 }
 0x6fb   :  { %v4373_v25 = vadd.f32 %v1858_v29, %v1857_v34 }
 0x6fc   :  { %3027 = vrcp.f32 %v1961_v30 }
 0x6fd   :  { %v1860_v53 = vpack.c.bf16 %v4373_v25, %v4373_v25 }
 0x6ff   :  { %2346 = vst [vmem:[%s4450_s6 + $0x18] sm:$0xf] %v1860_v53  ;;  %2014 = vmatmul.mubr.bf16.vlgmr.msra.gmra.mxu0 %v1860_v53  ;;  %2800 = vmatmul.mubr.bf16.vlgmr.msra.gmra.mxu1 %v1860_v53 }
 0x700   :  { %2093 = vmatpush1.bf16.msra.mxu0 %v3955_v14  ;;  %2804 = vmatpush3.bf16.msra.mxu1 %v3961_v57  ;;  %v1964_v14 = vadd.f32 %v4186_v52, %v1944_v38 }
 0x701   :  { %2094 = vmatprep.subr.bf16.mxu0 %v3967_v21  ;;  %2805 = vmatprep.subr.bf16.mxu1 %v4523_v20 }
 0x702   :  { %2124 = vmatprep.mubr.bf16.mxu0 %v4524_v51  ;;  %2819 = vmatprep.mubr.msk.bf16.mxu1 %vm3103_vm0, %v4523_v20 }
 0x704   :  { %2095 = vmatpush1.bf16.msra.mxu0 %v3982_v56  ;;  %2806 = vmatpush3.bf16.msra.mxu1 %v3988_v17 }
 0x705   :  { %2096 = vmatprep.subr.bf16.mxu0 %v3996_v22  ;;  %2807 = vmatprep.subr.bf16.mxu1 %v4523_v20 }
 0x706   :  { %v3026_v57 = vpop.eup %3025 }
 0x707   :  { %v1965_v21 = vmul.f32 %v3026_v57, %v1964_v14 }
 0x708   :  { %2097 = vmatpush1.bf16.msra.mxu0 %v4003_v32  ;;  %2808 = vmatpush3.bf16.msra.mxu1 %v4009_v19 }
 0x709   :  { %v1966_v51 = vadd.f32 %v1965_v21, %v1868_v6  ;;  %2098 = vmatprep.subr.bf16.mxu0 %v4015_v33  ;;  %2809 = vmatprep.subr.bf16.mxu1 %v4523_v20  ;;  %v3028_v56 = vpop.eup %3027  ;;  %v2088_v6 = vld [vmem:[%s4448_s1 + $0x8] sm:$0xf] }
 0x70a   :  { %v1968_v17 = vsub.f32 1.0, %v3028_v56  ;;  %v1970_v19 = vmul.f32 %v3028_v56, %v4318_v61  ;;  %v2091_v57 = vunpack.c.l.bf16 %v2088_v6 }
 0x70b   :  { %3029 = vtanh.f32 %v1966_v51 }
 0x70c   :  { %2099 = vmatpush1.bf16.msra.mxu0 %v4022_v35  ;;  %2810 = vmatpush3.bf16.msra.mxu1 %v4028_v37 }
 0x70d   :  { %2100 = vmatprep.subr.bf16.mxu0 %v4034_v9  ;;  %2811 = vmatprep.subr.bf16.mxu1 %v4523_v20 }
 0x710   :  { %2101 = vmatpush1.bf16.msra.mxu0 %v4041_v10  ;;  %2812 = vmatpush3.bf16.msra.mxu1 %v4047_v12 }
 0x711   :  { %2102 = vmatprep.subr.bf16.mxu0 %v4053_v18  ;;  %2813 = vmatprep.subr.bf16.mxu1 %v4523_v20 }
 0x714   :  { %2103 = vmatpush1.bf16.msra.mxu0 %v4060_v55  ;;  %2814 = vmatpush3.bf16.msra.mxu1 %v4066_v1 }
 0x715   :  { %2104 = vmatprep.subr.bf16.mxu0 %v4072_v59  ;;  %2815 = vmatprep.subr.bf16.mxu1 %v4523_v20 }
 0x718   :  { %v3030_v22 = vpop.eup %3029  ;;  %2105 = vmatpush1.bf16.msra.mxu0 %v4079_v60  ;;  %2816 = vmatpush3.bf16.msra.mxu1 %v4085_v31 }
 0x719   :  { %2106 = vmatprep.subr.bf16.mxu0 %v4091_v27  ;;  %2817 = vmatprep.subr.bf16.mxu1 %v4523_v20  ;;  %v1969_v32 = vmul.f32 %v3030_v22, %v1968_v17  ;;  %v2352_v20 = vld [vmem:[%s4447_s0 + $0x54] sm:$0xff] }
 0x71a   :  { %v1978_v37 = vunpack.c.l.bf16 %v2352_v20  ;;  %v1979_v59 = vunpack.c.h.bf16 %v2352_v20 }
 0x71b   :  { %v4414_v33 = vadd.f32 %v1970_v19, %v1969_v32 }
 0x71c   :  { %2107 = vmatpush1.bf16.msra.mxu0 %v4101_v58  ;;  %2818 = vmatpush3.bf16.msra.mxu1 %v4107_v26 }
 0x71d   :  { %v1972_v35 = vpack.c.bf16 %v4414_v33, %v4414_v33 }
 0x71f   :  { %2351 = vst [vmem:[%s4452_s7 + $0x4] sm:$0xf] %v1972_v35  ;;  %2125 = vmatmul.mubr.bf16.vlgmr.msra.gmra.mxu0 %v1972_v35  ;;  %2820 = vmatmul.mubr.bf16.vlgmr.msra.gmra.mxu1 %v1972_v35 }
 0x7bf   :  { %v2015_v9 = vpop.f32.mrf.mxu0  ;;  %v2056_v10 = vpop.f32.mrf.mxu1 }
 0x7c0   :  { %v2062_v12 = vadd.f32 %v2015_v9, %v1978_v37  ;;  %v2076_v43 = vadd.f32 %v4592_v41, %v2056_v10 }
 0x7c1   :  { %v2017_v18 = vpop.f32.mrf.mxu0  ;;  %v2801_v55 = vpop.f32.mrf.mxu1 }
 0x7c2   :  { %v2354_v1 = vmul.f32 -1.442695, %v2062_v12  ;;  %v2069_v26 = vadd.f32 %v2017_v18, %v1979_v59 }
 0x7c3   :  { %v2019_v60 = vpop.f32.mrf.mxu0  ;;  %v2059_v31 = vpop.f32.mrf.mxu1 }
 0x7c4   :  { %3031 = vpow2.f32 %v2354_v1  ;;  %v2355_v28 = vmul.f32 -1.442695, %v2069_v26 }
 0x7c5   :  { %v2020_v27 = vpop.f32.mrf.mxu0  ;;  %v2802_v58 = vpop.f32.mrf.mxu1 }
 0x7c6   :  { %3033 = vpow2.f32 %v2355_v28 }
 0x7d1   :  { %v3032_v61 = vpop.eup %3031 }
 0x7d2   :  { %v2066_v15 = vadd.f32 1.0, %v3032_v61 }
 0x7d3   :  { %v3034_v54 = vpop.eup %3033 }
 0x7d4   :  { %3035 = vrcp.f32 %v2066_v15  ;;  %v2073_v38 = vadd.f32 1.0, %v3034_v54 }
 0x7d6   :  { %3037 = vrcp.f32 %v2073_v38 }
 0x7df   :  { %v2126_v39 = vpop.f32.mrf.mxu0  ;;  %v2167_v40 = vpop.f32.mrf.mxu1 }
 0x7e0   :  { %v2173_v44 = vadd.f32 %v2126_v39, %v2089_v36  ;;  %v2187_v21 = vadd.f32 %v4186_v52, %v2167_v40 }
 0x7e1   :  { %v3036_v45 = vpop.eup %3035  ;;  %v2128_v46 = vpop.f32.mrf.mxu0 }
 0x7e2   :  { %v2821_v47 = vpop.f32.mrf.mxu1  ;;  %v2077_v48 = vmul.f32 %v3036_v45, %v2076_v43  ;;  %v2357_v49 = vmul.f32 -1.442695, %v2173_v44  ;;  %v2180_v24 = vadd.f32 %v2128_v46, %v2090_v5 }
 0x7e3   :  { %v2130_v8 = vpop.f32.mrf.mxu0  ;;  %v3038_v4 = vpop.eup %3037 }
 0x7e4   :  { %v2170_v63 = vpop.f32.mrf.mxu1  ;;  %v2078_v2 = vadd.f32 %v2077_v48, %v1980_v42  ;;  %3039 = vpow2.f32 %v2357_v49  ;;  %v2358_v0 = vmul.f32 -1.442695, %v2180_v24  ;;  %v2080_v23 = vsub.f32 1.0, %v3038_v4 }
 0x7e5   :  { %v2131_v62 = vpop.f32.mrf.mxu0  ;;  %v2082_v29 = vmul.f32 %v3038_v4, %v4373_v25 }
 0x7e6   :  { %v2822_v13 = vpop.f32.mrf.mxu1  ;;  %3041 = vtanh.f32 %v2078_v2 }
 0x7e7   :  { %3043 = vpow2.f32 %v2358_v0 }
 0x7f1   :  { %v3040_v41 = vpop.eup %3039 }
 0x7f2   :  { %v2177_v11 = vadd.f32 1.0, %v3040_v41 }
 0x7f3   :  { %v3042_v16 = vpop.eup %3041 }
 0x7f4   :  { %v2081_v34 = vmul.f32 %v3042_v16, %v2080_v23  ;;  %3045 = vrcp.f32 %v2177_v11  ;;  %v3044_v30 = vpop.eup %3043 }
 0x7f5   :  { %v2184_v14 = vadd.f32 1.0, %v3044_v30 }
 0x7f6   :  { %v2083_v53 = vadd.f32 %v2082_v29, %v2081_v34 }
 0x7f7   :  { %3047 = vrcp.f32 %v2184_v14 }
 0x7f8   :  { %v2084_v50 = vpack.c.bf16 %v2083_v53, %v2083_v53 }
 0x7fa   :  { %2356 = vst [vmem:[%s4450_s6 + $0x1c] sm:$0xf] %v2084_v50 }
 0x801   :  { %v3046_v51 = vpop.eup %3045 }
 0x802   :  { %v2188_v56 = vmul.f32 %v3046_v51, %v2187_v21 }
 0x804   :  { %v2189_v25 = vadd.f32 %v2188_v56, %v2091_v57  ;;  %v3048_v17 = vpop.eup %3047 }
 0x805   :  { %v2191_v22 = vsub.f32 1.0, %v3048_v17  ;;  %v2193_v35 = vmul.f32 %v3048_v17, %v4414_v33 }
 0x806   :  { %3049 = vtanh.f32 %v2189_v25 }
 0x813   :  { %v3050_v32 = vpop.eup %3049 }
 0x814   :  { %v2192_v19 = vmul.f32 %v3050_v32, %v2191_v22 }
 0x816   :  { %v2194_v20 = vadd.f32 %v2193_v35, %v2192_v19 }
 0x818   :  { %v2195_v37 = vpack.c.bf16 %v2194_v20, %v2194_v20 }
 0x81a   :  { %2196 = vst [vmem:[%s4452_s7] sm:$0xf] %v2195_v37 }

</bundles_post_ra>
